<compile_context>
chip_gen: v7x
topology: tpu7x:2x2x1
jax: 0.10.0
libtpu: 0.0.40
codegen_flags: <defaults>
</compile_context>

<pallas_src>
import functools
import math
import numpy as np
import jax
import jax.numpy as jnp
from jax.experimental import pallas as pl
from jax.experimental.pallas import tpu as pltpu


# ----------------------------- kernel helpers ------------------------------

def _torch_norm(x, alpha, bias, eps):
    # torch-style Norm: alpha*(x-mean)/(std+eps)+bias with UNBIASED std (N-1).
    D = x.shape[-1]
    mean = jnp.mean(x, axis=-1, keepdims=True)
    var = jnp.sum((x - mean) ** 2, axis=-1, keepdims=True) * (1.0 / (D - 1))
    return alpha * (x - mean) / (jnp.sqrt(var) + eps) + bias


# ----------------------------- fused stack kernel ---------------------------

def _decoder_stack_kernel(emb_ref, pe_ref, mask_ref,
                          n1a_ref, n1b_ref, wqkv_ref, bqkv_ref, wo_ref, bo_ref,
                          n2a_ref, n2b_ref, w1_ref, b1_ref, w2_ref, b2_ref,
                          nfa_ref, nfb_ref, o_ref,
                          *, n_layers, heads, d_k, eps, scale):
    """Whole decoder stack for the whole batch in one VMEM-resident kernel."""
    f32 = jnp.float32
    B, S, D = emb_ref.shape

    # Prologue fused in: embedding scale + positional encoding add.
    x3 = emb_ref[...] * f32(scale) + pe_ref[...]            # (B, S, D)
    x = x3.reshape(B * S, D)                                 # lane dim intact

    # Hoist the mask compare out of all layer/head loops (computed once).
    mask_is_zero = mask_ref[...] == 0                        # (B, S, S) bool
    neg_big = f32(-1000000000.0)
    inv_sqrt_dk = f32(1.0 / math.sqrt(d_k))

    for l in range(n_layers):                 # N is small/static -> unrolled
        # ---------------- self-attention sub-block ----------------
        xn = _torch_norm(x, n1a_ref[l], n1b_ref[l], eps)     # (B*S, D)
        # Fused Q/K/V projection: single MXU pass over the (D, 3D) weight.
        qkv = (jnp.dot(xn, wqkv_ref[l], preferred_element_type=f32)
               + bqkv_ref[l]).reshape(B, S, 3 * D)

        heads_out = []
        for h in range(heads):
            lo = h * d_k
            qh = qkv[:, :, lo:lo + d_k]                      # (B, S, d_k)
            kh = qkv[:, :, D + lo:D + lo + d_k]
            vh = qkv[:, :, 2 * D + lo:2 * D + lo + d_k]
            # Batched over B in one dot_general (proven 'bqd,bkd->bqk' form).
            s = jnp.einsum('bqd,bkd->bqk', qh, kh,
                           preferred_element_type=f32) * inv_sqrt_dk
            # Exact masked_fill semantics (compare hoisted above).
            s = jnp.where(mask_is_zero, neg_big, s)
            s = s - jnp.max(s, axis=-1, keepdims=True)
            p = jnp.exp(s)
            p = p / jnp.sum(p, axis=-1, keepdims=True)       # exact divide
            oh = jnp.einsum('bqk,bkd->bqd', p, vh,
                            preferred_element_type=f32)      # (B, S, d_k)
            heads_out.append(oh)

        # concat(heads) then ONE (B*S, D) @ (D, D) output projection.
        concat = jnp.concatenate(heads_out, axis=-1).reshape(B * S, D)
        attn = jnp.dot(concat, wo_ref[l],
                       preferred_element_type=f32) + bo_ref[l]
        x = x + attn                                         # residual

        # ---------------- feed-forward sub-block ----------------
        xn = _torch_norm(x, n2a_ref[l], n2b_ref[l], eps)
        hid = jnp.dot(xn, w1_ref[l], preferred_element_type=f32) + b1_ref[l]
        hid = jnp.maximum(hid, 0.0)
        y = jnp.dot(hid, w2_ref[l], preferred_element_type=f32) + b2_ref[l]
        x = x + y                                            # residual

    # Final norm fused in (no separate launch).
    o_ref[...] = _torch_norm(x, nfa_ref[...], nfb_ref[...], eps).reshape(B, S, D)


# ----------------------------- kernel wrapper --------------------------------

def decoder_stack(emb, pe, mask, p, *, d_model, heads, n_layers, eps=1e-6):
    B, S, D = emb.shape
    kernel = functools.partial(
        _decoder_stack_kernel, n_layers=n_layers, heads=heads,
        d_k=d_model // heads, eps=eps, scale=math.sqrt(d_model))
    # No grid: one invocation, every operand whole-array resident in VMEM
    # (total ~1.1 MB weights + tiny activations at these shapes).
    return pl.pallas_call(
        kernel,
        out_shape=jax.ShapeDtypeStruct((B, S, D), jnp.float32),
        compiler_params=pltpu.CompilerParams(
            vmem_limit_bytes=32 * 1024 * 1024),
    )(emb, pe, mask,
      p["n1a"], p["n1b"], p["wqkv"], p["bqkv"], p["wo"], p["bo"],
      p["n2a"], p["n2b"], p["w1"], p["b1"], p["w2"], p["b2"],
      p["norm_a"], p["norm_b"])


# ----------------------------- model wiring ----------------------------------

def make_pe_table(max_seq_len, d_model):
    # Exact reproduction of the (slightly unusual) PyTorch loop.
    pe = np.zeros((max_seq_len, d_model), dtype=np.float32)
    for pos in range(max_seq_len):
        for i in range(0, d_model, 2):
            pe[pos, i] = math.sin(pos / 10000 ** (2 * i / d_model))
            pe[pos, i + 1] = math.cos(pos / 10000 ** (2 * (i + 1) / d_model))
    return jnp.asarray(pe)


def init_decoder_params(key, vocab_size, d_model, n_layers, seqlen, d_ff=2048):
    def nxt():
        nonlocal key
        key, sub = jax.random.split(key)
        return sub

    def w(shape, scale=0.02):
        return jax.random.normal(nxt(), shape, jnp.float32) * scale

    D = d_model
    params = {
        "embed": jax.random.normal(nxt(), (vocab_size, D), jnp.float32),
        "pe": make_pe_table(seqlen, D)[None],                 # (1, S, D)
        "norm_a": jnp.ones((1, D), jnp.float32),
        "norm_b": jnp.zeros((1, D), jnp.float32),
        # Per-layer params stacked along a leading layer axis so the whole
        # stack is a single pallas_call; Wq/Wk/Wv pre-fused at init time.
        "n1a": jnp.ones((n_layers, 1, D), jnp.float32),
        "n1b": jnp.zeros((n_layers, 1, D), jnp.float32),
        "n2a": jnp.ones((n_layers, 1, D), jnp.float32),
        "n2b": jnp.zeros((n_layers, 1, D), jnp.float32),
        "wqkv": w((n_layers, D, 3 * D)),
        "bqkv": w((n_layers, 1, 3 * D)),
        "wo": w((n_layers, D, D)),
        "bo": w((n_layers, 1, D)),
        "w1": w((n_layers, D, d_ff)),
        "b1": w((n_layers, 1, d_ff)),
        "w2": w((n_layers, d_ff, D)),
        "b2": w((n_layers, 1, D)),
    }
    return params


@functools.partial(jax.jit, static_argnames=("d_model", "heads", "n_layers"))
def decoder_forward(params, trg, trg_mask, d_model, heads, n_layers):
    # NOTE: all nn.Dropout layers are identity here (eval-mode semantics).
    B, S = trg.shape
    # Embedding gather is data-dependent -> JAX glue outside the kernel.
    emb = jnp.take(params["embed"], trg, axis=0)              # (B, S, D)
    pe = params["pe"][:, :S, :]                               # (1, S, D)
    mask = trg_mask.astype(jnp.int32)                         # (B, S, S)
    return decoder_stack(emb, pe, mask, params,
                         d_model=d_model, heads=heads, n_layers=n_layers)


# ------------------------------- main ----------------------------------------

if __name__ == "__main__":
    vocab_size = 50
    d_model = 32
    n_layers = 2
    heads = 4
    seqlen = 8
    batch = 2

    key = jax.random.PRNGKey(0)
    key, k_params, k_trg = jax.random.split(key, 3)

    params = init_decoder_params(k_params, vocab_size, d_model, n_layers, seqlen)

    trg = jax.random.randint(k_trg, (batch, seqlen), 0, vocab_size, dtype=jnp.int32)
    # causal target mask, (B, S, S), 1 = attend, 0 = masked
    trg_mask = jnp.broadcast_to(
        jnp.tril(jnp.ones((seqlen, seqlen), jnp.int32)),
        (batch, seqlen, seqlen))

    out = decoder_forward(params, trg, trg_mask, d_model, heads, n_layers)
    out = jax.block_until_ready(out)
    assert out.shape == (batch, seqlen, d_model)
    assert bool(jnp.all(jnp.isfinite(out)))
    print("KERNEL_OK")
</pallas_src>

<mosaic_0001>
module attributes {stable_mosaic.version = 11 : i64} {
  func.func @_decoder_stack_kernel(%arg0: memref<2x8x32xf32, #tpu.memory_space<vmem>>, %arg1: memref<1x8x32xf32, #tpu.memory_space<vmem>>, %arg2: memref<2x8x8xi32, #tpu.memory_space<vmem>>, %arg3: memref<2x1x32xf32, #tpu.memory_space<vmem>>, %arg4: memref<2x1x32xf32, #tpu.memory_space<vmem>>, %arg5: memref<2x32x96xf32, #tpu.memory_space<vmem>>, %arg6: memref<2x1x96xf32, #tpu.memory_space<vmem>>, %arg7: memref<2x32x32xf32, #tpu.memory_space<vmem>>, %arg8: memref<2x1x32xf32, #tpu.memory_space<vmem>>, %arg9: memref<2x1x32xf32, #tpu.memory_space<vmem>>, %arg10: memref<2x1x32xf32, #tpu.memory_space<vmem>>, %arg11: memref<2x32x2048xf32, #tpu.memory_space<vmem>>, %arg12: memref<2x1x2048xf32, #tpu.memory_space<vmem>>, %arg13: memref<2x2048x32xf32, #tpu.memory_space<vmem>>, %arg14: memref<2x1x32xf32, #tpu.memory_space<vmem>>, %arg15: memref<1x32xf32, #tpu.memory_space<vmem>>, %arg16: memref<1x32xf32, #tpu.memory_space<vmem>>, %arg17: memref<2x8x32xf32, #tpu.memory_space<vmem>>) attributes {dimension_semantics = [], scalar_prefetch = 0 : i64, scratch_operands = 0 : i64, tpu.core_type = #tpu.core_type<tc>} {
    %c0 = arith.constant 0 : index
    %c0_0 = arith.constant 0 : index
    %c0_1 = arith.constant 0 : index
    %0 = vector.load %arg0[%c0, %c0_0, %c0_1] : memref<2x8x32xf32, #tpu.memory_space<vmem>>, vector<2x8x32xf32>
    %cst = arith.constant 5.65685415 : f32
    %1 = vector.broadcast %cst : f32 to vector<2x8x32xf32>
    %2 = arith.mulf %0, %1 : vector<2x8x32xf32>
    %c0_2 = arith.constant 0 : index
    %c0_3 = arith.constant 0 : index
    %c0_4 = arith.constant 0 : index
    %3 = vector.load %arg1[%c0_2, %c0_3, %c0_4] : memref<1x8x32xf32, #tpu.memory_space<vmem>>, vector<1x8x32xf32>
    %4 = vector.broadcast %3 : vector<1x8x32xf32> to vector<2x8x32xf32>
    %5 = arith.addf %2, %4 : vector<2x8x32xf32>
    %6 = vector.shape_cast %5 : vector<2x8x32xf32> to vector<16x32xf32>
    %c0_5 = arith.constant 0 : index
    %c0_6 = arith.constant 0 : index
    %c0_7 = arith.constant 0 : index
    %7 = vector.load %arg2[%c0_5, %c0_6, %c0_7] : memref<2x8x8xi32, #tpu.memory_space<vmem>>, vector<2x8x8xi32>
    %c0_i32 = arith.constant 0 : i32
    %8 = vector.broadcast %c0_i32 : i32 to vector<2x8x8xi32>
    %9 = arith.cmpi eq, %7, %8 : vector<2x8x8xi32>
    %c0_8 = arith.constant 0 : index
    %c0_9 = arith.constant 0 : index
    %c0_10 = arith.constant 0 : index
    %10 = vector.load %arg3[%c0_8, %c0_9, %c0_10] : memref<2x1x32xf32, #tpu.memory_space<vmem>>, vector<1x1x32xf32>
    %11 = vector.shape_cast %10 : vector<1x1x32xf32> to vector<1x32xf32>
    %c0_11 = arith.constant 0 : index
    %c0_12 = arith.constant 0 : index
    %c0_13 = arith.constant 0 : index
    %12 = vector.load %arg4[%c0_11, %c0_12, %c0_13] : memref<2x1x32xf32, #tpu.memory_space<vmem>>, vector<1x1x32xf32>
    %13 = vector.shape_cast %12 : vector<1x1x32xf32> to vector<1x32xf32>
    %cst_14 = arith.constant dense<0.000000e+00> : vector<16xf32>
    %14 = vector.multi_reduction <add>, %6, %cst_14 [1] : vector<16x32xf32> to vector<16xf32>
    %15 = vector.shape_cast %14 : vector<16xf32> to vector<16x1xf32>
    %cst_15 = arith.constant 3.200000e+01 : f32
    %16 = vector.broadcast %cst_15 : f32 to vector<16x1xf32>
    %17 = arith.divf %15, %16 : vector<16x1xf32>
    %18 = vector.broadcast %17 : vector<16x1xf32> to vector<16x32xf32>
    %19 = arith.subf %6, %18 : vector<16x32xf32>
    %20 = arith.mulf %19, %19 : vector<16x32xf32>
    %cst_16 = arith.constant dense<0.000000e+00> : vector<16xf32>
    %21 = vector.multi_reduction <add>, %20, %cst_16 [1] : vector<16x32xf32> to vector<16xf32>
    %22 = vector.shape_cast %21 : vector<16xf32> to vector<16x1xf32>
    %cst_17 = arith.constant 0.0322580636 : f32
    %23 = vector.broadcast %cst_17 : f32 to vector<16x1xf32>
    %24 = arith.mulf %22, %23 : vector<16x1xf32>
    %25 = vector.broadcast %17 : vector<16x1xf32> to vector<16x32xf32>
    %26 = arith.subf %6, %25 : vector<16x32xf32>
    %27 = vector.broadcast %11 : vector<1x32xf32> to vector<16x32xf32>
    %28 = arith.mulf %27, %26 : vector<16x32xf32>
    %29 = math.sqrt %24 : vector<16x1xf32>
    %cst_18 = arith.constant 9.99999997E-7 : f32
    %30 = vector.broadcast %cst_18 : f32 to vector<16x1xf32>
    %31 = arith.addf %29, %30 : vector<16x1xf32>
    %32 = vector.broadcast %31 : vector<16x1xf32> to vector<16x32xf32>
    %33 = arith.divf %28, %32 : vector<16x32xf32>
    %34 = vector.broadcast %13 : vector<1x32xf32> to vector<16x32xf32>
    %35 = arith.addf %33, %34 : vector<16x32xf32>
    %c0_19 = arith.constant 0 : index
    %c0_20 = arith.constant 0 : index
    %c0_21 = arith.constant 0 : index
    %36 = vector.load %arg5[%c0_19, %c0_20, %c0_21] : memref<2x32x96xf32, #tpu.memory_space<vmem>>, vector<1x32x96xf32>
    %37 = vector.shape_cast %36 : vector<1x32x96xf32> to vector<32x96xf32>
    %cst_22 = arith.constant dense<0.000000e+00> : vector<16x96xf32>
    %38 = tpu.matmul %35, %37, %cst_22 {dimension_numbers = #tpu.dot_dimension_numbers<[1], [0], [0], [1], [0, 0, 1, 1], [], []>} : vector<16x32xf32>, vector<32x96xf32>, vector<16x96xf32> -> vector<16x96xf32>
    %c0_23 = arith.constant 0 : index
    %c0_24 = arith.constant 0 : index
    %c0_25 = arith.constant 0 : index
    %39 = vector.load %arg6[%c0_23, %c0_24, %c0_25] : memref<2x1x96xf32, #tpu.memory_space<vmem>>, vector<1x1x96xf32>
    %40 = vector.shape_cast %39 : vector<1x1x96xf32> to vector<1x96xf32>
    %41 = vector.broadcast %40 : vector<1x96xf32> to vector<16x96xf32>
    %42 = arith.addf %38, %41 : vector<16x96xf32>
    %43 = vector.shape_cast %42 : vector<16x96xf32> to vector<2x8x96xf32>
    %44 = vector.extract_strided_slice %43 {offsets = [0, 0, 0], sizes = [2, 8, 8], strides = [1, 1, 1]} : vector<2x8x96xf32> to vector<2x8x8xf32>
    %45 = vector.extract_strided_slice %43 {offsets = [0, 0, 32], sizes = [2, 8, 8], strides = [1, 1, 1]} : vector<2x8x96xf32> to vector<2x8x8xf32>
    %46 = vector.extract_strided_slice %43 {offsets = [0, 0, 64], sizes = [2, 8, 8], strides = [1, 1, 1]} : vector<2x8x96xf32> to vector<2x8x8xf32>
    "tpu.trace_start"() <{level = 10 : i32, message = "bqd,bkd->bqk"}> : () -> ()
    %cst_26 = arith.constant dense<0.000000e+00> : vector<2x8x8xf32>
    %47 = tpu.matmul %44, %45, %cst_26 {dimension_numbers = #tpu.dot_dimension_numbers<[2], [2], [1], [1], [0, 0, 0, 1, 1, 1], [0], [0]>} : vector<2x8x8xf32>, vector<2x8x8xf32>, vector<2x8x8xf32> -> vector<2x8x8xf32>
    "tpu.trace_stop"() : () -> ()
    %cst_27 = arith.constant 0.353553385 : f32
    %48 = vector.broadcast %cst_27 : f32 to vector<2x8x8xf32>
    %49 = arith.mulf %47, %48 : vector<2x8x8xf32>
    %cst_28 = arith.constant -1.000000e+09 : f32
    %50 = vector.broadcast %cst_28 : f32 to vector<2x8x8xf32>
    %51 = arith.select %9, %50, %49 : vector<2x8x8xi1>, vector<2x8x8xf32>
    %cst_29 = arith.constant dense<0xFF800000> : vector<2x8xf32>
    %52 = vector.multi_reduction <maximumf>, %51, %cst_29 [2] : vector<2x8x8xf32> to vector<2x8xf32>
    %53 = vector.shape_cast %52 : vector<2x8xf32> to vector<2x8x1xf32>
    %54 = vector.broadcast %53 : vector<2x8x1xf32> to vector<2x8x8xf32>
    %55 = arith.subf %51, %54 : vector<2x8x8xf32>
    %56 = math.exp %55 : vector<2x8x8xf32>
    %cst_30 = arith.constant dense<0.000000e+00> : vector<2x8xf32>
    %57 = vector.multi_reduction <add>, %56, %cst_30 [2] : vector<2x8x8xf32> to vector<2x8xf32>
    %58 = vector.shape_cast %57 : vector<2x8xf32> to vector<2x8x1xf32>
    %59 = vector.broadcast %58 : vector<2x8x1xf32> to vector<2x8x8xf32>
    %60 = arith.divf %56, %59 : vector<2x8x8xf32>
    "tpu.trace_start"() <{level = 10 : i32, message = "bqk,bkd->bqd"}> : () -> ()
    %cst_31 = arith.constant dense<0.000000e+00> : vector<2x8x8xf32>
    %61 = tpu.matmul %60, %46, %cst_31 {dimension_numbers = #tpu.dot_dimension_numbers<[2], [1], [1], [2], [0, 0, 0, 1, 1, 2], [0], [0]>} : vector<2x8x8xf32>, vector<2x8x8xf32>, vector<2x8x8xf32> -> vector<2x8x8xf32>
    "tpu.trace_stop"() : () -> ()
    %62 = vector.extract_strided_slice %43 {offsets = [0, 0, 8], sizes = [2, 8, 8], strides = [1, 1, 1]} : vector<2x8x96xf32> to vector<2x8x8xf32>
    %63 = vector.extract_strided_slice %43 {offsets = [0, 0, 40], sizes = [2, 8, 8], strides = [1, 1, 1]} : vector<2x8x96xf32> to vector<2x8x8xf32>
    %64 = vector.extract_strided_slice %43 {offsets = [0, 0, 72], sizes = [2, 8, 8], strides = [1, 1, 1]} : vector<2x8x96xf32> to vector<2x8x8xf32>
    "tpu.trace_start"() <{level = 10 : i32, message = "bqd,bkd->bqk"}> : () -> ()
    %cst_32 = arith.constant dense<0.000000e+00> : vector<2x8x8xf32>
    %65 = tpu.matmul %62, %63, %cst_32 {dimension_numbers = #tpu.dot_dimension_numbers<[2], [2], [1], [1], [0, 0, 0, 1, 1, 1], [0], [0]>} : vector<2x8x8xf32>, vector<2x8x8xf32>, vector<2x8x8xf32> -> vector<2x8x8xf32>
    "tpu.trace_stop"() : () -> ()
    %cst_33 = arith.constant 0.353553385 : f32
    %66 = vector.broadcast %cst_33 : f32 to vector<2x8x8xf32>
    %67 = arith.mulf %65, %66 : vector<2x8x8xf32>
    %cst_34 = arith.constant -1.000000e+09 : f32
    %68 = vector.broadcast %cst_34 : f32 to vector<2x8x8xf32>
    %69 = arith.select %9, %68, %67 : vector<2x8x8xi1>, vector<2x8x8xf32>
    %cst_35 = arith.constant dense<0xFF800000> : vector<2x8xf32>
    %70 = vector.multi_reduction <maximumf>, %69, %cst_35 [2] : vector<2x8x8xf32> to vector<2x8xf32>
    %71 = vector.shape_cast %70 : vector<2x8xf32> to vector<2x8x1xf32>
    %72 = vector.broadcast %71 : vector<2x8x1xf32> to vector<2x8x8xf32>
    %73 = arith.subf %69, %72 : vector<2x8x8xf32>
    %74 = math.exp %73 : vector<2x8x8xf32>
    %cst_36 = arith.constant dense<0.000000e+00> : vector<2x8xf32>
    %75 = vector.multi_reduction <add>, %74, %cst_36 [2] : vector<2x8x8xf32> to vector<2x8xf32>
    %76 = vector.shape_cast %75 : vector<2x8xf32> to vector<2x8x1xf32>
    %77 = vector.broadcast %76 : vector<2x8x1xf32> to vector<2x8x8xf32>
    %78 = arith.divf %74, %77 : vector<2x8x8xf32>
    "tpu.trace_start"() <{level = 10 : i32, message = "bqk,bkd->bqd"}> : () -> ()
    %cst_37 = arith.constant dense<0.000000e+00> : vector<2x8x8xf32>
    %79 = tpu.matmul %78, %64, %cst_37 {dimension_numbers = #tpu.dot_dimension_numbers<[2], [1], [1], [2], [0, 0, 0, 1, 1, 2], [0], [0]>} : vector<2x8x8xf32>, vector<2x8x8xf32>, vector<2x8x8xf32> -> vector<2x8x8xf32>
    "tpu.trace_stop"() : () -> ()
    %80 = vector.extract_strided_slice %43 {offsets = [0, 0, 16], sizes = [2, 8, 8], strides = [1, 1, 1]} : vector<2x8x96xf32> to vector<2x8x8xf32>
    %81 = vector.extract_strided_slice %43 {offsets = [0, 0, 48], sizes = [2, 8, 8], strides = [1, 1, 1]} : vector<2x8x96xf32> to vector<2x8x8xf32>
    %82 = vector.extract_strided_slice %43 {offsets = [0, 0, 80], sizes = [2, 8, 8], strides = [1, 1, 1]} : vector<2x8x96xf32> to vector<2x8x8xf32>
    "tpu.trace_start"() <{level = 10 : i32, message = "bqd,bkd->bqk"}> : () -> ()
    %cst_38 = arith.constant dense<0.000000e+00> : vector<2x8x8xf32>
    %83 = tpu.matmul %80, %81, %cst_38 {dimension_numbers = #tpu.dot_dimension_numbers<[2], [2], [1], [1], [0, 0, 0, 1, 1, 1], [0], [0]>} : vector<2x8x8xf32>, vector<2x8x8xf32>, vector<2x8x8xf32> -> vector<2x8x8xf32>
    "tpu.trace_stop"() : () -> ()
    %cst_39 = arith.constant 0.353553385 : f32
    %84 = vector.broadcast %cst_39 : f32 to vector<2x8x8xf32>
    %85 = arith.mulf %83, %84 : vector<2x8x8xf32>
    %cst_40 = arith.constant -1.000000e+09 : f32
    %86 = vector.broadcast %cst_40 : f32 to vector<2x8x8xf32>
    %87 = arith.select %9, %86, %85 : vector<2x8x8xi1>, vector<2x8x8xf32>
    %cst_41 = arith.constant dense<0xFF800000> : vector<2x8xf32>
    %88 = vector.multi_reduction <maximumf>, %87, %cst_41 [2] : vector<2x8x8xf32> to vector<2x8xf32>
    %89 = vector.shape_cast %88 : vector<2x8xf32> to vector<2x8x1xf32>
    %90 = vector.broadcast %89 : vector<2x8x1xf32> to vector<2x8x8xf32>
    %91 = arith.subf %87, %90 : vector<2x8x8xf32>
    %92 = math.exp %91 : vector<2x8x8xf32>
    %cst_42 = arith.constant dense<0.000000e+00> : vector<2x8xf32>
    %93 = vector.multi_reduction <add>, %92, %cst_42 [2] : vector<2x8x8xf32> to vector<2x8xf32>
    %94 = vector.shape_cast %93 : vector<2x8xf32> to vector<2x8x1xf32>
    %95 = vector.broadcast %94 : vector<2x8x1xf32> to vector<2x8x8xf32>
    %96 = arith.divf %92, %95 : vector<2x8x8xf32>
    "tpu.trace_start"() <{level = 10 : i32, message = "bqk,bkd->bqd"}> : () -> ()
    %cst_43 = arith.constant dense<0.000000e+00> : vector<2x8x8xf32>
    %97 = tpu.matmul %96, %82, %cst_43 {dimension_numbers = #tpu.dot_dimension_numbers<[2], [1], [1], [2], [0, 0, 0, 1, 1, 2], [0], [0]>} : vector<2x8x8xf32>, vector<2x8x8xf32>, vector<2x8x8xf32> -> vector<2x8x8xf32>
    "tpu.trace_stop"() : () -> ()
    %98 = vector.extract_strided_slice %43 {offsets = [0, 0, 24], sizes = [2, 8, 8], strides = [1, 1, 1]} : vector<2x8x96xf32> to vector<2x8x8xf32>
    %99 = vector.extract_strided_slice %43 {offsets = [0, 0, 56], sizes = [2, 8, 8], strides = [1, 1, 1]} : vector<2x8x96xf32> to vector<2x8x8xf32>
    %100 = vector.extract_strided_slice %43 {offsets = [0, 0, 88], sizes = [2, 8, 8], strides = [1, 1, 1]} : vector<2x8x96xf32> to vector<2x8x8xf32>
    "tpu.trace_start"() <{level = 10 : i32, message = "bqd,bkd->bqk"}> : () -> ()
    %cst_44 = arith.constant dense<0.000000e+00> : vector<2x8x8xf32>
    %101 = tpu.matmul %98, %99, %cst_44 {dimension_numbers = #tpu.dot_dimension_numbers<[2], [2], [1], [1], [0, 0, 0, 1, 1, 1], [0], [0]>} : vector<2x8x8xf32>, vector<2x8x8xf32>, vector<2x8x8xf32> -> vector<2x8x8xf32>
    "tpu.trace_stop"() : () -> ()
    %cst_45 = arith.constant 0.353553385 : f32
    %102 = vector.broadcast %cst_45 : f32 to vector<2x8x8xf32>
    %103 = arith.mulf %101, %102 : vector<2x8x8xf32>
    %cst_46 = arith.constant -1.000000e+09 : f32
    %104 = vector.broadcast %cst_46 : f32 to vector<2x8x8xf32>
    %105 = arith.select %9, %104, %103 : vector<2x8x8xi1>, vector<2x8x8xf32>
    %cst_47 = arith.constant dense<0xFF800000> : vector<2x8xf32>
    %106 = vector.multi_reduction <maximumf>, %105, %cst_47 [2] : vector<2x8x8xf32> to vector<2x8xf32>
    %107 = vector.shape_cast %106 : vector<2x8xf32> to vector<2x8x1xf32>
    %108 = vector.broadcast %107 : vector<2x8x1xf32> to vector<2x8x8xf32>
    %109 = arith.subf %105, %108 : vector<2x8x8xf32>
    %110 = math.exp %109 : vector<2x8x8xf32>
    %cst_48 = arith.constant dense<0.000000e+00> : vector<2x8xf32>
    %111 = vector.multi_reduction <add>, %110, %cst_48 [2] : vector<2x8x8xf32> to vector<2x8xf32>
    %112 = vector.shape_cast %111 : vector<2x8xf32> to vector<2x8x1xf32>
    %113 = vector.broadcast %112 : vector<2x8x1xf32> to vector<2x8x8xf32>
    %114 = arith.divf %110, %113 : vector<2x8x8xf32>
    "tpu.trace_start"() <{level = 10 : i32, message = "bqk,bkd->bqd"}> : () -> ()
    %cst_49 = arith.constant dense<0.000000e+00> : vector<2x8x8xf32>
    %115 = tpu.matmul %114, %100, %cst_49 {dimension_numbers = #tpu.dot_dimension_numbers<[2], [1], [1], [2], [0, 0, 0, 1, 1, 2], [0], [0]>} : vector<2x8x8xf32>, vector<2x8x8xf32>, vector<2x8x8xf32> -> vector<2x8x8xf32>
    "tpu.trace_stop"() : () -> ()
    %116 = tpu.concatenate %61, %79, %97, %115 in 2 : vector<2x8x8xf32>, vector<2x8x8xf32>, vector<2x8x8xf32>, vector<2x8x8xf32> -> vector<2x8x32xf32>
    %117 = vector.shape_cast %116 : vector<2x8x32xf32> to vector<16x32xf32>
    %c0_50 = arith.constant 0 : index
    %c0_51 = arith.constant 0 : index
    %c0_52 = arith.constant 0 : index
    %118 = vector.load %arg7[%c0_50, %c0_51, %c0_52] : memref<2x32x32xf32, #tpu.memory_space<vmem>>, vector<1x32x32xf32>
    %119 = vector.shape_cast %118 : vector<1x32x32xf32> to vector<32x32xf32>
    %cst_53 = arith.constant dense<0.000000e+00> : vector<16x32xf32>
    %120 = tpu.matmul %117, %119, %cst_53 {dimension_numbers = #tpu.dot_dimension_numbers<[1], [0], [0], [1], [0, 0, 1, 1], [], []>} : vector<16x32xf32>, vector<32x32xf32>, vector<16x32xf32> -> vector<16x32xf32>
    %c0_54 = arith.constant 0 : index
    %c0_55 = arith.constant 0 : index
    %c0_56 = arith.constant 0 : index
    %121 = vector.load %arg8[%c0_54, %c0_55, %c0_56] : memref<2x1x32xf32, #tpu.memory_space<vmem>>, vector<1x1x32xf32>
    %122 = vector.shape_cast %121 : vector<1x1x32xf32> to vector<1x32xf32>
    %123 = vector.broadcast %122 : vector<1x32xf32> to vector<16x32xf32>
    %124 = arith.addf %120, %123 : vector<16x32xf32>
    %125 = arith.addf %6, %124 : vector<16x32xf32>
    %c0_57 = arith.constant 0 : index
    %c0_58 = arith.constant 0 : index
    %c0_59 = arith.constant 0 : index
    %126 = vector.load %arg9[%c0_57, %c0_58, %c0_59] : memref<2x1x32xf32, #tpu.memory_space<vmem>>, vector<1x1x32xf32>
    %127 = vector.shape_cast %126 : vector<1x1x32xf32> to vector<1x32xf32>
    %c0_60 = arith.constant 0 : index
    %c0_61 = arith.constant 0 : index
    %c0_62 = arith.constant 0 : index
    %128 = vector.load %arg10[%c0_60, %c0_61, %c0_62] : memref<2x1x32xf32, #tpu.memory_space<vmem>>, vector<1x1x32xf32>
    %129 = vector.shape_cast %128 : vector<1x1x32xf32> to vector<1x32xf32>
    %cst_63 = arith.constant dense<0.000000e+00> : vector<16xf32>
    %130 = vector.multi_reduction <add>, %125, %cst_63 [1] : vector<16x32xf32> to vector<16xf32>
    %131 = vector.shape_cast %130 : vector<16xf32> to vector<16x1xf32>
    %cst_64 = arith.constant 3.200000e+01 : f32
    %132 = vector.broadcast %cst_64 : f32 to vector<16x1xf32>
    %133 = arith.divf %131, %132 : vector<16x1xf32>
    %134 = vector.broadcast %133 : vector<16x1xf32> to vector<16x32xf32>
    %135 = arith.subf %125, %134 : vector<16x32xf32>
    %136 = arith.mulf %135, %135 : vector<16x32xf32>
    %cst_65 = arith.constant dense<0.000000e+00> : vector<16xf32>
    %137 = vector.multi_reduction <add>, %136, %cst_65 [1] : vector<16x32xf32> to vector<16xf32>
    %138 = vector.shape_cast %137 : vector<16xf32> to vector<16x1xf32>
    %cst_66 = arith.constant 0.0322580636 : f32
    %139 = vector.broadcast %cst_66 : f32 to vector<16x1xf32>
    %140 = arith.mulf %138, %139 : vector<16x1xf32>
    %141 = vector.broadcast %133 : vector<16x1xf32> to vector<16x32xf32>
    %142 = arith.subf %125, %141 : vector<16x32xf32>
    %143 = vector.broadcast %127 : vector<1x32xf32> to vector<16x32xf32>
    %144 = arith.mulf %143, %142 : vector<16x32xf32>
    %145 = math.sqrt %140 : vector<16x1xf32>
    %cst_67 = arith.constant 9.99999997E-7 : f32
    %146 = vector.broadcast %cst_67 : f32 to vector<16x1xf32>
    %147 = arith.addf %145, %146 : vector<16x1xf32>
    %148 = vector.broadcast %147 : vector<16x1xf32> to vector<16x32xf32>
    %149 = arith.divf %144, %148 : vector<16x32xf32>
    %150 = vector.broadcast %129 : vector<1x32xf32> to vector<16x32xf32>
    %151 = arith.addf %149, %150 : vector<16x32xf32>
    %c0_68 = arith.constant 0 : index
    %c0_69 = arith.constant 0 : index
    %c0_70 = arith.constant 0 : index
    %152 = vector.load %arg11[%c0_68, %c0_69, %c0_70] : memref<2x32x2048xf32, #tpu.memory_space<vmem>>, vector<1x32x2048xf32>
    %153 = vector.shape_cast %152 : vector<1x32x2048xf32> to vector<32x2048xf32>
    %cst_71 = arith.constant dense<0.000000e+00> : vector<16x2048xf32>
    %154 = tpu.matmul %151, %153, %cst_71 {dimension_numbers = #tpu.dot_dimension_numbers<[1], [0], [0], [1], [0, 0, 1, 1], [], []>} : vector<16x32xf32>, vector<32x2048xf32>, vector<16x2048xf32> -> vector<16x2048xf32>
    %c0_72 = arith.constant 0 : index
    %c0_73 = arith.constant 0 : index
    %c0_74 = arith.constant 0 : index
    %155 = vector.load %arg12[%c0_72, %c0_73, %c0_74] : memref<2x1x2048xf32, #tpu.memory_space<vmem>>, vector<1x1x2048xf32>
    %156 = vector.shape_cast %155 : vector<1x1x2048xf32> to vector<1x2048xf32>
    %157 = vector.broadcast %156 : vector<1x2048xf32> to vector<16x2048xf32>
    %158 = arith.addf %154, %157 : vector<16x2048xf32>
    %cst_75 = arith.constant 0.000000e+00 : f32
    %159 = vector.broadcast %cst_75 : f32 to vector<16x2048xf32>
    %160 = arith.maximumf %158, %159 : vector<16x2048xf32>
    %c0_76 = arith.constant 0 : index
    %c0_77 = arith.constant 0 : index
    %c0_78 = arith.constant 0 : index
    %161 = vector.load %arg13[%c0_76, %c0_77, %c0_78] : memref<2x2048x32xf32, #tpu.memory_space<vmem>>, vector<1x2048x32xf32>
    %162 = vector.shape_cast %161 : vector<1x2048x32xf32> to vector<2048x32xf32>
    %cst_79 = arith.constant dense<0.000000e+00> : vector<16x32xf32>
    %163 = tpu.matmul %160, %162, %cst_79 {dimension_numbers = #tpu.dot_dimension_numbers<[1], [0], [0], [1], [0, 0, 1, 1], [], []>} : vector<16x2048xf32>, vector<2048x32xf32>, vector<16x32xf32> -> vector<16x32xf32>
    %c0_80 = arith.constant 0 : index
    %c0_81 = arith.constant 0 : index
    %c0_82 = arith.constant 0 : index
    %164 = vector.load %arg14[%c0_80, %c0_81, %c0_82] : memref<2x1x32xf32, #tpu.memory_space<vmem>>, vector<1x1x32xf32>
    %165 = vector.shape_cast %164 : vector<1x1x32xf32> to vector<1x32xf32>
    %166 = vector.broadcast %165 : vector<1x32xf32> to vector<16x32xf32>
    %167 = arith.addf %163, %166 : vector<16x32xf32>
    %168 = arith.addf %125, %167 : vector<16x32xf32>
    %c1 = arith.constant 1 : index
    %c0_83 = arith.constant 0 : index
    %c0_84 = arith.constant 0 : index
    %169 = vector.load %arg3[%c1, %c0_83, %c0_84] : memref<2x1x32xf32, #tpu.memory_space<vmem>>, vector<1x1x32xf32>
    %170 = vector.shape_cast %169 : vector<1x1x32xf32> to vector<1x32xf32>
    %c1_85 = arith.constant 1 : index
    %c0_86 = arith.constant 0 : index
    %c0_87 = arith.constant 0 : index
    %171 = vector.load %arg4[%c1_85, %c0_86, %c0_87] : memref<2x1x32xf32, #tpu.memory_space<vmem>>, vector<1x1x32xf32>
    %172 = vector.shape_cast %171 : vector<1x1x32xf32> to vector<1x32xf32>
    %cst_88 = arith.constant dense<0.000000e+00> : vector<16xf32>
    %173 = vector.multi_reduction <add>, %168, %cst_88 [1] : vector<16x32xf32> to vector<16xf32>
    %174 = vector.shape_cast %173 : vector<16xf32> to vector<16x1xf32>
    %cst_89 = arith.constant 3.200000e+01 : f32
    %175 = vector.broadcast %cst_89 : f32 to vector<16x1xf32>
    %176 = arith.divf %174, %175 : vector<16x1xf32>
    %177 = vector.broadcast %176 : vector<16x1xf32> to vector<16x32xf32>
    %178 = arith.subf %168, %177 : vector<16x32xf32>
    %179 = arith.mulf %178, %178 : vector<16x32xf32>
    %cst_90 = arith.constant dense<0.000000e+00> : vector<16xf32>
    %180 = vector.multi_reduction <add>, %179, %cst_90 [1] : vector<16x32xf32> to vector<16xf32>
    %181 = vector.shape_cast %180 : vector<16xf32> to vector<16x1xf32>
    %cst_91 = arith.constant 0.0322580636 : f32
    %182 = vector.broadcast %cst_91 : f32 to vector<16x1xf32>
    %183 = arith.mulf %181, %182 : vector<16x1xf32>
    %184 = vector.broadcast %176 : vector<16x1xf32> to vector<16x32xf32>
    %185 = arith.subf %168, %184 : vector<16x32xf32>
    %186 = vector.broadcast %170 : vector<1x32xf32> to vector<16x32xf32>
    %187 = arith.mulf %186, %185 : vector<16x32xf32>
    %188 = math.sqrt %183 : vector<16x1xf32>
    %cst_92 = arith.constant 9.99999997E-7 : f32
    %189 = vector.broadcast %cst_92 : f32 to vector<16x1xf32>
    %190 = arith.addf %188, %189 : vector<16x1xf32>
    %191 = vector.broadcast %190 : vector<16x1xf32> to vector<16x32xf32>
    %192 = arith.divf %187, %191 : vector<16x32xf32>
    %193 = vector.broadcast %172 : vector<1x32xf32> to vector<16x32xf32>
    %194 = arith.addf %192, %193 : vector<16x32xf32>
    %c1_93 = arith.constant 1 : index
    %c0_94 = arith.constant 0 : index
    %c0_95 = arith.constant 0 : index
    %195 = vector.load %arg5[%c1_93, %c0_94, %c0_95] : memref<2x32x96xf32, #tpu.memory_space<vmem>>, vector<1x32x96xf32>
    %196 = vector.shape_cast %195 : vector<1x32x96xf32> to vector<32x96xf32>
    %cst_96 = arith.constant dense<0.000000e+00> : vector<16x96xf32>
    %197 = tpu.matmul %194, %196, %cst_96 {dimension_numbers = #tpu.dot_dimension_numbers<[1], [0], [0], [1], [0, 0, 1, 1], [], []>} : vector<16x32xf32>, vector<32x96xf32>, vector<16x96xf32> -> vector<16x96xf32>
    %c1_97 = arith.constant 1 : index
    %c0_98 = arith.constant 0 : index
    %c0_99 = arith.constant 0 : index
    %198 = vector.load %arg6[%c1_97, %c0_98, %c0_99] : memref<2x1x96xf32, #tpu.memory_space<vmem>>, vector<1x1x96xf32>
    %199 = vector.shape_cast %198 : vector<1x1x96xf32> to vector<1x96xf32>
    %200 = vector.broadcast %199 : vector<1x96xf32> to vector<16x96xf32>
    %201 = arith.addf %197, %200 : vector<16x96xf32>
    %202 = vector.shape_cast %201 : vector<16x96xf32> to vector<2x8x96xf32>
    %203 = vector.extract_strided_slice %202 {offsets = [0, 0, 0], sizes = [2, 8, 8], strides = [1, 1, 1]} : vector<2x8x96xf32> to vector<2x8x8xf32>
    %204 = vector.extract_strided_slice %202 {offsets = [0, 0, 32], sizes = [2, 8, 8], strides = [1, 1, 1]} : vector<2x8x96xf32> to vector<2x8x8xf32>
    %205 = vector.extract_strided_slice %202 {offsets = [0, 0, 64], sizes = [2, 8, 8], strides = [1, 1, 1]} : vector<2x8x96xf32> to vector<2x8x8xf32>
    "tpu.trace_start"() <{level = 10 : i32, message = "bqd,bkd->bqk"}> : () -> ()
    %cst_100 = arith.constant dense<0.000000e+00> : vector<2x8x8xf32>
    %206 = tpu.matmul %203, %204, %cst_100 {dimension_numbers = #tpu.dot_dimension_numbers<[2], [2], [1], [1], [0, 0, 0, 1, 1, 1], [0], [0]>} : vector<2x8x8xf32>, vector<2x8x8xf32>, vector<2x8x8xf32> -> vector<2x8x8xf32>
    "tpu.trace_stop"() : () -> ()
    %cst_101 = arith.constant 0.353553385 : f32
    %207 = vector.broadcast %cst_101 : f32 to vector<2x8x8xf32>
    %208 = arith.mulf %206, %207 : vector<2x8x8xf32>
    %cst_102 = arith.constant -1.000000e+09 : f32
    %209 = vector.broadcast %cst_102 : f32 to vector<2x8x8xf32>
    %210 = arith.select %9, %209, %208 : vector<2x8x8xi1>, vector<2x8x8xf32>
    %cst_103 = arith.constant dense<0xFF800000> : vector<2x8xf32>
    %211 = vector.multi_reduction <maximumf>, %210, %cst_103 [2] : vector<2x8x8xf32> to vector<2x8xf32>
    %212 = vector.shape_cast %211 : vector<2x8xf32> to vector<2x8x1xf32>
    %213 = vector.broadcast %212 : vector<2x8x1xf32> to vector<2x8x8xf32>
    %214 = arith.subf %210, %213 : vector<2x8x8xf32>
    %215 = math.exp %214 : vector<2x8x8xf32>
    %cst_104 = arith.constant dense<0.000000e+00> : vector<2x8xf32>
    %216 = vector.multi_reduction <add>, %215, %cst_104 [2] : vector<2x8x8xf32> to vector<2x8xf32>
    %217 = vector.shape_cast %216 : vector<2x8xf32> to vector<2x8x1xf32>
    %218 = vector.broadcast %217 : vector<2x8x1xf32> to vector<2x8x8xf32>
    %219 = arith.divf %215, %218 : vector<2x8x8xf32>
    "tpu.trace_start"() <{level = 10 : i32, message = "bqk,bkd->bqd"}> : () -> ()
    %cst_105 = arith.constant dense<0.000000e+00> : vector<2x8x8xf32>
    %220 = tpu.matmul %219, %205, %cst_105 {dimension_numbers = #tpu.dot_dimension_numbers<[2], [1], [1], [2], [0, 0, 0, 1, 1, 2], [0], [0]>} : vector<2x8x8xf32>, vector<2x8x8xf32>, vector<2x8x8xf32> -> vector<2x8x8xf32>
    "tpu.trace_stop"() : () -> ()
    %221 = vector.extract_strided_slice %202 {offsets = [0, 0, 8], sizes = [2, 8, 8], strides = [1, 1, 1]} : vector<2x8x96xf32> to vector<2x8x8xf32>
    %222 = vector.extract_strided_slice %202 {offsets = [0, 0, 40], sizes = [2, 8, 8], strides = [1, 1, 1]} : vector<2x8x96xf32> to vector<2x8x8xf32>
    %223 = vector.extract_strided_slice %202 {offsets = [0, 0, 72], sizes = [2, 8, 8], strides = [1, 1, 1]} : vector<2x8x96xf32> to vector<2x8x8xf32>
    "tpu.trace_start"() <{level = 10 : i32, message = "bqd,bkd->bqk"}> : () -> ()
    %cst_106 = arith.constant dense<0.000000e+00> : vector<2x8x8xf32>
    %224 = tpu.matmul %221, %222, %cst_106 {dimension_numbers = #tpu.dot_dimension_numbers<[2], [2], [1], [1], [0, 0, 0, 1, 1, 1], [0], [0]>} : vector<2x8x8xf32>, vector<2x8x8xf32>, vector<2x8x8xf32> -> vector<2x8x8xf32>
    "tpu.trace_stop"() : () -> ()
    %cst_107 = arith.constant 0.353553385 : f32
    %225 = vector.broadcast %cst_107 : f32 to vector<2x8x8xf32>
    %226 = arith.mulf %224, %225 : vector<2x8x8xf32>
    %cst_108 = arith.constant -1.000000e+09 : f32
    %227 = vector.broadcast %cst_108 : f32 to vector<2x8x8xf32>
    %228 = arith.select %9, %227, %226 : vector<2x8x8xi1>, vector<2x8x8xf32>
    %cst_109 = arith.constant dense<0xFF800000> : vector<2x8xf32>
    %229 = vector.multi_reduction <maximumf>, %228, %cst_109 [2] : vector<2x8x8xf32> to vector<2x8xf32>
    %230 = vector.shape_cast %229 : vector<2x8xf32> to vector<2x8x1xf32>
    %231 = vector.broadcast %230 : vector<2x8x1xf32> to vector<2x8x8xf32>
    %232 = arith.subf %228, %231 : vector<2x8x8xf32>
    %233 = math.exp %232 : vector<2x8x8xf32>
    %cst_110 = arith.constant dense<0.000000e+00> : vector<2x8xf32>
    %234 = vector.multi_reduction <add>, %233, %cst_110 [2] : vector<2x8x8xf32> to vector<2x8xf32>
    %235 = vector.shape_cast %234 : vector<2x8xf32> to vector<2x8x1xf32>
    %236 = vector.broadcast %235 : vector<2x8x1xf32> to vector<2x8x8xf32>
    %237 = arith.divf %233, %236 : vector<2x8x8xf32>
    "tpu.trace_start"() <{level = 10 : i32, message = "bqk,bkd->bqd"}> : () -> ()
    %cst_111 = arith.constant dense<0.000000e+00> : vector<2x8x8xf32>
    %238 = tpu.matmul %237, %223, %cst_111 {dimension_numbers = #tpu.dot_dimension_numbers<[2], [1], [1], [2], [0, 0, 0, 1, 1, 2], [0], [0]>} : vector<2x8x8xf32>, vector<2x8x8xf32>, vector<2x8x8xf32> -> vector<2x8x8xf32>
    "tpu.trace_stop"() : () -> ()
    %239 = vector.extract_strided_slice %202 {offsets = [0, 0, 16], sizes = [2, 8, 8], strides = [1, 1, 1]} : vector<2x8x96xf32> to vector<2x8x8xf32>
    %240 = vector.extract_strided_slice %202 {offsets = [0, 0, 48], sizes = [2, 8, 8], strides = [1, 1, 1]} : vector<2x8x96xf32> to vector<2x8x8xf32>
    %241 = vector.extract_strided_slice %202 {offsets = [0, 0, 80], sizes = [2, 8, 8], strides = [1, 1, 1]} : vector<2x8x96xf32> to vector<2x8x8xf32>
    "tpu.trace_start"() <{level = 10 : i32, message = "bqd,bkd->bqk"}> : () -> ()
    %cst_112 = arith.constant dense<0.000000e+00> : vector<2x8x8xf32>
    %242 = tpu.matmul %239, %240, %cst_112 {dimension_numbers = #tpu.dot_dimension_numbers<[2], [2], [1], [1], [0, 0, 0, 1, 1, 1], [0], [0]>} : vector<2x8x8xf32>, vector<2x8x8xf32>, vector<2x8x8xf32> -> vector<2x8x8xf32>
    "tpu.trace_stop"() : () -> ()
    %cst_113 = arith.constant 0.353553385 : f32
    %243 = vector.broadcast %cst_113 : f32 to vector<2x8x8xf32>
    %244 = arith.mulf %242, %243 : vector<2x8x8xf32>
    %cst_114 = arith.constant -1.000000e+09 : f32
    %245 = vector.broadcast %cst_114 : f32 to vector<2x8x8xf32>
    %246 = arith.select %9, %245, %244 : vector<2x8x8xi1>, vector<2x8x8xf32>
    %cst_115 = arith.constant dense<0xFF800000> : vector<2x8xf32>
    %247 = vector.multi_reduction <maximumf>, %246, %cst_115 [2] : vector<2x8x8xf32> to vector<2x8xf32>
    %248 = vector.shape_cast %247 : vector<2x8xf32> to vector<2x8x1xf32>
    %249 = vector.broadcast %248 : vector<2x8x1xf32> to vector<2x8x8xf32>
    %250 = arith.subf %246, %249 : vector<2x8x8xf32>
    %251 = math.exp %250 : vector<2x8x8xf32>
    %cst_116 = arith.constant dense<0.000000e+00> : vector<2x8xf32>
    %252 = vector.multi_reduction <add>, %251, %cst_116 [2] : vector<2x8x8xf32> to vector<2x8xf32>
    %253 = vector.shape_cast %252 : vector<2x8xf32> to vector<2x8x1xf32>
    %254 = vector.broadcast %253 : vector<2x8x1xf32> to vector<2x8x8xf32>
    %255 = arith.divf %251, %254 : vector<2x8x8xf32>
    "tpu.trace_start"() <{level = 10 : i32, message = "bqk,bkd->bqd"}> : () -> ()
    %cst_117 = arith.constant dense<0.000000e+00> : vector<2x8x8xf32>
    %256 = tpu.matmul %255, %241, %cst_117 {dimension_numbers = #tpu.dot_dimension_numbers<[2], [1], [1], [2], [0, 0, 0, 1, 1, 2], [0], [0]>} : vector<2x8x8xf32>, vector<2x8x8xf32>, vector<2x8x8xf32> -> vector<2x8x8xf32>
    "tpu.trace_stop"() : () -> ()
    %257 = vector.extract_strided_slice %202 {offsets = [0, 0, 24], sizes = [2, 8, 8], strides = [1, 1, 1]} : vector<2x8x96xf32> to vector<2x8x8xf32>
    %258 = vector.extract_strided_slice %202 {offsets = [0, 0, 56], sizes = [2, 8, 8], strides = [1, 1, 1]} : vector<2x8x96xf32> to vector<2x8x8xf32>
    %259 = vector.extract_strided_slice %202 {offsets = [0, 0, 88], sizes = [2, 8, 8], strides = [1, 1, 1]} : vector<2x8x96xf32> to vector<2x8x8xf32>
    "tpu.trace_start"() <{level = 10 : i32, message = "bqd,bkd->bqk"}> : () -> ()
    %cst_118 = arith.constant dense<0.000000e+00> : vector<2x8x8xf32>
    %260 = tpu.matmul %257, %258, %cst_118 {dimension_numbers = #tpu.dot_dimension_numbers<[2], [2], [1], [1], [0, 0, 0, 1, 1, 1], [0], [0]>} : vector<2x8x8xf32>, vector<2x8x8xf32>, vector<2x8x8xf32> -> vector<2x8x8xf32>
    "tpu.trace_stop"() : () -> ()
    %cst_119 = arith.constant 0.353553385 : f32
    %261 = vector.broadcast %cst_119 : f32 to vector<2x8x8xf32>
    %262 = arith.mulf %260, %261 : vector<2x8x8xf32>
    %cst_120 = arith.constant -1.000000e+09 : f32
    %263 = vector.broadcast %cst_120 : f32 to vector<2x8x8xf32>
    %264 = arith.select %9, %263, %262 : vector<2x8x8xi1>, vector<2x8x8xf32>
    %cst_121 = arith.constant dense<0xFF800000> : vector<2x8xf32>
    %265 = vector.multi_reduction <maximumf>, %264, %cst_121 [2] : vector<2x8x8xf32> to vector<2x8xf32>
    %266 = vector.shape_cast %265 : vector<2x8xf32> to vector<2x8x1xf32>
    %267 = vector.broadcast %266 : vector<2x8x1xf32> to vector<2x8x8xf32>
    %268 = arith.subf %264, %267 : vector<2x8x8xf32>
    %269 = math.exp %268 : vector<2x8x8xf32>
    %cst_122 = arith.constant dense<0.000000e+00> : vector<2x8xf32>
    %270 = vector.multi_reduction <add>, %269, %cst_122 [2] : vector<2x8x8xf32> to vector<2x8xf32>
    %271 = vector.shape_cast %270 : vector<2x8xf32> to vector<2x8x1xf32>
    %272 = vector.broadcast %271 : vector<2x8x1xf32> to vector<2x8x8xf32>
    %273 = arith.divf %269, %272 : vector<2x8x8xf32>
    "tpu.trace_start"() <{level = 10 : i32, message = "bqk,bkd->bqd"}> : () -> ()
    %cst_123 = arith.constant dense<0.000000e+00> : vector<2x8x8xf32>
    %274 = tpu.matmul %273, %259, %cst_123 {dimension_numbers = #tpu.dot_dimension_numbers<[2], [1], [1], [2], [0, 0, 0, 1, 1, 2], [0], [0]>} : vector<2x8x8xf32>, vector<2x8x8xf32>, vector<2x8x8xf32> -> vector<2x8x8xf32>
    "tpu.trace_stop"() : () -> ()
    %275 = tpu.concatenate %220, %238, %256, %274 in 2 : vector<2x8x8xf32>, vector<2x8x8xf32>, vector<2x8x8xf32>, vector<2x8x8xf32> -> vector<2x8x32xf32>
    %276 = vector.shape_cast %275 : vector<2x8x32xf32> to vector<16x32xf32>
    %c1_124 = arith.constant 1 : index
    %c0_125 = arith.constant 0 : index
    %c0_126 = arith.constant 0 : index
    %277 = vector.load %arg7[%c1_124, %c0_125, %c0_126] : memref<2x32x32xf32, #tpu.memory_space<vmem>>, vector<1x32x32xf32>
    %278 = vector.shape_cast %277 : vector<1x32x32xf32> to vector<32x32xf32>
    %cst_127 = arith.constant dense<0.000000e+00> : vector<16x32xf32>
    %279 = tpu.matmul %276, %278, %cst_127 {dimension_numbers = #tpu.dot_dimension_numbers<[1], [0], [0], [1], [0, 0, 1, 1], [], []>} : vector<16x32xf32>, vector<32x32xf32>, vector<16x32xf32> -> vector<16x32xf32>
    %c1_128 = arith.constant 1 : index
    %c0_129 = arith.constant 0 : index
    %c0_130 = arith.constant 0 : index
    %280 = vector.load %arg8[%c1_128, %c0_129, %c0_130] : memref<2x1x32xf32, #tpu.memory_space<vmem>>, vector<1x1x32xf32>
    %281 = vector.shape_cast %280 : vector<1x1x32xf32> to vector<1x32xf32>
    %282 = vector.broadcast %281 : vector<1x32xf32> to vector<16x32xf32>
    %283 = arith.addf %279, %282 : vector<16x32xf32>
    %284 = arith.addf %168, %283 : vector<16x32xf32>
    %c1_131 = arith.constant 1 : index
    %c0_132 = arith.constant 0 : index
    %c0_133 = arith.constant 0 : index
    %285 = vector.load %arg9[%c1_131, %c0_132, %c0_133] : memref<2x1x32xf32, #tpu.memory_space<vmem>>, vector<1x1x32xf32>
    %286 = vector.shape_cast %285 : vector<1x1x32xf32> to vector<1x32xf32>
    %c1_134 = arith.constant 1 : index
    %c0_135 = arith.constant 0 : index
    %c0_136 = arith.constant 0 : index
    %287 = vector.load %arg10[%c1_134, %c0_135, %c0_136] : memref<2x1x32xf32, #tpu.memory_space<vmem>>, vector<1x1x32xf32>
    %288 = vector.shape_cast %287 : vector<1x1x32xf32> to vector<1x32xf32>
    %cst_137 = arith.constant dense<0.000000e+00> : vector<16xf32>
    %289 = vector.multi_reduction <add>, %284, %cst_137 [1] : vector<16x32xf32> to vector<16xf32>
    %290 = vector.shape_cast %289 : vector<16xf32> to vector<16x1xf32>
    %cst_138 = arith.constant 3.200000e+01 : f32
    %291 = vector.broadcast %cst_138 : f32 to vector<16x1xf32>
    %292 = arith.divf %290, %291 : vector<16x1xf32>
    %293 = vector.broadcast %292 : vector<16x1xf32> to vector<16x32xf32>
    %294 = arith.subf %284, %293 : vector<16x32xf32>
    %295 = arith.mulf %294, %294 : vector<16x32xf32>
    %cst_139 = arith.constant dense<0.000000e+00> : vector<16xf32>
    %296 = vector.multi_reduction <add>, %295, %cst_139 [1] : vector<16x32xf32> to vector<16xf32>
    %297 = vector.shape_cast %296 : vector<16xf32> to vector<16x1xf32>
    %cst_140 = arith.constant 0.0322580636 : f32
    %298 = vector.broadcast %cst_140 : f32 to vector<16x1xf32>
    %299 = arith.mulf %297, %298 : vector<16x1xf32>
    %300 = vector.broadcast %292 : vector<16x1xf32> to vector<16x32xf32>
    %301 = arith.subf %284, %300 : vector<16x32xf32>
    %302 = vector.broadcast %286 : vector<1x32xf32> to vector<16x32xf32>
    %303 = arith.mulf %302, %301 : vector<16x32xf32>
    %304 = math.sqrt %299 : vector<16x1xf32>
    %cst_141 = arith.constant 9.99999997E-7 : f32
    %305 = vector.broadcast %cst_141 : f32 to vector<16x1xf32>
    %306 = arith.addf %304, %305 : vector<16x1xf32>
    %307 = vector.broadcast %306 : vector<16x1xf32> to vector<16x32xf32>
    %308 = arith.divf %303, %307 : vector<16x32xf32>
    %309 = vector.broadcast %288 : vector<1x32xf32> to vector<16x32xf32>
    %310 = arith.addf %308, %309 : vector<16x32xf32>
    %c1_142 = arith.constant 1 : index
    %c0_143 = arith.constant 0 : index
    %c0_144 = arith.constant 0 : index
    %311 = vector.load %arg11[%c1_142, %c0_143, %c0_144] : memref<2x32x2048xf32, #tpu.memory_space<vmem>>, vector<1x32x2048xf32>
    %312 = vector.shape_cast %311 : vector<1x32x2048xf32> to vector<32x2048xf32>
    %cst_145 = arith.constant dense<0.000000e+00> : vector<16x2048xf32>
    %313 = tpu.matmul %310, %312, %cst_145 {dimension_numbers = #tpu.dot_dimension_numbers<[1], [0], [0], [1], [0, 0, 1, 1], [], []>} : vector<16x32xf32>, vector<32x2048xf32>, vector<16x2048xf32> -> vector<16x2048xf32>
    %c1_146 = arith.constant 1 : index
    %c0_147 = arith.constant 0 : index
    %c0_148 = arith.constant 0 : index
    %314 = vector.load %arg12[%c1_146, %c0_147, %c0_148] : memref<2x1x2048xf32, #tpu.memory_space<vmem>>, vector<1x1x2048xf32>
    %315 = vector.shape_cast %314 : vector<1x1x2048xf32> to vector<1x2048xf32>
    %316 = vector.broadcast %315 : vector<1x2048xf32> to vector<16x2048xf32>
    %317 = arith.addf %313, %316 : vector<16x2048xf32>
    %cst_149 = arith.constant 0.000000e+00 : f32
    %318 = vector.broadcast %cst_149 : f32 to vector<16x2048xf32>
    %319 = arith.maximumf %317, %318 : vector<16x2048xf32>
    %c1_150 = arith.constant 1 : index
    %c0_151 = arith.constant 0 : index
    %c0_152 = arith.constant 0 : index
    %320 = vector.load %arg13[%c1_150, %c0_151, %c0_152] : memref<2x2048x32xf32, #tpu.memory_space<vmem>>, vector<1x2048x32xf32>
    %321 = vector.shape_cast %320 : vector<1x2048x32xf32> to vector<2048x32xf32>
    %cst_153 = arith.constant dense<0.000000e+00> : vector<16x32xf32>
    %322 = tpu.matmul %319, %321, %cst_153 {dimension_numbers = #tpu.dot_dimension_numbers<[1], [0], [0], [1], [0, 0, 1, 1], [], []>} : vector<16x2048xf32>, vector<2048x32xf32>, vector<16x32xf32> -> vector<16x32xf32>
    %c1_154 = arith.constant 1 : index
    %c0_155 = arith.constant 0 : index
    %c0_156 = arith.constant 0 : index
    %323 = vector.load %arg14[%c1_154, %c0_155, %c0_156] : memref<2x1x32xf32, #tpu.memory_space<vmem>>, vector<1x1x32xf32>
    %324 = vector.shape_cast %323 : vector<1x1x32xf32> to vector<1x32xf32>
    %325 = vector.broadcast %324 : vector<1x32xf32> to vector<16x32xf32>
    %326 = arith.addf %322, %325 : vector<16x32xf32>
    %327 = arith.addf %284, %326 : vector<16x32xf32>
    %c0_157 = arith.constant 0 : index
    %c0_158 = arith.constant 0 : index
    %328 = vector.load %arg15[%c0_157, %c0_158] : memref<1x32xf32, #tpu.memory_space<vmem>>, vector<1x32xf32>
    %c0_159 = arith.constant 0 : index
    %c0_160 = arith.constant 0 : index
    %329 = vector.load %arg16[%c0_159, %c0_160] : memref<1x32xf32, #tpu.memory_space<vmem>>, vector<1x32xf32>
    %cst_161 = arith.constant dense<0.000000e+00> : vector<16xf32>
    %330 = vector.multi_reduction <add>, %327, %cst_161 [1] : vector<16x32xf32> to vector<16xf32>
    %331 = vector.shape_cast %330 : vector<16xf32> to vector<16x1xf32>
    %cst_162 = arith.constant 3.200000e+01 : f32
    %332 = vector.broadcast %cst_162 : f32 to vector<16x1xf32>
    %333 = arith.divf %331, %332 : vector<16x1xf32>
    %334 = vector.broadcast %333 : vector<16x1xf32> to vector<16x32xf32>
    %335 = arith.subf %327, %334 : vector<16x32xf32>
    %336 = arith.mulf %335, %335 : vector<16x32xf32>
    %cst_163 = arith.constant dense<0.000000e+00> : vector<16xf32>
    %337 = vector.multi_reduction <add>, %336, %cst_163 [1] : vector<16x32xf32> to vector<16xf32>
    %338 = vector.shape_cast %337 : vector<16xf32> to vector<16x1xf32>
    %cst_164 = arith.constant 0.0322580636 : f32
    %339 = vector.broadcast %cst_164 : f32 to vector<16x1xf32>
    %340 = arith.mulf %338, %339 : vector<16x1xf32>
    %341 = vector.broadcast %333 : vector<16x1xf32> to vector<16x32xf32>
    %342 = arith.subf %327, %341 : vector<16x32xf32>
    %343 = vector.broadcast %328 : vector<1x32xf32> to vector<16x32xf32>
    %344 = arith.mulf %343, %342 : vector<16x32xf32>
    %345 = math.sqrt %340 : vector<16x1xf32>
    %cst_165 = arith.constant 9.99999997E-7 : f32
    %346 = vector.broadcast %cst_165 : f32 to vector<16x1xf32>
    %347 = arith.addf %345, %346 : vector<16x1xf32>
    %348 = vector.broadcast %347 : vector<16x1xf32> to vector<16x32xf32>
    %349 = arith.divf %344, %348 : vector<16x32xf32>
    %350 = vector.broadcast %329 : vector<1x32xf32> to vector<16x32xf32>
    %351 = arith.addf %349, %350 : vector<16x32xf32>
    %352 = vector.shape_cast %351 : vector<16x32xf32> to vector<2x8x32xf32>
    %c0_166 = arith.constant 0 : index
    %c0_167 = arith.constant 0 : index
    %c0_168 = arith.constant 0 : index
    %353 = vector.load %arg17[%c0_166, %c0_167, %c0_168] : memref<2x8x32xf32, #tpu.memory_space<vmem>>, vector<2x8x32xf32>
    tpu.vector_store %arg17[%c0_166, %c0_167, %c0_168], %352 {strides = array<i32>} : memref<2x8x32xf32, #tpu.memory_space<vmem>>, vector<2x8x32xf32>,
    return
  }
}

</mosaic_0001>

<bundles_post_ra>
// kernel: decoder_forward.1
= control target key start
LH: loop header
LB: loop body
LE: loop exit
PB: predicated region body
PF: predicated region fallthrough
CT: control target
= control target key end

     0   :  { %s11984_s0 = inlined_call_operand.vmem [shape: f32[2,8,32], index: 0, kind: input, shape index: {}]   ;;  %s11985_s1 = inlined_call_operand.vmem [shape: f32[1,8,32], index: 1, kind: input, shape index: {}]   ;;  %s11986_s2 = inlined_call_operand.vmem [shape: s32[2,8,8], index: 2, kind: input, shape index: {}]   ;;  %s11987_s3 = inlined_call_operand.vmem [shape: f32[2,1,32], index: 3, kind: input, shape index: {}]   ;;  %s11988_s4 = inlined_call_operand.vmem [shape: f32[2,1,32], index: 4, kind: input, shape index: {}]   ;;  %s11989_s5 = inlined_call_operand.vmem [shape: f32[2,32,96], index: 5, kind: input, shape index: {}]   ;;  %s11990_s6 = inlined_call_operand.vmem [shape: f32[2,1,96], index: 6, kind: input, shape index: {}]   ;;  %s11991_s7 = inlined_call_operand.vmem [shape: f32[2,32,32], index: 7, kind: input, shape index: {}]   ;;  %s11992_s8 = inlined_call_operand.vmem [shape: f32[2,1,32], index: 8, kind: input, shape index: {}]   ;;  %s11993_s9 = inlined_call_operand.vmem [shape: f32[2,1,32], index: 9, kind: input, shape index: {}]   ;;  %s11994_s10 = inlined_call_operand.vmem [shape: f32[2,1,32], index: 10, kind: input, shape index: {}]   ;;  %s11995_s11 = inlined_call_operand.vmem [shape: f32[2,32,2048], index: 11, kind: input, shape index: {}]   ;;  %s11996_s12 = inlined_call_operand.vmem [shape: f32[2,1,2048], index: 12, kind: input, shape index: {}]   ;;  %s11997_s13 = inlined_call_operand.vmem [shape: f32[2,2048,32], index: 13, kind: input, shape index: {}]   ;;  %s11998_s14 = inlined_call_operand.vmem [shape: f32[2,1,32], index: 14, kind: input, shape index: {}]   ;;  %s11999_s15 = inlined_call_operand.vmem [shape: f32[1,32], index: 15, kind: input, shape index: {}]   ;;  %s12000_s16 = inlined_call_operand.vmem [shape: f32[1,32], index: 16, kind: input, shape index: {}]   ;;  %s12001_s17 = inlined_call_operand.hbm [shape: f32[2,8,32], index: 17, kind: output, shape index: {}]  }
   0x1   :  { %12024 = sst [smem:[#allocation5_spill]] %s11984_s0 }
   0x2   :  { %12025 = sst [smem:[#allocation6_spill]] %s11985_s1 }
   0x3   :  { %12026 = sst [smem:[#allocation7_spill]] %s11996_s12 }
   0x4   :  { %s12027_s26 = sld [smem:[#allocation5_spill]]  ;;  %s12028_s12 = sld [smem:[#allocation6_spill]] }
   0xa   :  { %v57_v0 = vld [vmem:[%s12027_s26] sm:$0xff]  ;;  %v58_v2 = vld [vmem:[%s12027_s26 + $0x8] sm:$0xff] }
   0xb   :  { %v61_v1 = vld [vmem:[%s12028_s12] sm:$0xff]  ;;  %v59_v3 = vmul.f32 5.656854, %v57_v0  ;;  %v60_v4 = vmul.f32 5.656854, %v58_v2 }
   0xc   :  { %22 = vsyncpa [#allocation3], 0  ;;  %vm70_vm0 = vcmask 261120   ;;  %v128_v19 = vld [vmem:[%s11989_s5] sm:$0xff]  ;;  %v129_v20 = vld [vmem:[%s11989_s5 + $0x8] sm:$0xff]  ;;  %v8986_v51 = vmov 0.0  }
   0xd   :  { %v9103_v5 = vadd.f32 %v61_v1, %v59_v3  ;;  %v9105_v6 = vadd.f32 %v61_v1, %v60_v4  ;;  %v130_v21 = vld [vmem:[%s11989_s5 + $0x10] sm:$0xff]  ;;  %v8168_v22 = vpack.c.bf16 %v129_v20, %v128_v19  ;;  %v131_v23 = vld [vmem:[%s11989_s5 + $0x18] sm:$0xff]  ;;  %v6827_v41 = vld [vmem:[%s11987_s3] ss:$0 sm:$0xff]  ;;  %7975 = vmatprep.subr.mxu1 %v8986_v51  ;;  %vm8987_vm5 = vmmov 0   ;;  %s8988_s29 = smov 96  }
   0xe   :  { %v8172_v24 = vpack.c.bf16 %v131_v23, %v130_v21  ;;  %v6828_v44 = vld [vmem:[%s11988_s4] ss:$0 sm:$0xff]  ;;  %7977 = vmatprep.mubr.msk.f32.mxu1 %vm8987_vm5, %v8986_v51  ;;  %vm223_vm6 = vcmask 64512   ;;  %v9173_v63 = vld [vmem:[%s11986_s2 + $0x8] sm:$0xff]  ;;  %s8989_s19 = smov 64   ;;  %s8991_s1 = smov 120  }
   0xf   :  { %v71_v7 = vsel %vm70_vm0, %v9103_v5, 0.0  ;;  %v74_v8 = vsel %vm70_vm0, %v9105_v6, 0.0  ;;  %8169 = vmatprep.subr.bf16.mxu0 %v8168_v22  ;;  %v6829_v52 = vld [vmem:[%s11990_s6] ss:$0 sm:$0xff]  ;;  %vm67_vm8 = vcmp.eq.s32.totalorder %v9173_v63, 0  ;;  %s12022_s20 = smov 56  }
  0x10   :  { %72 = vadd.xlane.f32.xlu0 %v71_v7  ;;  %8171 = vmatpush3.bf16.msra.mxu0 %v8168_v22  ;;  %v9167_v59 = vld [vmem:[%s11986_s2] sm:$0xff]  ;;  %s8990_s2 = smov 88   ;;  %s12020_s21 = smov 80   ;;  %vm1584_vm9 = vcmask 195584   ;;  %vm1581_vm10 = vcmask 130048  }
  0x11   :  { %8173 = vmatprep.subr.bf16.mxu0 %v8172_v24  ;;  %vm66_vm7 = vcmp.eq.s32.totalorder %v9167_v59, 0  ;;  %s12018_s22 = smov 112   ;;  %s12016_s23 = smov 48  }
  0x12   :  { %s12014_s24 = smov 72   ;;  %s12010_s25 = smov 104  }
  0x13   :  { %s12008_s26 = smov 40   ;;  %s12006_s27 = smov 8  }
  0x14   :  { %75 = vadd.xlane.f32.xlu0 %v74_v8  ;;  %8175 = vmatpush3.bf16.msra.mxu0 %v8172_v24  ;;  %s12004_s28 = smov 16   ;;  %s12012_s0 = smov 24  }
  0x15   :  { %7985 = vmatprep.subr.mxu0 %v8986_v51  ;;  %s12036_s12 = smov 40   ;;  %s12037_s30 = smov 8  }
  0x16   :  { %s12038_s18 = smov 16  }
  0x9d   :  { %v73_v9 = vpop.xlane.xlu0 %72 }
  0x9e   :  { %v78_v10 = vmul.f32 0.03125, %v73_v9 }
  0xa0   :  { %v80_v11 = vsub.f32 %v9103_v5, %v78_v10 }
  0xa1   :  { %v76_v12 = vpop.xlane.xlu0 %75 }
  0xa2   :  { %v79_v13 = vmul.f32 0.03125, %v76_v12  ;;  %v82_v14 = vmul.f32 %v80_v11, %v80_v11  ;;  %v98_v42 = vmul.f32 %v6827_v41, %v80_v11 }
  0xa4   :  { %v81_v15 = vsub.f32 %v9105_v6, %v79_v13  ;;  %v84_v16 = vsel %vm70_vm0, %v82_v14, 0.0 }
  0xa5   :  { %85 = vadd.xlane.f32.xlu1 %v84_v16 }
  0xa6   :  { %v83_v17 = vmul.f32 %v81_v15, %v81_v15  ;;  %v99_v46 = vmul.f32 %v6827_v41, %v81_v15 }
  0xa8   :  { %v87_v18 = vsel %vm70_vm0, %v83_v17, 0.0 }
  0xa9   :  { %88 = vadd.xlane.f32.xlu1 %v87_v18 }
 0x132   :  { %v86_v25 = vpop.xlane.xlu1 %85 }
 0x133   :  { %v90_v26 = vmul.f32 0.032258064, %v86_v25 }
 0x135   :  { %8858 = vrsqrt.f32 %v90_v26  ;;  %vm102_vm1 = vcmp.eq.f32.partialorder %v90_v26, inf  ;;  %v105_v31 = vand.u32 2147483648, %v90_v26  ;;  %vm104_vm2 = vcmp.eq.f32.partialorder %v90_v26, 0.0 }
 0x136   :  { %v89_v27 = vpop.xlane.xlu1 %88 }
 0x137   :  { %v91_v28 = vmul.f32 0.032258064, %v89_v27 }
 0x139   :  { %8860 = vrsqrt.f32 %v91_v28  ;;  %vm109_vm3 = vcmp.eq.f32.partialorder %v91_v28, inf  ;;  %v112_v37 = vand.u32 2147483648, %v91_v28  ;;  %vm111_vm4 = vcmp.eq.f32.partialorder %v91_v28, 0.0 }
 0x13f   :  { %v8859_v29 = vpop.eup %8858 }
 0x140   :  { %v101_v30 = vmul.f32 %v8859_v29, %v90_v26 }
 0x142   :  { %v103_v32 = vsel %vm102_vm1, %v90_v26, %v101_v30 }
 0x143   :  { %v8861_v33 = vpop.eup %8860  ;;  %v106_v34 = vsel %vm104_vm2, %v105_v31, %v103_v32 }
 0x144   :  { %v108_v35 = vmul.f32 %v8861_v33, %v91_v28  ;;  %v114_v36 = vadd.f32 1e-06, %v106_v34 }
 0x146   :  { %v110_v38 = vsel %vm109_vm3, %v91_v28, %v108_v35  ;;  %8862 = vrcp.f32 %v114_v36 }
 0x147   :  { %v113_v39 = vsel %vm111_vm4, %v112_v37, %v110_v38 }
 0x148   :  { %v115_v40 = vadd.f32 1e-06, %v113_v39 }
 0x14a   :  { %8864 = vrcp.f32 %v115_v40 }
 0x150   :  { %v8863_v43 = vpop.eup %8862 }
 0x151   :  { %v117_v45 = vmul.f32 %v8863_v43, %v98_v42 }
 0x153   :  { %v126_v47 = vadd.f32 %v6828_v44, %v117_v45 }
 0x154   :  { %v8865_v48 = vpop.eup %8864 }
 0x155   :  { %v119_v49 = vmul.f32 %v8865_v48, %v99_v46  ;;  %7972 = vmatprep.mubr.msk.f32.mxu0 %vm70_vm0, %v126_v47 }
 0x157   :  { %v127_v50 = vadd.f32 %v6828_v44, %v119_v49 }
 0x159   :  { %7973 = vmatmul.mubr.msk.f32.vlgmr.msra.gmra.mrb[0].mxu0 %vm70_vm0, %v127_v50 }
 0x15a   :  { %7987 = vmatprep.mubr.msk.f32.mxu0 %vm8987_vm5, %v8986_v51 }
 0x22c   :  { %v7974_v53 = vpop.f32.mrb[0].mxu0 }
 0x22d   :  { %v9144_v54 = vadd.f32 %v7974_v53, %v6829_v52  ;;  %v211_v55 = vpop.f32.mrb[1].mxu0 }
 0x22e   :  { %v9146_v56 = vadd.f32 %v6829_v52, %v211_v55 }
 0x22f   :  { %299 = vrot.lane.b32.xlu1 %v9144_v54, %s8988_s29 }
 0x230   :  { %221 = vrot.lane.b32.xlu0 %v9146_v56, %s8988_s29 }
 0x2a1   :  { %v300_v58 = vpop.permute.xlu1 %299 }
 0x2a2   :  { %v222_v57 = vpop.permute.xlu0 %221 }
 0x2a3   :  { %7976 = vmatpush3.xpose.msk.msra.mxu1 %vm223_vm6, %v222_v57 }
 0x2a4   :  { %7980 = vmatprep.subr.mxu1 %v8986_v51 }
 0x2a6   :  { %7978 = vmatmul.mubr.msk.f32.vlgmr.msra.gmra.mrb[0].mxu1 %vm223_vm6, %v9146_v56 }
 0x2a7   :  { %7981 = vmatpush3.xpose.msk.msra.mxu1 %vm223_vm6, %v300_v58  ;;  %7982 = vmatprep.mubr.msk.f32.mxu1 %vm8987_vm5, %v8986_v51 }
 0x2a8   :  { %7990 = vmatprep.subr.mxu1 %v8986_v51 }
 0x2aa   :  { %7983 = vmatmul.mubr.msk.f32.vlgmr.msra.gmra.mrb[2].mxu1 %vm223_vm6, %v9144_v54 }
 0x2ab   :  { %7992 = vmatprep.mubr.msk.f32.mxu1 %vm8987_vm5, %v8986_v51 }
 0x379   :  { %v294_v60 = vpop.f32.mrb[0].mxu1 }
 0x37a   :  { %v375_v61 = vmul.f32 0.35355338, %v294_v60  ;;  %v7979_v62 = vpop.f32.mrb[1].mxu1 }
 0x37c   :  { %v377_v0 = vsel %vm66_vm7, -1e+09, %v375_v61 }
 0x37d   :  { %v371_v1 = vpop.f32.mrb[2].mxu1  ;;  %v379_v2 = vsel %vm223_vm6, %v377_v0, -inf }
 0x37e   :  { %v376_v3 = vmul.f32 0.35355338, %v371_v1  ;;  %380 = vmax.xlane.f32.xlu1 %v379_v2  ;;  %v7984_v4 = vpop.f32.mrb[3].mxu1 }
 0x380   :  { %v378_v7 = vsel %vm67_vm8, -1e+09, %v376_v3 }
 0x381   :  { %v382_v8 = vsel %vm223_vm6, %v378_v7, -inf }
 0x382   :  { %383 = vmax.xlane.f32.xlu0 %v382_v8 }
 0x38f   :  { %477 = vrot.lane.b32.xlu1 %v9144_v54, %s8989_s19 }
 0x393   :  { %555 = vrot.lane.b32.xlu1 %v9146_v56, %s8990_s2 }
 0x397   :  { %633 = vrot.lane.b32.xlu1 %v9144_v54, %s8990_s2 }
 0x398   :  { %401 = vrot.lane.b32.xlu0 %v9146_v56, %s8989_s19 }
 0x40b   :  { %v381_v9 = vpop.xlane.xlu1 %380 }
 0x40c   :  { %v385_v10 = vsub.f32 %v377_v0, %v381_v9 }
 0x40e   :  { %v387_v11 = vmul.f32 1.442695, %v385_v10 }
 0x40f   :  { %v478_v12 = vpop.permute.xlu1 %477  ;;  %v384_v13 = vpop.xlane.xlu0 %383 }
 0x410   :  { %8866 = vpow2.f32 %v387_v11  ;;  %v386_v14 = vsub.f32 %v378_v7, %v384_v13  ;;  %7991 = vmatpush3.msra.mxu1 %v478_v12 }
 0x411   :  { %8000 = vmatprep.subr.mxu1 %v8986_v51 }
 0x412   :  { %v389_v15 = vmul.f32 1.442695, %v386_v14 }
 0x413   :  { %v402_v16 = vpop.permute.xlu0 %401  ;;  %v556_v21 = vpop.permute.xlu1 %555 }
 0x414   :  { %8868 = vpow2.f32 %v389_v15  ;;  %7986 = vmatpush3.msra.mxu0 %v402_v16 }
 0x415   :  { %7995 = vmatprep.subr.mxu0 %v8986_v51 }
 0x417   :  { %v634_v22 = vpop.permute.xlu1 %633 }
 0x41a   :  { %v8867_v17 = vpop.eup %8866 }
 0x41b   :  { %v391_v18 = vsel %vm223_vm6, %v8867_v17, 0.0 }
 0x41c   :  { %392 = vadd.xlane.f32.xlu0 %v391_v18 }
 0x41e   :  { %v8869_v19 = vpop.eup %8868 }
 0x41f   :  { %v394_v20 = vsel %vm223_vm6, %v8869_v19, 0.0 }
 0x420   :  { %395 = vadd.xlane.f32.xlu1 %v394_v20 }
 0x431   :  { %631 = vrot.lane.b32.xlu1 %v9144_v54, %s8991_s1 }
 0x432   :  { %553 = vrot.lane.b32.xlu0 %v9146_v56, %s8991_s1 }
 0x4a9   :  { %v393_v23 = vpop.xlane.xlu0 %392 }
 0x4aa   :  { %8870 = vrcp.f32 %v393_v23 }
 0x4ad   :  { %v396_v24 = vpop.xlane.xlu1 %395  ;;  %v554_v29 = vpop.permute.xlu0 %553 }
 0x4ae   :  { %8872 = vrcp.f32 %v396_v24 }
 0x4b1   :  { %v632_v30 = vpop.permute.xlu1 %631 }
 0x4b4   :  { %v8871_v25 = vpop.eup %8870 }
 0x4b5   :  { %v398_v26 = vmul.f32 %v8871_v25, %v8867_v17 }
 0x4b7   :  { %7988 = vmatmul.mubr.msk.f32.vlgmr.msra.gmra.mrb[2].mxu0 %vm223_vm6, %v398_v26 }
 0x4b8   :  { %v8873_v27 = vpop.eup %8872  ;;  %7996 = vmatpush3.xpose.msk.msra.mxu0 %vm223_vm6, %v556_v21  ;;  %7997 = vmatprep.mubr.msk.f32.mxu0 %vm8987_vm5, %v8986_v51 }
 0x4b9   :  { %v400_v28 = vmul.f32 %v8873_v27, %v8869_v19  ;;  %8005 = vmatprep.subr.mxu0 %v8986_v51 }
 0x4bb   :  { %7993 = vmatmul.mubr.msk.f32.vlgmr.msra.gmra.mrb[4].mxu1 %vm223_vm6, %v400_v28  ;;  %7998 = vmatmul.mubr.msk.f32.vlgmr.msra.gmra.mrb[4].mxu0 %vm223_vm6, %v554_v29 }
 0x4bc   :  { %8001 = vmatpush3.xpose.msk.msra.mxu1 %vm223_vm6, %v634_v22  ;;  %8002 = vmatprep.mubr.msk.f32.mxu1 %vm8987_vm5, %v8986_v51 }
 0x4bd   :  { %8010 = vmatprep.subr.mxu1 %v8986_v51  ;;  %8007 = vmatprep.mubr.msk.f32.mxu0 %vm8987_vm5, %v8986_v51 }
 0x4bf   :  { %8003 = vmatmul.mubr.msk.f32.vlgmr.msra.gmra.mrb[6].mxu1 %vm223_vm6, %v632_v30 }
 0x4c0   :  { %8012 = vmatprep.mubr.msk.f32.mxu1 %vm8987_vm5, %v8986_v51 }
 0x58a   :  { %v9214_v31 = vpop.f32.mrb[2].mxu0 }
 0x58b   :  { %v7989_v32 = vpop.f32.mrb[3].mxu0 }
 0x58e   :  { %v9216_v33 = vpop.f32.mrb[4].mxu1  ;;  %v627_v34 = vpop.f32.mrb[4].mxu0 }
 0x58f   :  { %v709_v35 = vmul.f32 0.35355338, %v627_v34  ;;  %v7994_v36 = vpop.f32.mrb[5].mxu1  ;;  %v7999_v37 = vpop.f32.mrb[5].mxu0 }
 0x591   :  { %v711_v38 = vsel %vm66_vm7, -1e+09, %v709_v35 }
 0x592   :  { %v705_v39 = vpop.f32.mrb[6].mxu1  ;;  %v713_v40 = vsel %vm223_vm6, %v711_v38, -inf }
 0x593   :  { %v710_v41 = vmul.f32 0.35355338, %v705_v39  ;;  %714 = vmax.xlane.f32.xlu0 %v713_v40  ;;  %v8004_v42 = vpop.f32.mrb[7].mxu1 }
 0x595   :  { %v712_v43 = vsel %vm67_vm8, -1e+09, %v710_v41 }
 0x596   :  { %v716_v44 = vsel %vm223_vm6, %v712_v43, -inf }
 0x597   :  { %717 = vmax.xlane.f32.xlu1 %v716_v44 }
 0x5a8   :  { %811 = vrot.lane.b32.xlu1 %v9144_v54, %s12022_s20 }
 0x5a9   :  { %735 = vrot.lane.b32.xlu0 %v9146_v56, %s12022_s20 }
 0x5ac   :  { %889 = vrot.lane.b32.xlu1 %v9146_v56, %s12020_s21 }
 0x5b0   :  { %967 = vrot.lane.b32.xlu1 %v9144_v54, %s12020_s21  ;;  %s12029_s21 = sld [smem:[#allocation7_spill]] }
 0x5b4   :  { %965 = vrot.lane.b32.xlu1 %v9144_v54, %s12018_s22 }
 0x620   :  { %v715_v45 = vpop.xlane.xlu0 %714 }
 0x621   :  { %v719_v46 = vsub.f32 %v711_v38, %v715_v45 }
 0x623   :  { %v721_v47 = vmul.f32 1.442695, %v719_v46 }
 0x624   :  { %v736_v48 = vpop.permute.xlu0 %735  ;;  %v718_v49 = vpop.xlane.xlu1 %717 }
 0x625   :  { %8874 = vpow2.f32 %v721_v47  ;;  %v720_v50 = vsub.f32 %v712_v43, %v718_v49  ;;  %8006 = vmatpush3.msra.mxu0 %v736_v48 }
 0x626   :  { %8015 = vmatprep.subr.mxu0 %v8986_v51 }
 0x627   :  { %v723_v52 = vmul.f32 1.442695, %v720_v50 }
 0x628   :  { %v812_v53 = vpop.permute.xlu1 %811 }
 0x629   :  { %8876 = vpow2.f32 %v723_v52  ;;  %8011 = vmatpush3.msra.mxu1 %v812_v53 }
 0x62a   :  { %8020 = vmatprep.subr.mxu1 %v8986_v51 }
 0x62c   :  { %v890_v0 = vpop.permute.xlu1 %889 }
 0x62f   :  { %v8875_v55 = vpop.eup %8874 }
 0x630   :  { %v725_v57 = vsel %vm223_vm6, %v8875_v55, 0.0  ;;  %v968_v4 = vpop.permute.xlu1 %967 }
 0x631   :  { %726 = vadd.xlane.f32.xlu0 %v725_v57 }
 0x633   :  { %v8877_v58 = vpop.eup %8876 }
 0x634   :  { %v728_v60 = vsel %vm223_vm6, %v8877_v58, 0.0  ;;  %v966_v9 = vpop.permute.xlu1 %965 }
 0x635   :  { %729 = vadd.xlane.f32.xlu0 %v728_v60 }
 0x64b   :  { %887 = vrot.lane.b32.xlu0 %v9146_v56, %s12018_s22 }
 0x6be   :  { %v727_v61 = vpop.xlane.xlu0 %726 }
 0x6bf   :  { %8878 = vrcp.f32 %v727_v61 }
 0x6c2   :  { %v730_v62 = vpop.xlane.xlu0 %729 }
 0x6c3   :  { %8880 = vrcp.f32 %v730_v62 }
 0x6c6   :  { %v888_v8 = vpop.permute.xlu0 %887 }
 0x6c9   :  { %v8879_v1 = vpop.eup %8878 }
 0x6ca   :  { %v732_v2 = vmul.f32 %v8879_v1, %v8875_v55 }
 0x6cc   :  { %8008 = vmatmul.mubr.msk.f32.vlgmr.msra.gmra.mrb[6].mxu0 %vm223_vm6, %v732_v2 }
 0x6cd   :  { %v8881_v3 = vpop.eup %8880  ;;  %8016 = vmatpush3.xpose.msk.msra.mxu0 %vm223_vm6, %v890_v0  ;;  %8017 = vmatprep.mubr.msk.f32.mxu0 %vm8987_vm5, %v8986_v51 }
 0x6ce   :  { %v734_v7 = vmul.f32 %v8881_v3, %v8877_v58  ;;  %8025 = vmatprep.subr.mxu0 %v8986_v51 }
 0x6d0   :  { %8013 = vmatmul.mubr.msk.f32.vlgmr.msra.gmra.mrb[8].mxu1 %vm223_vm6, %v734_v7  ;;  %8018 = vmatmul.mubr.msk.f32.vlgmr.msra.gmra.mrb[8].mxu0 %vm223_vm6, %v888_v8 }
 0x6d1   :  { %8021 = vmatpush3.xpose.msk.msra.mxu1 %vm223_vm6, %v968_v4  ;;  %8022 = vmatprep.mubr.msk.f32.mxu1 %vm8987_vm5, %v8986_v51 }
 0x6d2   :  { %8030 = vmatprep.subr.mxu1 %v8986_v51  ;;  %8027 = vmatprep.mubr.msk.f32.mxu0 %vm8987_vm5, %v8986_v51 }
 0x6d4   :  { %8023 = vmatmul.mubr.msk.f32.vlgmr.msra.gmra.mrb[10].mxu1 %vm223_vm6, %v966_v9 }
 0x6d5   :  { %8032 = vmatprep.mubr.msk.f32.mxu1 %vm8987_vm5, %v8986_v51 }
 0x79f   :  { %v9256_v10 = vpop.f32.mrb[6].mxu0 }
 0x7a0   :  { %v8009_v11 = vpop.f32.mrb[7].mxu0 }
 0x7a3   :  { %v9258_v12 = vpop.f32.mrb[8].mxu1  ;;  %v961_v13 = vpop.f32.mrb[8].mxu0 }
 0x7a4   :  { %v1043_v14 = vmul.f32 0.35355338, %v961_v13  ;;  %v8014_v15 = vpop.f32.mrb[9].mxu1  ;;  %v8019_v16 = vpop.f32.mrb[9].mxu0 }
 0x7a6   :  { %v1045_v17 = vsel %vm66_vm7, -1e+09, %v1043_v14 }
 0x7a7   :  { %v1039_v18 = vpop.f32.mrb[10].mxu1  ;;  %v1047_v19 = vsel %vm223_vm6, %v1045_v17, -inf }
 0x7a8   :  { %v1044_v20 = vmul.f32 0.35355338, %v1039_v18  ;;  %1048 = vmax.xlane.f32.xlu0 %v1047_v19  ;;  %v8024_v21 = vpop.f32.mrb[11].mxu1 }
 0x7aa   :  { %v1046_v22 = vsel %vm67_vm8, -1e+09, %v1044_v20 }
 0x7ab   :  { %v1050_v23 = vsel %vm223_vm6, %v1046_v22, -inf }
 0x7ac   :  { %1051 = vmax.xlane.f32.xlu1 %v1050_v23 }
 0x7bd   :  { %1145 = vrot.lane.b32.xlu1 %v9144_v54, %s12016_s23 }
 0x7be   :  { %1069 = vrot.lane.b32.xlu0 %v9146_v56, %s12016_s23 }
 0x7c1   :  { %1223 = vrot.lane.b32.xlu1 %v9146_v56, %s12014_s24 }
 0x7c5   :  { %1301 = vrot.lane.b32.xlu1 %v9144_v54, %s12014_s24 }
 0x7c9   :  { %1299 = vrot.lane.b32.xlu1 %v9144_v54, %s12010_s25 }
 0x835   :  { %v1049_v24 = vpop.xlane.xlu0 %1048 }
 0x836   :  { %v1053_v25 = vsub.f32 %v1045_v17, %v1049_v24  ;;  %v1589_v24 = vld [vmem:[%s11991_s7 + $0x10] sm:$0xff] }
 0x838   :  { %v1055_v26 = vmul.f32 1.442695, %v1053_v25  ;;  %v1590_v25 = vld [vmem:[%s11991_s7 + $0x18] sm:$0xff] }
 0x839   :  { %v1070_v27 = vpop.permute.xlu0 %1069  ;;  %v1052_v28 = vpop.xlane.xlu1 %1051 }
 0x83a   :  { %8882 = vpow2.f32 %v1055_v26  ;;  %v1054_v29 = vsub.f32 %v1046_v22, %v1052_v28  ;;  %8026 = vmatpush3.msra.mxu0 %v1070_v27  ;;  %v1588_v22 = vld [vmem:[%s11991_s7 + $0x8] sm:$0xff]  ;;  %v8180_v26 = vpack.c.bf16 %v1590_v25, %v1589_v24 }
 0x83b   :  { %8035 = vmatprep.subr.mxu0 %v8986_v51  ;;  %v1744_v25 = vld [vmem:[%s11995_s11 + $0x28] sm:$0xff] }
 0x83c   :  { %v1057_v30 = vmul.f32 1.442695, %v1054_v29 }
 0x83d   :  { %v1146_v32 = vpop.permute.xlu1 %1145 }
 0x83e   :  { %8884 = vpow2.f32 %v1057_v30  ;;  %8031 = vmatpush3.msra.mxu1 %v1146_v32 }
 0x83f   :  { %8040 = vmatprep.subr.mxu1 %v8986_v51 }
 0x841   :  { %v1224_v40 = vpop.permute.xlu1 %1223 }
 0x844   :  { %v8883_v34 = vpop.eup %8882 }
 0x845   :  { %v1059_v35 = vsel %vm223_vm6, %v8883_v34, 0.0  ;;  %v1302_v44 = vpop.permute.xlu1 %1301 }
 0x846   :  { %1060 = vadd.xlane.f32.xlu0 %v1059_v35 }
 0x848   :  { %v8885_v36 = vpop.eup %8884 }
 0x849   :  { %v1062_v37 = vsel %vm223_vm6, %v8885_v36, 0.0  ;;  %v1300_v47 = vpop.permute.xlu1 %1299 }
 0x84a   :  { %1063 = vadd.xlane.f32.xlu0 %v1062_v37 }
 0x860   :  { %1221 = vrot.lane.b32.xlu0 %v9146_v56, %s12010_s25 }
 0x8d3   :  { %v1061_v38 = vpop.xlane.xlu0 %1060 }
 0x8d4   :  { %8886 = vrcp.f32 %v1061_v38 }
 0x8d7   :  { %v1064_v39 = vpop.xlane.xlu0 %1063 }
 0x8d8   :  { %8888 = vrcp.f32 %v1064_v39 }
 0x8db   :  { %v1222_v46 = vpop.permute.xlu0 %1221 }
 0x8de   :  { %v8887_v41 = vpop.eup %8886 }
 0x8df   :  { %v1066_v42 = vmul.f32 %v8887_v41, %v8883_v34 }
 0x8e1   :  { %8028 = vmatmul.mubr.msk.f32.vlgmr.msra.gmra.mrb[10].mxu0 %vm223_vm6, %v1066_v42 }
 0x8e2   :  { %v8889_v43 = vpop.eup %8888  ;;  %8036 = vmatpush3.xpose.msk.msra.mxu0 %vm223_vm6, %v1224_v40  ;;  %8037 = vmatprep.mubr.msk.f32.mxu0 %vm8987_vm5, %v8986_v51 }
 0x8e3   :  { %v1068_v45 = vmul.f32 %v8889_v43, %v8885_v36  ;;  %8045 = vmatprep.subr.mxu0 %v8986_v51 }
 0x8e5   :  { %8033 = vmatmul.mubr.msk.f32.vlgmr.msra.gmra.mrb[12].mxu1 %vm223_vm6, %v1068_v45  ;;  %8038 = vmatmul.mubr.msk.f32.vlgmr.msra.gmra.mrb[12].mxu0 %vm223_vm6, %v1222_v46 }
 0x8e6   :  { %8041 = vmatpush3.xpose.msk.msra.mxu1 %vm223_vm6, %v1302_v44  ;;  %8042 = vmatprep.mubr.msk.f32.mxu1 %vm8987_vm5, %v8986_v51 }
 0x8e7   :  { %8050 = vmatprep.subr.mxu1 %v8986_v51  ;;  %8047 = vmatprep.mubr.msk.f32.mxu0 %vm8987_vm5, %v8986_v51 }
 0x8e9   :  { %8043 = vmatmul.mubr.msk.f32.vlgmr.msra.gmra.mrb[14].mxu1 %vm223_vm6, %v1300_v47 }
 0x8ea   :  { %8052 = vmatprep.mubr.msk.f32.mxu1 %vm8987_vm5, %v8986_v51 }
 0x9b4   :  { %v1141_v48 = vpop.f32.mrb[10].mxu0 }
 0x9b5   :  { %v8029_v49 = vpop.f32.mrb[11].mxu0 }
 0x9b8   :  { %v1217_v50 = vpop.f32.mrb[12].mxu1  ;;  %v1295_v52 = vpop.f32.mrb[12].mxu0 }
 0x9b9   :  { %v1377_v53 = vmul.f32 0.35355338, %v1295_v52  ;;  %v8034_v55 = vpop.f32.mrb[13].mxu1  ;;  %v8039_v57 = vpop.f32.mrb[13].mxu0 }
 0x9bb   :  { %v1379_v58 = vsel %vm66_vm7, -1e+09, %v1377_v53 }
 0x9bc   :  { %v1373_v60 = vpop.f32.mrb[14].mxu1  ;;  %v1381_v61 = vsel %vm223_vm6, %v1379_v58, -inf }
 0x9bd   :  { %v1378_v62 = vmul.f32 0.35355338, %v1373_v60  ;;  %1382 = vmax.xlane.f32.xlu0 %v1381_v61  ;;  %v8044_v0 = vpop.f32.mrb[15].mxu1 }
 0x9bf   :  { %v1380_v1 = vsel %vm67_vm8, -1e+09, %v1378_v62 }
 0x9c0   :  { %v1384_v2 = vsel %vm223_vm6, %v1380_v1, -inf }
 0x9c1   :  { %1385 = vmax.xlane.f32.xlu1 %v1384_v2  ;;  %v1756_v2 = vld [vmem:[%s11995_s11 + $0x88] sm:$0xff] }
 0x9d2   :  { %1479 = vrot.lane.b32.xlu1 %v9144_v54, %s12008_s26 }
 0x9d6   :  { %1557 = vrot.lane.b32.xlu1 %v9256_v10, %s12006_s27 }
 0x9da   :  { %1559 = vrot.lane.b32.xlu1 %v9258_v12, %s12006_s27  ;;  %s12039_s27 = smov 24  }
 0x9de   :  { %1567 = vrot.lane.b32.xlu1 %v1217_v50, %s12004_s28 }
 0xa4a   :  { %v1383_v3 = vpop.xlane.xlu0 %1382 }
 0xa4b   :  { %v1387_v4 = vsub.f32 %v1379_v58, %v1383_v3  ;;  %v1742_v3 = vld [vmem:[%s11995_s11 + $0x18] sm:$0xff] }
 0xa4d   :  { %v1389_v7 = vmul.f32 1.442695, %v1387_v4 }
 0xa4e   :  { %v1386_v8 = vpop.xlane.xlu1 %1385 }
 0xa4f   :  { %8890 = vpow2.f32 %v1389_v7  ;;  %v1388_v9 = vsub.f32 %v1380_v1, %v1386_v8  ;;  %v1740_v1 = vld [vmem:[%s11995_s11 + $0x8] sm:$0xff]  ;;  %v1758_v7 = vld [vmem:[%s11995_s11 + $0x98] sm:$0xff]  ;;  %v1739_v8 = vld [vmem:[%s11995_s11] sm:$0xff] }
 0xa50   :  { %v8184_v4 = vpack.c.bf16 %v1756_v2, %v1740_v1  ;;  %v1794_v1 = vld [vmem:[%s11995_s11 + $0x1b8] sm:$0xff] }
 0xa51   :  { %v1391_v11 = vmul.f32 1.442695, %v1388_v9  ;;  %v1755_v9 = vld [vmem:[%s11995_s11 + $0x80] sm:$0xff] }
 0xa52   :  { %v1480_v13 = vpop.permute.xlu1 %1479 }
 0xa53   :  { %8892 = vpow2.f32 %v1391_v11  ;;  %8051 = vmatpush3.msra.mxu1 %v1480_v13  ;;  %v8192_v11 = vpack.c.bf16 %v1758_v7, %v1742_v3  ;;  %v8186_v13 = vpack.c.bf16 %v1755_v9, %v1739_v8  ;;  %v1791_v9 = vld [vmem:[%s11995_s11 + $0x1a0] sm:$0xff] }
 0xa54   :  { %8185 = vmatprep.subr.bf16.mxu1 %v8184_v4  ;;  %v1775_v4 = vld [vmem:[%s11995_s11 + $0x120] sm:$0xff] }
 0xa56   :  { %v1558_v32 = vpop.permute.xlu1 %1557 }
 0xa57   :  { %v1579_v36 = vsel %vm223_vm6, %v9214_v31, %v1558_v32  ;;  %v6856_v31 = vld [vmem:[%s11992_s8] ss:$0 sm:$0xff] }
 0xa59   :  { %v8891_v54 = vpop.eup %8890 }
 0xa5a   :  { %v1393_v14 = vsel %vm223_vm6, %v8891_v54, 0.0  ;;  %v1560_v34 = vpop.permute.xlu1 %1559 }
 0xa5b   :  { %1394 = vadd.xlane.f32.xlu0 %v1393_v14  ;;  %v1580_v41 = vsel %vm223_vm6, %v9216_v33, %v1560_v34  ;;  %v1757_v14 = vld [vmem:[%s11995_s11 + $0x90] sm:$0xff] }
 0xa5d   :  { %v8893_v10 = vpop.eup %8892 }
 0xa5e   :  { %v1396_v12 = vsel %vm223_vm6, %v8893_v10, 0.0  ;;  %v1568_v37 = vpop.permute.xlu1 %1567 }
 0xa5f   :  { %1397 = vadd.xlane.f32.xlu0 %v1396_v12  ;;  %v1583_v42 = vsel %vm1581_vm10, %v1580_v41, %v1568_v37  ;;  %v1772_v12 = vld [vmem:[%s11995_s11 + $0x108] sm:$0xff] }
 0xa75   :  { %1403 = vrot.lane.b32.xlu0 %v9146_v56, %s12008_s26  ;;  %v1587_v56 = vld [vmem:[%s11991_s7] sm:$0xff] }
 0xa76   :  { %v8176_v23 = vpack.c.bf16 %v1588_v22, %v1587_v56  ;;  %v1773_v22 = vld [vmem:[%s11995_s11 + $0x110] sm:$0xff] }
 0xa79   :  { %1565 = vrot.lane.b32.xlu0 %v1141_v48, %s12004_s28 }
 0xae8   :  { %v1395_v15 = vpop.xlane.xlu0 %1394 }
 0xae9   :  { %8894 = vrcp.f32 %v1395_v15  ;;  %v1788_v15 = vld [vmem:[%s11995_s11 + $0x188] sm:$0xff] }
 0xaec   :  { %v1398_v16 = vpop.xlane.xlu0 %1397 }
 0xaed   :  { %8896 = vrcp.f32 %v1398_v16  ;;  %v1774_v16 = vld [vmem:[%s11995_s11 + $0x118] sm:$0xff] }
 0xaf0   :  { %v1404_v17 = vpop.permute.xlu0 %1403 }
 0xaf1   :  { %8046 = vmatpush3.msra.mxu0 %v1404_v17  ;;  %v8188_v17 = vpack.c.bf16 %v1788_v15, %v1772_v12  ;;  %v1764_v15 = vld [vmem:[%s11995_s11 + $0xc8] sm:$0xff] }
 0xaf2   :  { %8177 = vmatprep.subr.bf16.mxu0 %v8176_v23 }
 0xaf3   :  { %v8895_v18 = vpop.eup %8894 }
 0xaf4   :  { %v1400_v19 = vmul.f32 %v8895_v18, %v8891_v54  ;;  %v1566_v35 = vpop.permute.xlu0 %1565  ;;  %v1741_v54 = vld [vmem:[%s11995_s11 + $0x10] sm:$0xff]  ;;  %v1790_v18 = vld [vmem:[%s11995_s11 + $0x198] sm:$0xff] }
 0xaf5   :  { %v1582_v38 = vsel %vm1581_vm10, %v1579_v36, %v1566_v35 }
 0xaf6   :  { %8048 = vmatmul.mubr.msk.f32.vlgmr.msra.gmra.mrb[14].mxu0 %vm223_vm6, %v1400_v19  ;;  %v1771_v19 = vld [vmem:[%s11995_s11 + $0x100] sm:$0xff] }
 0xaf7   :  { %v8897_v20 = vpop.eup %8896  ;;  %8179 = vmatpush3.bf16.msra.mxu0 %v8176_v23  ;;  %v1789_v23 = vld [vmem:[%s11995_s11 + $0x190] sm:$0xff] }
 0xaf8   :  { %v1402_v21 = vmul.f32 %v8897_v20, %v8893_v10  ;;  %8181 = vmatprep.subr.bf16.mxu0 %v8180_v26  ;;  %v8194_v10 = vpack.c.bf16 %v1757_v14, %v1741_v54  ;;  %v1787_v20 = vld [vmem:[%s11995_s11 + $0x180] sm:$0xff]  ;;  %v8198_v24 = vpack.c.bf16 %v1789_v23, %v1773_v22  ;;  %v1749_v22 = vld [vmem:[%s11995_s11 + $0x50] sm:$0xff] }
 0xaf9   :  { %v8190_v56 = vpack.c.bf16 %v1787_v20, %v1771_v19  ;;  %v1747_v20 = vld [vmem:[%s11995_s11 + $0x40] sm:$0xff]  ;;  %v1765_v23 = vld [vmem:[%s11995_s11 + $0xd0] sm:$0xff] }
 0xafa   :  { %8053 = vmatmul.mubr.msk.f32.vlgmr.msra.gmra.mrb[16].mxu1 %vm223_vm6, %v1402_v21  ;;  %v8196_v21 = vpack.c.bf16 %v1790_v18, %v1774_v16  ;;  %v1750_v16 = vld [vmem:[%s11995_s11 + $0x58] sm:$0xff]  ;;  %v8206_v18 = vpack.c.bf16 %v1791_v9, %v1775_v4  ;;  %v2557_v4 = vld [vmem:[%s11997_s13 + $0x80] sm:$0xff] }
 0xafb   :  { %1957 = vmatprep.mubr.f32.mxu1 %v8986_v51  ;;  %8183 = vmatpush3.bf16.msra.mxu0 %v8180_v26  ;;  %v1760_v26 = vld [vmem:[%s11995_s11 + $0xa8] sm:$0xff]  ;;  %v2589_v9 = vld [vmem:[%s11997_s13 + $0x180] sm:$0xff] }
 0xafc   :  { %8193 = vmatprep.subr.bf16.mxu0 %v8192_v11  ;;  %8187 = vmatpush1.bf16.msra.mxu1 %v8186_v13  ;;  %v1777_v11 = vld [vmem:[%s11995_s11 + $0x130] sm:$0xff] }
 0xafd   :  { %8189 = vmatprep.subr.bf16.mxu1 %v8188_v17  ;;  %v1793_v13 = vld [vmem:[%s11995_s11 + $0x1b0] sm:$0xff]  ;;  %v1766_v17 = vld [vmem:[%s11995_s11 + $0xd8] sm:$0xff] }
 0xafe   :  { %v8214_v19 = vpack.c.bf16 %v1793_v13, %v1777_v11  ;;  %v2590_v11 = vld [vmem:[%s11997_s13 + $0x188] sm:$0xff] }
 0xb00   :  { %8191 = vmatpush1.bf16.msra.mxu1 %v8190_v56  ;;  %v1763_v56 = vld [vmem:[%s11995_s11 + $0xc0] sm:$0xff] }
 0xbc9   :  { %v1475_v27 = vpop.f32.mrb[14].mxu0 }
 0xbca   :  { %1573 = vrot.lane.b32.xlu0 %v1475_v27, %s12012_s0  ;;  %v8049_v28 = vpop.f32.mrb[15].mxu0  ;;  %v8200_v27 = vpack.c.bf16 %v1760_v26, %v1744_v25  ;;  %v8224_v25 = vpack.c.bf16 %v1766_v17, %v1750_v16  ;;  %v1780_v26 = vld [vmem:[%s11995_s11 + $0x148] sm:$0xff]  ;;  %v2559_v17 = vld [vmem:[%s11997_s13 + $0x90] sm:$0xff] }
 0xbcb   :  { %v1746_v28 = vld [vmem:[%s11995_s11 + $0x38] sm:$0xff]  ;;  %v2574_v16 = vld [vmem:[%s11997_s13 + $0x108] sm:$0xff] }
 0xbcc   :  { %8201 = vmatprep.subr.bf16.mxu1 %v8200_v27  ;;  %v1796_v27 = vld [vmem:[%s11995_s11 + $0x1c8] sm:$0xff] }
 0xbcd   :  { %v1551_v29 = vpop.f32.mrb[16].mxu1 }
 0xbce   :  { %1575 = vrot.lane.b32.xlu1 %v1551_v29, %s12012_s0  ;;  %v8054_v30 = vpop.f32.mrb[17].mxu1  ;;  %v1762_v29 = vld [vmem:[%s11995_s11 + $0xb8] sm:$0xff] }
 0xbcf   :  { %v8208_v30 = vpack.c.bf16 %v1762_v29, %v1746_v28  ;;  %v1782_v28 = vld [vmem:[%s11995_s11 + $0x158] sm:$0xff] }
 0xbd0   :  { %v1798_v29 = vld [vmem:[%s11995_s11 + $0x1d8] sm:$0xff] }
 0xc3c   :  { %v1574_v39 = vpop.permute.xlu0 %1573 }
 0xc3d   :  { %v1585_v40 = vsel %vm1584_vm9, %v1582_v38, %v1574_v39 }
 0xc3e   :  { %8063 = vmatprep.mubr.msk.f32.mxu0 %vm70_vm0, %v1585_v40 }
 0xc40   :  { %v1576_v43 = vpop.permute.xlu1 %1575 }
 0xc41   :  { %v1586_v44 = vsel %vm1584_vm9, %v1583_v42, %v1576_v43 }
 0xc42   :  { %8064 = vmatmul.mubr.msk.f32.vlgmr.msra.gmra.mrb[16].mxu0 %vm70_vm0, %v1586_v44 }
 0xc43   :  { %2034 = vmatprep.mubr.f32.mxu0 %v8986_v51  ;;  %8195 = vmatpush1.bf16.msra.mxu0 %v8194_v10 }
 0xc44   :  { %8197 = vmatprep.subr.bf16.mxu0 %v8196_v21 }
 0xc47   :  { %8199 = vmatpush1.bf16.msra.mxu0 %v8198_v24 }
 0xc48   :  { %8209 = vmatprep.subr.bf16.mxu0 %v8208_v30  ;;  %v8218_v30 = vpack.c.bf16 %v1763_v56, %v1747_v20  ;;  %v2592_v20 = vld [vmem:[%s11997_s13 + $0x198] sm:$0xff] }
 0xd15   :  { %v8065_v45 = vpop.f32.mrb[16].mxu0 }
 0xd16   :  { %v1676_v46 = vadd.f32 %v8065_v45, %v6856_v31  ;;  %v1670_v47 = vpop.f32.mrb[17].mxu0 }
 0xd17   :  { %v1671_v48 = vadd.f32 %v6856_v31, %v1670_v47 }
 0xd18   :  { %v9348_v49 = vadd.f32 %v1676_v46, %v9105_v6 }
 0xd19   :  { %v9351_v33 = vadd.f32 %v1671_v48, %v9103_v5  ;;  %v6859_v48 = vld [vmem:[%s11993_s9] ss:$0 sm:$0xff] }
 0xd1a   :  { %v1686_v50 = vsel %vm70_vm0, %v9348_v49, 0.0 }
 0xd1b   :  { %1687 = vadd.xlane.f32.xlu1 %v1686_v50  ;;  %v1683_v52 = vsel %vm70_vm0, %v9351_v33, 0.0  ;;  %v1743_v50 = vld [vmem:[%s11995_s11 + $0x20] sm:$0xff] }
 0xd1c   :  { %1684 = vadd.xlane.f32.xlu0 %v1683_v52 }
 0xda8   :  { %v1688_v53 = vpop.xlane.xlu1 %1687 }
 0xda9   :  { %v1690_v55 = vmul.f32 0.03125, %v1688_v53  ;;  %v1685_v57 = vpop.xlane.xlu0 %1684  ;;  %v1759_v53 = vld [vmem:[%s11995_s11 + $0xa0] sm:$0xff] }
 0xdaa   :  { %v1689_v58 = vmul.f32 0.03125, %v1685_v57  ;;  %v1761_v57 = vld [vmem:[%s11995_s11 + $0xb0] sm:$0xff]  ;;  %v8202_v2 = vpack.c.bf16 %v1759_v53, %v1743_v50  ;;  %v1784_v53 = vld [vmem:[%s11995_s11 + $0x168] sm:$0xff] }
 0xdab   :  { %v9358_v60 = vsub.f32 %v9348_v49, %v1690_v55  ;;  %v1745_v55 = vld [vmem:[%s11995_s11 + $0x30] sm:$0xff] }
 0xdac   :  { %v9361_v6 = vsub.f32 %v9351_v33, %v1689_v58  ;;  %v8210_v3 = vpack.c.bf16 %v1761_v57, %v1745_v55  ;;  %v1800_v55 = vld [vmem:[%s11995_s11 + $0x1e8] sm:$0xff]  ;;  %v1786_v57 = vld [vmem:[%s11995_s11 + $0x178] sm:$0xff] }
 0xdad   :  { %v1694_v62 = vmul.f32 %v9358_v60, %v9358_v60  ;;  %v1710_v7 = vmul.f32 %v6859_v48, %v9358_v60  ;;  %v1748_v60 = vld [vmem:[%s11995_s11 + $0x48] sm:$0xff] }
 0xdae   :  { %v1693_v5 = vmul.f32 %v9361_v6, %v9361_v6  ;;  %v1709_v52 = vmul.f32 %v6859_v48, %v9361_v6  ;;  %v1776_v6 = vld [vmem:[%s11995_s11 + $0x128] sm:$0xff]  ;;  %v8216_v24 = vpack.c.bf16 %v1764_v15, %v1748_v60  ;;  %v1769_v48 = vld [vmem:[%s11995_s11 + $0xf0] sm:$0xff]  ;;  %v2573_v15 = vld [vmem:[%s11997_s13 + $0x100] sm:$0xff] }
 0xdaf   :  { %v1698_v0 = vsel %vm70_vm0, %v1694_v62, 0.0  ;;  %v1792_v62 = vld [vmem:[%s11995_s11 + $0x1a8] sm:$0xff] }
 0xdb0   :  { %v1695_v61 = vsel %vm70_vm0, %v1693_v5, 0.0  ;;  %v6860_v5 = vld [vmem:[%s11994_s10] ss:$0 sm:$0xff]  ;;  %v8204_v14 = vpack.c.bf16 %v1792_v62, %v1776_v6 }
 0xdb1   :  { %1696 = vadd.xlane.f32.xlu0 %v1695_v61  ;;  %v1799_v62 = vld [vmem:[%s11995_s11 + $0x1e0] sm:$0xff] }
 0xdb5   :  { %1699 = vadd.xlane.f32.xlu0 %v1698_v0  ;;  %v1778_v0 = vld [vmem:[%s11995_s11 + $0x138] sm:$0xff] }
 0xdb6   :  { %v8212_v10 = vpack.c.bf16 %v1794_v1, %v1778_v0  ;;  %v1785_v0 = vld [vmem:[%s11995_s11 + $0x170] sm:$0xff] }
 0xdb7   :  { %v1801_v1 = vld [vmem:[%s11995_s11 + $0x1f0] sm:$0xff] }
 0xe3e   :  { %v1697_v32 = vpop.xlane.xlu0 %1696 }
 0xe3f   :  { %v1701_v34 = vmul.f32 0.032258064, %v1697_v32  ;;  %v8226_v32 = vpack.c.bf16 %v1765_v23, %v1749_v22  ;;  %v8282_v22 = vpack.c.bf16 %v2574_v16, %v2573_v15  ;;  %v2543_v23 = vld [vmem:[%s11997_s13 + $0x10] sm:$0xff] }
 0xe40   :  { %v2583_v16 = vld [vmem:[%s11997_s13 + $0x150] sm:$0xff] }
 0xe41   :  { %8898 = vrsqrt.f32 %v1701_v34  ;;  %vm1713_vm11 = vcmp.eq.f32.partialorder %v1701_v34, inf  ;;  %v1716_v39 = vand.u32 2147483648, %v1701_v34  ;;  %vm1715_vm12 = vcmp.eq.f32.partialorder %v1701_v34, 0.0 }
 0xe42   :  { %v1700_v35 = vpop.xlane.xlu0 %1699 }
 0xe43   :  { %v1702_v36 = vmul.f32 0.032258064, %v1700_v35  ;;  %v1795_v35 = vld [vmem:[%s11995_s11 + $0x1c0] sm:$0xff] }
 0xe45   :  { %8900 = vrsqrt.f32 %v1702_v36  ;;  %vm1720_vm13 = vcmp.eq.f32.partialorder %v1702_v36, inf  ;;  %v1723_v31 = vand.u32 2147483648, %v1702_v36  ;;  %vm1722_vm14 = vcmp.eq.f32.partialorder %v1702_v36, 0.0 }
 0xe4b   :  { %v8899_v37 = vpop.eup %8898 }
 0xe4c   :  { %v1712_v38 = vmul.f32 %v8899_v37, %v1701_v34  ;;  %v1797_v37 = vld [vmem:[%s11995_s11 + $0x1d0] sm:$0xff] }
 0xe4e   :  { %v1714_v40 = vsel %vm1713_vm11, %v1701_v34, %v1712_v38  ;;  %v1779_v34 = vld [vmem:[%s11995_s11 + $0x140] sm:$0xff]  ;;  %v8220_v38 = vpack.c.bf16 %v1796_v27, %v1780_v26  ;;  %v2575_v27 = vld [vmem:[%s11997_s13 + $0x110] sm:$0xff] }
 0xe4f   :  { %v8901_v41 = vpop.eup %8900  ;;  %v1717_v42 = vsel %vm1715_vm12, %v1716_v39, %v1714_v40  ;;  %v8228_v39 = vpack.c.bf16 %v1798_v29, %v1782_v28  ;;  %v1752_v40 = vld [vmem:[%s11995_s11 + $0x68] sm:$0xff]  ;;  %v2576_v28 = vld [vmem:[%s11997_s13 + $0x118] sm:$0xff]  ;;  %v2561_v29 = vld [vmem:[%s11997_s13 + $0xa0] sm:$0xff] }
 0xe50   :  { %v1725_v43 = vadd.f32 1e-06, %v1717_v42  ;;  %v1719_v44 = vmul.f32 %v8901_v41, %v1702_v36  ;;  %v1768_v41 = vld [vmem:[%s11995_s11 + $0xe8] sm:$0xff]  ;;  %v1754_v42 = vld [vmem:[%s11995_s11 + $0x78] sm:$0xff] }
 0xe51   :  { %v8232_v50 = vpack.c.bf16 %v1768_v41, %v1752_v40  ;;  %v2577_v40 = vld [vmem:[%s11997_s13 + $0x120] sm:$0xff]  ;;  %v2578_v41 = vld [vmem:[%s11997_s13 + $0x128] sm:$0xff] }
 0xe52   :  { %8902 = vrcp.f32 %v1725_v43  ;;  %v1721_v45 = vsel %vm1720_vm13, %v1702_v36, %v1719_v44  ;;  %v1781_v36 = vld [vmem:[%s11995_s11 + $0x150] sm:$0xff]  ;;  %v1770_v43 = vld [vmem:[%s11995_s11 + $0xf8] sm:$0xff]  ;;  %v8222_v44 = vpack.c.bf16 %v1795_v35, %v1779_v34  ;;  %v2594_v34 = vld [vmem:[%s11997_s13 + $0x1a8] sm:$0xff] }
 0xe53   :  { %v1724_v46 = vsel %vm1722_vm14, %v1723_v31, %v1721_v45  ;;  %v8230_v31 = vpack.c.bf16 %v1797_v37, %v1781_v36  ;;  %v1751_v45 = vld [vmem:[%s11995_s11 + $0x60] sm:$0xff]  ;;  %v2546_v37 = vld [vmem:[%s11997_s13 + $0x28] sm:$0xff] }
 0xe54   :  { %v1726_v47 = vadd.f32 1e-06, %v1724_v46  ;;  %v1767_v46 = vld [vmem:[%s11995_s11 + $0xe0] sm:$0xff] }
 0xe55   :  { %v2545_v36 = vld [vmem:[%s11997_s13 + $0x20] sm:$0xff] }
 0xe56   :  { %8904 = vrcp.f32 %v1726_v47  ;;  %v1753_v47 = vld [vmem:[%s11995_s11 + $0x70] sm:$0xff] }
 0xe57   :  { %v8242_v6 = vpack.c.bf16 %v1769_v48, %v1753_v47  ;;  %v2548_v47 = vld [vmem:[%s11997_s13 + $0x38] sm:$0xff] }
 0xe5c   :  { %v8903_v58 = vpop.eup %8902 }
 0xe5d   :  { %v1728_v61 = vmul.f32 %v8903_v58, %v1709_v52  ;;  %v8240_v52 = vpack.c.bf16 %v1770_v43, %v1754_v42  ;;  %v1802_v58 = vld [vmem:[%s11995_s11 + $0x1f8] sm:$0xff]  ;;  %v2563_v42 = vld [vmem:[%s11997_s13 + $0xb0] sm:$0xff] }
 0xe5e   :  { %v2564_v43 = vld [vmem:[%s11997_s13 + $0xb8] sm:$0xff] }
 0xe5f   :  { %v9464_v8 = vadd.f32 %v6860_v5, %v1728_v61  ;;  %v1783_v61 = vld [vmem:[%s11995_s11 + $0x160] sm:$0xff]  ;;  %v8260_v48 = vpack.c.bf16 %v2564_v43, %v2563_v42  ;;  %v2587_v42 = vld [vmem:[%s11997_s13 + $0x170] sm:$0xff]  ;;  %v2588_v43 = vld [vmem:[%s11997_s13 + $0x178] sm:$0xff] }
 0xe60   :  { %v8905_v54 = vpop.eup %8904  ;;  %v8238_v13 = vpack.c.bf16 %v1799_v62, %v1783_v61  ;;  %v2549_v62 = vld [vmem:[%s11997_s13 + $0x40] sm:$0xff] }
 0xe61   :  { %v1730_v12 = vmul.f32 %v8905_v54, %v1710_v7  ;;  %6861 = vmatmul.mubr.msk.f32.vlgmr.msra.gmra.mrb[18].mxu1 %vm70_vm0, %v9464_v8  ;;  %6863 = vmatmul.mubr.msk.f32.vlgmr.msra.gmra.mrb[18].mxu0 %vm70_vm0, %v9464_v8  ;;  %v2558_v7 = vld [vmem:[%s11997_s13 + $0x88] sm:$0xff]  ;;  %v8246_v54 = vpack.c.bf16 %v1801_v1, %v1785_v0 }
 0xe62   :  { %8203 = vmatpush1.bf16.msra.mxu1 %v8202_v2  ;;  %8211 = vmatpush1.bf16.msra.mxu0 %v8210_v3  ;;  %v8236_v2 = vpack.c.bf16 %v1800_v55, %v1784_v53  ;;  %v8244_v3 = vpack.c.bf16 %v1802_v58, %v1786_v57  ;;  %v8248_v60 = vpack.c.bf16 %v2558_v7, %v2557_v4  ;;  %v2580_v53 = vld [vmem:[%s11997_s13 + $0x138] sm:$0xff]  ;;  %v2565_v55 = vld [vmem:[%s11997_s13 + $0xc0] sm:$0xff]  ;;  %v2566_v57 = vld [vmem:[%s11997_s13 + $0xc8] sm:$0xff] }
 0xe63   :  { %1963 = vmatprep.mubr.f32.mxu1 %v8986_v51  ;;  %2040 = vmatprep.mubr.f32.mxu0 %v8986_v51  ;;  %v9496_v21 = vadd.f32 %v6860_v5, %v1730_v12  ;;  %v8234_v5 = vpack.c.bf16 %v1767_v46, %v1751_v45  ;;  %v8280_v12 = vpack.c.bf16 %v2590_v11, %v2589_v9  ;;  %v2597_v58 = vld [vmem:[%s11997_s13 + $0x1c0] sm:$0xff]  ;;  %v2550_v0 = vld [vmem:[%s11997_s13 + $0x48] sm:$0xff]  ;;  %v2567_v7 = vld [vmem:[%s11997_s13 + $0xd0] sm:$0xff] }
 0xe64   :  { %8205 = vmatprep.subr.bf16.mxu1 %v8204_v14  ;;  %8213 = vmatprep.subr.bf16.mxu0 %v8212_v10  ;;  %v2541_v14 = vld [vmem:[%s11997_s13] sm:$0xff]  ;;  %v2542_v10 = vld [vmem:[%s11997_s13 + $0x8] sm:$0xff]  ;;  %v8258_v45 = vpack.c.bf16 %v2546_v37, %v2545_v36  ;;  %v8290_v46 = vpack.c.bf16 %v2578_v41, %v2577_v40  ;;  %v8264_v1 = vpack.c.bf16 %v2566_v57, %v2565_v55  ;;  %v2568_v9 = vld [vmem:[%s11997_s13 + $0xd8] sm:$0xff] }
 0xe65   :  { %6862 = vmatmul.mubr.msk.f32.gmra.mrb[20].mxu1 %vm70_vm0, %v9496_v21  ;;  %6864 = vmatmul.mubr.msk.f32.gmra.mrb[20].mxu0 %vm70_vm0, %v9496_v21  ;;  %v8250_v56 = vpack.c.bf16 %v2542_v10, %v2541_v14  ;;  %v2582_v4 = vld [vmem:[%s11997_s13 + $0x148] sm:$0xff]  ;;  %v2599_v11 = vld [vmem:[%s11997_s13 + $0x1d0] sm:$0xff]  ;;  %v2604_v37 = vld [vmem:[%s11997_s13 + $0x1f8] sm:$0xff] }
 0xe66   :  { %8207 = vmatpush1.bf16.msra.mxu1 %v8206_v18  ;;  %8215 = vmatpush1.bf16.msra.mxu0 %v8214_v19  ;;  %v2560_v18 = vld [vmem:[%s11997_s13 + $0x98] sm:$0xff]  ;;  %v2591_v19 = vld [vmem:[%s11997_s13 + $0x190] sm:$0xff]  ;;  %v9834_v57 = vld [vmem:[%s12029_s21] sm:$0xff] }
 0xe67   :  { %2111 = vmatprep.mubr.f32.mxu1 %v8986_v51  ;;  %2188 = vmatprep.mubr.f32.mxu0 %v8986_v51  ;;  %v8284_v26 = vpack.c.bf16 %v2592_v20, %v2591_v19  ;;  %v2551_v10 = vld [vmem:[%s11997_s13 + $0x50] sm:$0xff]  ;;  %v2570_v19 = vld [vmem:[%s11997_s13 + $0xe8] sm:$0xff]  ;;  %v2601_v20 = vld [vmem:[%s11997_s13 + $0x1e0] sm:$0xff] }
 0xe68   :  { %8217 = vmatprep.subr.bf16.mxu1 %v8216_v24  ;;  %8225 = vmatprep.subr.bf16.mxu0 %v8224_v25  ;;  %v2544_v24 = vld [vmem:[%s11997_s13 + $0x18] sm:$0xff]  ;;  %v8252_v25 = vpack.c.bf16 %v2560_v18, %v2559_v17  ;;  %v2569_v18 = vld [vmem:[%s11997_s13 + $0xe0] sm:$0xff] }
 0xe69   :  { %6865 = vmatmul.mubr.msk.f32.vlgmr.msra.gmra.mrb[22].mxu1 %vm70_vm0, %v9464_v8  ;;  %6867 = vmatmul.mubr.msk.f32.vlgmr.msra.gmra.mrb[22].mxu0 %vm70_vm0, %v9464_v8  ;;  %v8254_v35 = vpack.c.bf16 %v2544_v24, %v2543_v23  ;;  %v2584_v17 = vld [vmem:[%s11997_s13 + $0x158] sm:$0xff]  ;;  %v2553_v24 = vld [vmem:[%s11997_s13 + $0x60] sm:$0xff] }
 0xe6a   :  { %8219 = vmatpush1.bf16.msra.mxu1 %v8218_v30  ;;  %8227 = vmatpush1.bf16.msra.mxu0 %v8226_v32  ;;  %v2562_v30 = vld [vmem:[%s11997_s13 + $0xa8] sm:$0xff]  ;;  %v2593_v32 = vld [vmem:[%s11997_s13 + $0x1a0] sm:$0xff]  ;;  %v8302_v23 = vpack.c.bf16 %v2584_v17, %v2583_v16  ;;  %v2656_v16 = vld [vmem:[%s11997_s13 + $0x398] sm:$0xff] }
 0xe6b   :  { %2117 = vmatprep.mubr.f32.mxu1 %v8986_v51  ;;  %2194 = vmatprep.mubr.f32.mxu0 %v8986_v51 }
 0xe6c   :  { %8221 = vmatprep.subr.bf16.mxu1 %v8220_v38  ;;  %8229 = vmatprep.subr.bf16.mxu0 %v8228_v39  ;;  %v8256_v38 = vpack.c.bf16 %v2562_v30, %v2561_v29  ;;  %v8288_v39 = vpack.c.bf16 %v2594_v34, %v2593_v32  ;;  %v2586_v29 = vld [vmem:[%s11997_s13 + $0x168] sm:$0xff]  ;;  %v2571_v34 = vld [vmem:[%s11997_s13 + $0xf0] sm:$0xff] }
 0xe6d   :  { %6866 = vmatmul.mubr.msk.f32.gmra.mrb[24].mxu1 %vm70_vm0, %v9496_v21  ;;  %6868 = vmatmul.mubr.msk.f32.gmra.mrb[24].mxu0 %vm70_vm0, %v9496_v21 }
 0xe6e   :  { %8223 = vmatpush1.bf16.msra.mxu1 %v8222_v44  ;;  %8231 = vmatpush1.bf16.msra.mxu0 %v8230_v31  ;;  %v2595_v44 = vld [vmem:[%s11997_s13 + $0x1b0] sm:$0xff]  ;;  %v2596_v31 = vld [vmem:[%s11997_s13 + $0x1b8] sm:$0xff] }
 0xe6f   :  { %2265 = vmatprep.mubr.f32.mxu1 %v8986_v51  ;;  %2342 = vmatprep.mubr.f32.mxu0 %v8986_v51 }
 0xe70   :  { %8233 = vmatprep.subr.bf16.mxu1 %v8232_v50  ;;  %8241 = vmatprep.subr.bf16.mxu0 %v8240_v52  ;;  %v8292_v50 = vpack.c.bf16 %v2596_v31, %v2595_v44  ;;  %v2579_v52 = vld [vmem:[%s11997_s13 + $0x130] sm:$0xff]  ;;  %v8310_v44 = vpack.c.bf16 %v2588_v43, %v2587_v42  ;;  %v2621_v31 = vld [vmem:[%s11997_s13 + $0x280] sm:$0xff] }
 0xe71   :  { %6869 = vmatmul.mubr.msk.f32.vlgmr.msra.gmra.mrb[26].mxu1 %vm70_vm0, %v9464_v8  ;;  %6871 = vmatmul.mubr.msk.f32.vlgmr.msra.gmra.mrb[26].mxu0 %vm70_vm0, %v9464_v8  ;;  %v8294_v61 = vpack.c.bf16 %v2580_v53, %v2579_v52 }
 0xe72   :  { %8235 = vmatpush1.bf16.msra.mxu1 %v8234_v5  ;;  %8243 = vmatpush1.bf16.msra.mxu0 %v8242_v6  ;;  %v2598_v5 = vld [vmem:[%s11997_s13 + $0x1c8] sm:$0xff] }
 0xe73   :  { %2271 = vmatprep.mubr.f32.mxu1 %v8986_v51  ;;  %2348 = vmatprep.mubr.f32.mxu0 %v8986_v51 }
 0xe74   :  { %8237 = vmatprep.subr.bf16.mxu1 %v8236_v2  ;;  %8245 = vmatprep.subr.bf16.mxu0 %v8244_v3  ;;  %v8296_v2 = vpack.c.bf16 %v2598_v5, %v2597_v58  ;;  %v2581_v3 = vld [vmem:[%s11997_s13 + $0x140] sm:$0xff] }
 0xe75   :  { %6870 = vmatmul.mubr.msk.f32.gmra.mrb[28].mxu1 %vm70_vm0, %v9496_v21  ;;  %6872 = vmatmul.mubr.msk.f32.gmra.mrb[28].mxu0 %vm70_vm0, %v9496_v21  ;;  %v8298_v14 = vpack.c.bf16 %v2582_v4, %v2581_v3 }
 0xe76   :  { %8239 = vmatpush1.bf16.msra.mxu1 %v8238_v13  ;;  %8247 = vmatpush1.bf16.msra.mxu0 %v8246_v54  ;;  %v2600_v13 = vld [vmem:[%s11997_s13 + $0x1d8] sm:$0xff]  ;;  %v8266_v54 = vpack.c.bf16 %v2550_v0, %v2549_v62 }
 0xe77   :  { %2419 = vmatprep.mubr.f32.mxu1 %v8986_v51  ;;  %2496 = vmatprep.mubr.f32.mxu0 %v8986_v51  ;;  %v8300_v15 = vpack.c.bf16 %v2600_v13, %v2599_v11  ;;  %v2638_v11 = vld [vmem:[%s11997_s13 + $0x308] sm:$0xff]  ;;  %v2623_v13 = vld [vmem:[%s11997_s13 + $0x290] sm:$0xff] }
 0xe78   :  { %8249 = vmatprep.subr.bf16.mxu1 %v8248_v60  ;;  %8281 = vmatprep.subr.bf16.mxu0 %v8280_v12  ;;  %v2552_v60 = vld [vmem:[%s11997_s13 + $0x58] sm:$0xff]  ;;  %v8268_v12 = vpack.c.bf16 %v2568_v9, %v2567_v7  ;;  %v2637_v9 = vld [vmem:[%s11997_s13 + $0x300] sm:$0xff] }
 0xe79   :  { %6873 = vmatmul.mubr.msk.f32.vlgmr.msra.gmra.mrb[30].mxu1 %vm70_vm0, %v9464_v8  ;;  %6875 = vmatmul.mubr.msk.f32.vlgmr.msra.gmra.mrb[30].mxu0 %vm70_vm0, %v9464_v8  ;;  %v8286_v8 = vpack.c.bf16 %v2576_v28, %v2575_v27  ;;  %v2554_v27 = vld [vmem:[%s11997_s13 + $0x68] sm:$0xff]  ;;  %v2585_v28 = vld [vmem:[%s11997_s13 + $0x160] sm:$0xff] }
 0xe7a   :  { %2425 = vmatprep.mubr.f32.mxu1 %v8986_v51  ;;  %2502 = vmatprep.mubr.f32.mxu0 %v8986_v51  ;;  %v8274_v30 = vpack.c.bf16 %v2554_v27, %v2553_v24  ;;  %v8306_v32 = vpack.c.bf16 %v2586_v29, %v2585_v28 }
 0xe7b   :  { %8251 = vmatpush3.bf16.msra.mxu1 %v8250_v56  ;;  %8283 = vmatpush3.bf16.msra.mxu0 %v8282_v22  ;;  %v2602_v56 = vld [vmem:[%s11997_s13 + $0x1e8] sm:$0xff]  ;;  %v8270_v22 = vpack.c.bf16 %v2552_v60, %v2551_v10 }
 0xe7c   :  { %8253 = vmatprep.subr.bf16.mxu1 %v8252_v25  ;;  %8285 = vmatprep.subr.bf16.mxu0 %v8284_v26  ;;  %v8272_v25 = vpack.c.bf16 %v2570_v19, %v2569_v18  ;;  %v8304_v26 = vpack.c.bf16 %v2602_v56, %v2601_v20  ;;  %v8346_v56 = vpack.c.bf16 %v2638_v11, %v2637_v9 }
 0xe7d   :  { %6874 = vmatmul.mubr.msk.f32.gmra.mrb[32].mxu1 %vm70_vm0, %v9496_v21  ;;  %6876 = vmatmul.mubr.msk.f32.gmra.mrb[32].mxu0 %vm70_vm0, %v9496_v21  ;;  %v2547_v21 = vld [vmem:[%s11997_s13 + $0x30] sm:$0xff] }
 0xe7e   :  { %v8262_v6 = vpack.c.bf16 %v2548_v47, %v2547_v21  ;;  %v2654_v47 = vld [vmem:[%s11997_s13 + $0x388] sm:$0xff] }
 0xe7f   :  { %8255 = vmatpush3.bf16.msra.mxu1 %v8254_v35  ;;  %8287 = vmatpush3.bf16.msra.mxu0 %v8286_v8  ;;  %v2572_v35 = vld [vmem:[%s11997_s13 + $0xf8] sm:$0xff]  ;;  %v2603_v8 = vld [vmem:[%s11997_s13 + $0x1f0] sm:$0xff] }
 0xe80   :  { %8257 = vmatprep.subr.bf16.mxu1 %v8256_v38  ;;  %8289 = vmatprep.subr.bf16.mxu0 %v8288_v39  ;;  %v8276_v36 = vpack.c.bf16 %v2572_v35, %v2571_v34  ;;  %v2555_v38 = vld [vmem:[%s11997_s13 + $0x70] sm:$0xff]  ;;  %v2556_v39 = vld [vmem:[%s11997_s13 + $0x78] sm:$0xff]  ;;  %v8308_v40 = vpack.c.bf16 %v2604_v37, %v2603_v8 }
 0xe81   :  { %v8278_v41 = vpack.c.bf16 %v2556_v39, %v2555_v38  ;;  %v2640_v39 = vld [vmem:[%s11997_s13 + $0x318] sm:$0xff] }
 0xe83   :  { %8259 = vmatpush3.bf16.msra.mxu1 %v8258_v45  ;;  %8291 = vmatpush3.bf16.msra.mxu0 %v8290_v46  ;;  %v2622_v45 = vld [vmem:[%s11997_s13 + $0x288] sm:$0xff]  ;;  %v2653_v46 = vld [vmem:[%s11997_s13 + $0x380] sm:$0xff] }
 0xe84   :  { %8261 = vmatprep.subr.bf16.mxu1 %v8260_v48  ;;  %8293 = vmatprep.subr.bf16.mxu0 %v8292_v50  ;;  %v8312_v21 = vpack.c.bf16 %v2622_v45, %v2621_v31  ;;  %v8344_v48 = vpack.c.bf16 %v2654_v47, %v2653_v46  ;;  %v1807_v50 = vlaneseq  ;;  %v2657_v31 = vld [vmem:[%s11997_s13 + $0x3a0] sm:$0xff]  ;;  %v2658_v45 = vld [vmem:[%s11997_s13 + $0x3a8] sm:$0xff] }
 0xe85   :  { %v2609_v46 = vld [vmem:[%s11997_s13 + $0x220] sm:$0xff]  ;;  %v8352_v11 = vpack.c.bf16 %v2658_v45, %v2657_v31 }
 0xe86   :  { %v9823_v52 = vshrl.u32 %v1807_v50, 7 }
 0xe87   :  { %8263 = vmatpush3.bf16.msra.mxu1 %v8262_v6  ;;  %8295 = vmatpush3.bf16.msra.mxu0 %v8294_v61 }
 0xe88   :  { %8265 = vmatprep.subr.bf16.mxu1 %v8264_v1  ;;  %8297 = vmatprep.subr.bf16.mxu0 %v8296_v2  ;;  %v9826_v53 = vsub.s32 0, %v9823_v52  ;;  %v9829_v55 = vsub.s32 2, %v9823_v52  ;;  %v9837_v58 = vsub.s32 1, %v9823_v52  ;;  %v9840_v5 = vsub.s32 3, %v9823_v52  ;;  %v2605_v1 = vld [vmem:[%s11997_s13 + $0x200] sm:$0xff]  ;;  %v2606_v2 = vld [vmem:[%s11997_s13 + $0x208] sm:$0xff] }
 0xe89   :  { %v9857_v3 = vsub.s32 5, %v9823_v52  ;;  %v9878_v19 = vsub.s32 7, %v9823_v52  ;;  %v8314_v20 = vpack.c.bf16 %v2606_v2, %v2605_v1 }
 0xe8a   :  { %v1810_v6 = vrot.slane %v9834_v57, %v9826_v53  ;;  %v1818_v61 = vrot.slane %v9834_v57, %v9829_v55  ;;  %v1814_v62 = vrot.slane %v9834_v57, %v9837_v58  ;;  %v1822_v0 = vrot.slane %v9834_v57, %v9840_v5 }
 0xe8b   :  { %8267 = vmatpush3.bf16.msra.mxu1 %v8266_v54  ;;  %8299 = vmatpush3.bf16.msra.mxu0 %v8298_v14  ;;  %v9901_v43 = vrot.slane %v9834_v57, %v9878_v19 }
 0xe8c   :  { %8269 = vmatprep.subr.bf16.mxu1 %v8268_v12  ;;  %8301 = vmatprep.subr.bf16.mxu0 %v8300_v15  ;;  %v2624_v12 = vld [vmem:[%s11997_s13 + $0x298] sm:$0xff]  ;;  %v2655_v15 = vld [vmem:[%s11997_s13 + $0x390] sm:$0xff] }
 0xe8d   :  { %v8316_v28 = vpack.c.bf16 %v2624_v12, %v2623_v13  ;;  %v8348_v29 = vpack.c.bf16 %v2656_v16, %v2655_v15  ;;  %v2642_v13 = vld [vmem:[%s11997_s13 + $0x328] sm:$0xff]  ;;  %v2659_v12 = vld [vmem:[%s11997_s13 + $0x3b0] sm:$0xff]  ;;  %v2660_v15 = vld [vmem:[%s11997_s13 + $0x3b8] sm:$0xff] }
 0xe8f   :  { %8271 = vmatpush3.bf16.msra.mxu1 %v8270_v22  ;;  %8303 = vmatpush3.bf16.msra.mxu0 %v8302_v23  ;;  %v9882_v22 = vrot.slane %v9834_v57, %v9857_v3  ;;  %v2607_v23 = vld [vmem:[%s11997_s13 + $0x210] sm:$0xff] }
 0xe90   :  { %8273 = vmatprep.subr.bf16.mxu1 %v8272_v25  ;;  %8305 = vmatprep.subr.bf16.mxu0 %v8304_v26 }
 0xe93   :  { %8275 = vmatpush3.bf16.msra.mxu1 %v8274_v30  ;;  %8307 = vmatpush3.bf16.msra.mxu0 %v8306_v32  ;;  %v2608_v30 = vld [vmem:[%s11997_s13 + $0x218] sm:$0xff]  ;;  %v2639_v32 = vld [vmem:[%s11997_s13 + $0x310] sm:$0xff] }
 0xe94   :  { %8277 = vmatprep.subr.bf16.mxu1 %v8276_v36  ;;  %8309 = vmatprep.subr.bf16.mxu0 %v8308_v40  ;;  %v2625_v40 = vld [vmem:[%s11997_s13 + $0x2a0] sm:$0xff] }
 0xe97   :  { %8279 = vmatpush3.bf16.msra.mxu1 %v8278_v41  ;;  %8311 = vmatpush3.bf16.msra.mxu0 %v8310_v44  ;;  %v2626_v44 = vld [vmem:[%s11997_s13 + $0x2a8] sm:$0xff] }
 0xe98   :  { %8313 = vmatprep.subr.bf16.mxu1 %v8312_v21  ;;  %8345 = vmatprep.subr.bf16.mxu0 %v8344_v48  ;;  %v8320_v9 = vpack.c.bf16 %v2626_v44, %v2625_v40 }
 0xf34   :  { %v1959_v4 = vpop.f32.mrb[18].mxu1  ;;  %v2036_v7 = vpop.f32.mrb[18].mxu0 }
 0xf35   :  { %v1960_v54 = vadd.f32 %v1959_v4, %v1810_v6  ;;  %v2037_v14 = vadd.f32 %v2036_v7, %v1818_v61  ;;  %v1961_v10 = vpop.f32.mrb[19].mxu1  ;;  %v2038_v60 = vpop.f32.mrb[19].mxu0 }
 0xf36   :  { %v1962_v17 = vadd.f32 %v1961_v10, %v1814_v62  ;;  %v2039_v18 = vadd.f32 %v2038_v60, %v1822_v0  ;;  %v2628_v60 = vld [vmem:[%s11997_s13 + $0x2b8] sm:$0xff] }
 0xf37   :  { %v2509_v34 = vmax.f32 %v1960_v54, 0.0  ;;  %v2511_v35 = vmax.f32 %v2037_v14, 0.0  ;;  %v2627_v54 = vld [vmem:[%s11997_s13 + $0x2b0] sm:$0xff] }
 0xf38   :  { %v2510_v24 = vmax.f32 %v1962_v17, 0.0  ;;  %v2512_v25 = vmax.f32 %v2039_v18, 0.0  ;;  %v1965_v26 = vpop.f32.mrb[20].mxu1  ;;  %v2042_v27 = vpop.f32.mrb[20].mxu0 }
 0xf39   :  { %v1966_v8 = vadd.f32 %v1965_v26, %v1810_v6  ;;  %v2043_v36 = vadd.f32 %v2042_v27, %v1818_v61  ;;  %v1967_v37 = vpop.f32.mrb[21].mxu1  ;;  %v2044_v38 = vpop.f32.mrb[21].mxu0  ;;  %v8318_v6 = vpack.c.bf16 %v2608_v30, %v2607_v23  ;;  %v8350_v61 = vpack.c.bf16 %v2640_v39, %v2639_v32  ;;  %v2643_v30 = vld [vmem:[%s11997_s13 + $0x330] sm:$0xff]  ;;  %v2644_v32 = vld [vmem:[%s11997_s13 + $0x338] sm:$0xff] }
 0xf3a   :  { %v1968_v41 = vadd.f32 %v1967_v37, %v1814_v62  ;;  %v2045_v42 = vadd.f32 %v2044_v38, %v1822_v0  ;;  %2868 = vmatprep.mubr.f32.mxu1 %v2510_v24  ;;  %2943 = vmatprep.mubr.f32.mxu0 %v2512_v25  ;;  %v2610_v62 = vld [vmem:[%s11997_s13 + $0x228] sm:$0xff]  ;;  %v2641_v0 = vld [vmem:[%s11997_s13 + $0x320] sm:$0xff]  ;;  %v2611_v24 = vld [vmem:[%s11997_s13 + $0x230] sm:$0xff]  ;;  %v8358_v40 = vpack.c.bf16 %v2644_v32, %v2643_v30 }
 0xf3b   :  { %2869 = vmatmul.mubr.f32.vlgmr.msra.gmra.mrb[34].mxu1 %v2509_v34  ;;  %2944 = vmatmul.mubr.f32.vlgmr.msra.gmra.mrb[34].mxu0 %v2511_v35  ;;  %v2525_v1 = vmax.f32 %v1966_v8, 0.0  ;;  %v2527_v2 = vmax.f32 %v2043_v36, 0.0  ;;  %v8354_v23 = vpack.c.bf16 %v2642_v13, %v2641_v0  ;;  %v2612_v25 = vld [vmem:[%s11997_s13 + $0x238] sm:$0xff]  ;;  %v2629_v34 = vld [vmem:[%s11997_s13 + $0x2c0] sm:$0xff]  ;;  %v2630_v35 = vld [vmem:[%s11997_s13 + $0x2c8] sm:$0xff] }
 0xf3c   :  { %v2526_v21 = vmax.f32 %v1968_v41, 0.0  ;;  %v2528_v47 = vmax.f32 %v2045_v42, 0.0  ;;  %8315 = vmatpush3.bf16.msra.mxu1 %v8314_v20  ;;  %8347 = vmatpush3.bf16.msra.mxu0 %v8346_v56  ;;  %v9915_v48 = vpop.f32.mrb[22].mxu1  ;;  %v9917_v50 = vpop.f32.mrb[22].mxu0  ;;  %v8322_v56 = vpack.c.bf16 %v2610_v62, %v2609_v46  ;;  %v2661_v8 = vld [vmem:[%s11997_s13 + $0x3c0] sm:$0xff]  ;;  %v2662_v36 = vld [vmem:[%s11997_s13 + $0x3c8] sm:$0xff]  ;;  %v8326_v39 = vpack.c.bf16 %v2612_v25, %v2611_v24 }
 0xf3d   :  { %v2115_v4 = vpop.f32.mrb[23].mxu1  ;;  %v2192_v7 = vpop.f32.mrb[23].mxu0  ;;  %8317 = vmatprep.subr.bf16.mxu1 %v8316_v28  ;;  %8349 = vmatprep.subr.bf16.mxu0 %v8348_v29  ;;  %v8324_v28 = vpack.c.bf16 %v2628_v60, %v2627_v54  ;;  %v8356_v29 = vpack.c.bf16 %v2660_v15, %v2659_v12  ;;  %v2613_v41 = vld [vmem:[%s11997_s13 + $0x240] sm:$0xff]  ;;  %v2614_v42 = vld [vmem:[%s11997_s13 + $0x248] sm:$0xff]  ;;  %v8328_v45 = vpack.c.bf16 %v2630_v35, %v2629_v34  ;;  %v2663_v62 = vld [vmem:[%s11997_s13 + $0x3d0] sm:$0xff]  ;;  %v10052_v34 = vsub.s32 6, %v9823_v52 }
 0xf3e   :  { %v2116_v14 = vadd.f32 %v2115_v4, %v9882_v22  ;;  %v2193_v10 = vadd.f32 %v2192_v7, %v9901_v43  ;;  %2873 = vmatprep.mubr.f32.mxu1 %v2526_v21  ;;  %2948 = vmatprep.mubr.f32.mxu0 %v2528_v47  ;;  %v8360_v46 = vpack.c.bf16 %v2662_v36, %v2661_v8  ;;  %v2645_v21 = vld [vmem:[%s11997_s13 + $0x340] sm:$0xff]  ;;  %v2646_v47 = vld [vmem:[%s11997_s13 + $0x348] sm:$0xff]  ;;  %v2664_v0 = vld [vmem:[%s11997_s13 + $0x3d8] sm:$0xff] }
 0xf3f   :  { %2874 = vmatmul.mubr.f32.gmra.mrb[36].mxu1 %v2525_v1  ;;  %2949 = vmatmul.mubr.f32.gmra.mrb[36].mxu0 %v2527_v2  ;;  %v8330_v4 = vpack.c.bf16 %v2614_v42, %v2613_v41  ;;  %v8362_v7 = vpack.c.bf16 %v2646_v47, %v2645_v21  ;;  %v2647_v60 = vld [vmem:[%s11997_s13 + $0x350] sm:$0xff]  ;;  %v2648_v12 = vld [vmem:[%s11997_s13 + $0x358] sm:$0xff]  ;;  %v2633_v15 = vld [vmem:[%s11997_s13 + $0x2e0] sm:$0xff] }
 0xf40   :  { %v2514_v16 = vmax.f32 %v2116_v14, 0.0  ;;  %v2516_v17 = vmax.f32 %v2193_v10, 0.0  ;;  %8319 = vmatpush3.bf16.msra.mxu1 %v8318_v6  ;;  %8351 = vmatpush3.bf16.msra.mxu0 %v8350_v61  ;;  %v9942_v18 = vpop.f32.mrb[24].mxu1  ;;  %v9944_v20 = vpop.f32.mrb[24].mxu0  ;;  %v2631_v6 = vld [vmem:[%s11997_s13 + $0x2d0] sm:$0xff]  ;;  %v2632_v61 = vld [vmem:[%s11997_s13 + $0x2d8] sm:$0xff]  ;;  %v8364_v10 = vpack.c.bf16 %v2664_v0, %v2663_v62 }
 0xf41   :  { %v9952_v26 = vpop.f32.mrb[25].mxu1  ;;  %v9954_v27 = vpop.f32.mrb[25].mxu0  ;;  %8321 = vmatprep.subr.bf16.mxu1 %v8320_v9  ;;  %8353 = vmatprep.subr.bf16.mxu0 %v8352_v11  ;;  %v2615_v9 = vld [vmem:[%s11997_s13 + $0x250] sm:$0xff]  ;;  %v2616_v11 = vld [vmem:[%s11997_s13 + $0x258] sm:$0xff]  ;;  %v8332_v14 = vpack.c.bf16 %v2632_v61, %v2631_v6  ;;  %v2617_v30 = vld [vmem:[%s11997_s13 + $0x260] sm:$0xff] }
 0xf42   :  { %3018 = vmatprep.mubr.f32.mxu1 %v2514_v16  ;;  %3093 = vmatprep.mubr.f32.mxu0 %v2516_v17  ;;  %v2634_v16 = vld [vmem:[%s11997_s13 + $0x2e8] sm:$0xff]  ;;  %v2665_v17 = vld [vmem:[%s11997_s13 + $0x3e0] sm:$0xff]  ;;  %v2636_v42 = vld [vmem:[%s11997_s13 + $0x2f8] sm:$0xff] }
 0xf43   :  { %v2618_v32 = vld [vmem:[%s11997_s13 + $0x268] sm:$0xff]  ;;  %v8336_v36 = vpack.c.bf16 %v2634_v16, %v2633_v15  ;;  %v2619_v0 = vld [vmem:[%s11997_s13 + $0x270] sm:$0xff]  ;;  %v2685_v15 = vld [vmem:[%s11997_s13 + $0x480] sm:$0xff] }
 0xf44   :  { %8323 = vmatpush3.bf16.msra.mxu1 %v8322_v56  ;;  %8355 = vmatpush3.bf16.msra.mxu0 %v8354_v23  ;;  %v9974_v37 = vpop.f32.mrb[26].mxu1  ;;  %v9976_v38 = vpop.f32.mrb[26].mxu0  ;;  %v2666_v56 = vld [vmem:[%s11997_s13 + $0x3e8] sm:$0xff]  ;;  %v10039_v23 = vsub.s32 4, %v9823_v52  ;;  %v2635_v52 = vld [vmem:[%s11997_s13 + $0x2f0] sm:$0xff]  ;;  %v8338_v61 = vpack.c.bf16 %v2618_v32, %v2617_v30  ;;  %v2717_v16 = vld [vmem:[%s11997_s13 + $0x580] sm:$0xff] }
 0xf45   :  { %v9984_v44 = vpop.f32.mrb[27].mxu1  ;;  %v9986_v31 = vpop.f32.mrb[27].mxu0  ;;  %8325 = vmatprep.subr.bf16.mxu1 %v8324_v28  ;;  %8357 = vmatprep.subr.bf16.mxu0 %v8356_v29  ;;  %v8334_v28 = vpack.c.bf16 %v2616_v11, %v2615_v9  ;;  %v8366_v29 = vpack.c.bf16 %v2648_v12, %v2647_v60  ;;  %v2650_v41 = vld [vmem:[%s11997_s13 + $0x368] sm:$0xff]  ;;  %v1834_v9 = vrot.slane %v9834_v57, %v10052_v34  ;;  %v2652_v12 = vld [vmem:[%s11997_s13 + $0x378] sm:$0xff] }
 0xf46   :  { %v1826_v21 = vrot.slane %v9834_v57, %v10039_v23  ;;  %v2686_v57 = vld [vmem:[%s11997_s13 + $0x488] sm:$0xff] }
 0xf48   :  { %8327 = vmatpush3.bf16.msra.mxu1 %v8326_v39  ;;  %8359 = vmatpush3.bf16.msra.mxu0 %v8358_v40  ;;  %v10006_v1 = vpop.f32.mrb[28].mxu1  ;;  %v10008_v2 = vpop.f32.mrb[28].mxu0  ;;  %v8368_v39 = vpack.c.bf16 %v2666_v56, %v2665_v17  ;;  %v2649_v40 = vld [vmem:[%s11997_s13 + $0x360] sm:$0xff]  ;;  %v2718_v17 = vld [vmem:[%s11997_s13 + $0x588] sm:$0xff] }
 0xf49   :  { %v10016_v13 = vpop.f32.mrb[29].mxu1  ;;  %v10018_v54 = vpop.f32.mrb[29].mxu0  ;;  %8329 = vmatprep.subr.bf16.mxu1 %v8328_v45  ;;  %8361 = vmatprep.subr.bf16.mxu0 %v8360_v46  ;;  %v2667_v45 = vld [vmem:[%s11997_s13 + $0x3f0] sm:$0xff]  ;;  %v2668_v46 = vld [vmem:[%s11997_s13 + $0x3f8] sm:$0xff]  ;;  %v8370_v62 = vpack.c.bf16 %v2650_v41, %v2649_v40  ;;  %v10115_v56 = vld [vmem:[%s12029_s21 + $0x8] sm:$0xff] }
 0xf4a   :  { %v8372_v60 = vpack.c.bf16 %v2668_v46, %v2667_v45  ;;  %v2702_v40 = vld [vmem:[%s11997_s13 + $0x508] sm:$0xff]  ;;  %v2687_v41 = vld [vmem:[%s11997_s13 + $0x490] sm:$0xff]  ;;  %v8408_v45 = vpack.c.bf16 %v2718_v17, %v2717_v16  ;;  %v2688_v46 = vld [vmem:[%s11997_s13 + $0x498] sm:$0xff] }
 0xf4c   :  { %8331 = vmatpush3.bf16.msra.mxu1 %v8330_v4  ;;  %8363 = vmatpush3.bf16.msra.mxu0 %v8362_v7  ;;  %v10041_v24 = vpop.f32.mrb[30].mxu1  ;;  %v10043_v25 = vpop.f32.mrb[30].mxu0  ;;  %v2620_v4 = vld [vmem:[%s11997_s13 + $0x278] sm:$0xff]  ;;  %v2651_v7 = vld [vmem:[%s11997_s13 + $0x370] sm:$0xff] }
 0xf4d   :  { %v10054_v35 = vpop.f32.mrb[31].mxu1  ;;  %v10056_v8 = vpop.f32.mrb[31].mxu0  ;;  %8333 = vmatprep.subr.bf16.mxu1 %v8332_v14  ;;  %8365 = vmatprep.subr.bf16.mxu0 %v8364_v10  ;;  %v8340_v10 = vpack.c.bf16 %v2636_v42, %v2635_v52  ;;  %v8342_v30 = vpack.c.bf16 %v2620_v4, %v2619_v0  ;;  %v8374_v32 = vpack.c.bf16 %v2652_v12, %v2651_v7 }
 0xf4e   :  { %v2114_v52 = vadd.f32 %v9915_v48, %v1826_v21  ;;  %v2191_v42 = vadd.f32 %v9917_v50, %v1834_v9  ;;  %v2122_v48 = vadd.f32 %v9952_v26, %v9882_v22  ;;  %v2199_v50 = vadd.f32 %v9954_v27, %v9901_v43  ;;  %v2671_v26 = vld [vmem:[%s11997_s13 + $0x410] sm:$0xff]  ;;  %v2672_v27 = vld [vmem:[%s11997_s13 + $0x418] sm:$0xff] }
 0xf4f   :  { %v10149_v0 = vrot.slane %v10115_v56, %v9837_v58  ;;  %v10153_v4 = vrot.slane %v10115_v56, %v9840_v5  ;;  %v2120_v22 = vadd.f32 %v9942_v18, %v1826_v21  ;;  %v2197_v43 = vadd.f32 %v9944_v20, %v1834_v9  ;;  %v2703_v20 = vld [vmem:[%s11997_s13 + $0x510] sm:$0xff]  ;;  %v2704_v21 = vld [vmem:[%s11997_s13 + $0x518] sm:$0xff]  ;;  %v2689_v9 = vld [vmem:[%s11997_s13 + $0x4a0] sm:$0xff] }
 0xf50   :  { %8335 = vmatpush3.bf16.msra.mxu1 %v8334_v28  ;;  %8367 = vmatpush3.bf16.msra.mxu0 %v8366_v29  ;;  %v10078_v47 = vpop.f32.mrb[32].mxu1  ;;  %v10080_v6 = vpop.f32.mrb[32].mxu0  ;;  %v2669_v28 = vld [vmem:[%s11997_s13 + $0x400] sm:$0xff]  ;;  %v2670_v29 = vld [vmem:[%s11997_s13 + $0x408] sm:$0xff]  ;;  %v2530_v16 = vmax.f32 %v2122_v48, 0.0  ;;  %v2532_v17 = vmax.f32 %v2199_v50, 0.0 }
 0xf51   :  { %v10093_v11 = vpop.f32.mrb[33].mxu1  ;;  %v10095_v14 = vpop.f32.mrb[33].mxu0  ;;  %8337 = vmatprep.subr.bf16.mxu1 %v8336_v36  ;;  %8369 = vmatprep.subr.bf16.mxu0 %v8368_v39  ;;  %v8376_v36 = vpack.c.bf16 %v2686_v57, %v2685_v15  ;;  %v2701_v39 = vld [vmem:[%s11997_s13 + $0x500] sm:$0xff]  ;;  %v8378_v7 = vpack.c.bf16 %v2670_v29, %v2669_v28  ;;  %v2513_v15 = vmax.f32 %v2114_v52, 0.0  ;;  %v2515_v57 = vmax.f32 %v2191_v42, 0.0  ;;  %v2722_v29 = vld [vmem:[%s11997_s13 + $0x5a8] sm:$0xff] }
 0xf52   :  { %v2270_v28 = vadd.f32 %v9984_v44, %v10149_v0  ;;  %v2347_v18 = vadd.f32 %v9986_v31, %v10153_v4  ;;  %v2690_v44 = vld [vmem:[%s11997_s13 + $0x4a8] sm:$0xff]  ;;  %v2721_v31 = vld [vmem:[%s11997_s13 + $0x5a0] sm:$0xff]  ;;  %v2691_v48 = vld [vmem:[%s11997_s13 + $0x4b0] sm:$0xff] }
 0xf53   :  { %v2692_v50 = vld [vmem:[%s11997_s13 + $0x4b8] sm:$0xff] }
 0xf54   :  { %8339 = vmatpush3.bf16.msra.mxu1 %v8338_v61  ;;  %8371 = vmatpush3.bf16.msra.mxu0 %v8370_v62  ;;  %v2719_v61 = vld [vmem:[%s11997_s13 + $0x590] sm:$0xff]  ;;  %v2720_v62 = vld [vmem:[%s11997_s13 + $0x598] sm:$0xff]  ;;  %v2518_v52 = vmax.f32 %v2270_v28, 0.0  ;;  %v2520_v42 = vmax.f32 %v2347_v18, 0.0  ;;  %v2725_v28 = vld [vmem:[%s11997_s13 + $0x5c0] sm:$0xff] }
 0xf55   :  { %8341 = vmatprep.subr.bf16.mxu1 %v8340_v10  ;;  %8373 = vmatprep.subr.bf16.mxu0 %v8372_v60  ;;  %v8410_v10 = vpack.c.bf16 %v2702_v40, %v2701_v39  ;;  %v8380_v60 = vpack.c.bf16 %v2688_v46, %v2687_v41  ;;  %v8412_v12 = vpack.c.bf16 %v2720_v62, %v2719_v61  ;;  %v2673_v40 = vld [vmem:[%s11997_s13 + $0x420] sm:$0xff]  ;;  %v2674_v41 = vld [vmem:[%s11997_s13 + $0x428] sm:$0xff] }
 0xf56   :  { %v8414_v39 = vpack.c.bf16 %v2704_v21, %v2703_v20  ;;  %v8416_v46 = vpack.c.bf16 %v2722_v29, %v2721_v31  ;;  %v2705_v61 = vld [vmem:[%s11997_s13 + $0x520] sm:$0xff]  ;;  %v2706_v62 = vld [vmem:[%s11997_s13 + $0x528] sm:$0xff] }
 0xf57   :  { %v2726_v18 = vld [vmem:[%s11997_s13 + $0x5c8] sm:$0xff] }
 0xf58   :  { %8343 = vmatpush3.bf16.msra.mxu1 %v8342_v30  ;;  %8375 = vmatpush3.bf16.msra.mxu0 %v8374_v32  ;;  %v2529_v30 = vmax.f32 %v2120_v22, 0.0  ;;  %v2531_v32 = vmax.f32 %v2197_v43, 0.0  ;;  %v8388_v22 = vpack.c.bf16 %v2692_v50, %v2691_v48  ;;  %v8424_v29 = vpack.c.bf16 %v2726_v18, %v2725_v28  ;;  %v2711_v48 = vld [vmem:[%s11997_s13 + $0x550] sm:$0xff]  ;;  %v2712_v50 = vld [vmem:[%s11997_s13 + $0x558] sm:$0xff] }
 0xf59   :  { %8377 = vmatprep.subr.bf16.mxu1 %v8376_v36  ;;  %8409 = vmatprep.subr.bf16.mxu0 %v8408_v45  ;;  %v8382_v36 = vpack.c.bf16 %v2672_v27, %v2671_v26  ;;  %v8384_v45 = vpack.c.bf16 %v2690_v44, %v2689_v9  ;;  %v2707_v26 = vld [vmem:[%s11997_s13 + $0x530] sm:$0xff]  ;;  %v2708_v27 = vld [vmem:[%s11997_s13 + $0x538] sm:$0xff]  ;;  %v2677_v9 = vld [vmem:[%s11997_s13 + $0x440] sm:$0xff] }
 0xf5a   :  { %v8422_v21 = vpack.c.bf16 %v2708_v27, %v2707_v26  ;;  %v2678_v44 = vld [vmem:[%s11997_s13 + $0x448] sm:$0xff]  ;;  %v2699_v28 = vld [vmem:[%s11997_s13 + $0x4f0] sm:$0xff]  ;;  %v2700_v18 = vld [vmem:[%s11997_s13 + $0x4f8] sm:$0xff] }
 0xf5b   :  { %3019 = vmatmul.mubr.f32.vlgmr.msra.gmra.mrb[38].mxu1 %v2513_v15  ;;  %3094 = vmatmul.mubr.f32.vlgmr.msra.gmra.mrb[38].mxu0 %v2515_v57  ;;  %v2675_v15 = vld [vmem:[%s11997_s13 + $0x430] sm:$0xff]  ;;  %v2676_v57 = vld [vmem:[%s11997_s13 + $0x438] sm:$0xff] }
 0xf5c   :  { %3023 = vmatprep.mubr.f32.mxu1 %v2530_v16  ;;  %3098 = vmatprep.mubr.f32.mxu0 %v2532_v17  ;;  %v2693_v16 = vld [vmem:[%s11997_s13 + $0x4c0] sm:$0xff]  ;;  %v2694_v17 = vld [vmem:[%s11997_s13 + $0x4c8] sm:$0xff]  ;;  %v8390_v20 = vpack.c.bf16 %v2676_v57, %v2675_v15  ;;  %v8430_v57 = vpack.c.bf16 %v2712_v50, %v2711_v48 }
 0xf5d   :  { %8379 = vmatpush3.bf16.msra.mxu1 %v8378_v7  ;;  %8411 = vmatpush3.bf16.msra.mxu0 %v8410_v10  ;;  %v2723_v7 = vld [vmem:[%s11997_s13 + $0x5b0] sm:$0xff]  ;;  %v2724_v10 = vld [vmem:[%s11997_s13 + $0x5b8] sm:$0xff]  ;;  %v8392_v31 = vpack.c.bf16 %v2694_v17, %v2693_v16  ;;  %v2713_v16 = vld [vmem:[%s11997_s13 + $0x560] sm:$0xff] }
 0xf5e   :  { %8381 = vmatprep.subr.bf16.mxu1 %v8380_v60  ;;  %8413 = vmatprep.subr.bf16.mxu0 %v8412_v12  ;;  %v8386_v60 = vpack.c.bf16 %v2674_v41, %v2673_v40  ;;  %v8418_v12 = vpack.c.bf16 %v2706_v62, %v2705_v61  ;;  %v8420_v43 = vpack.c.bf16 %v2724_v10, %v2723_v7  ;;  %v2727_v40 = vld [vmem:[%s11997_s13 + $0x5d0] sm:$0xff]  ;;  %v2728_v41 = vld [vmem:[%s11997_s13 + $0x5d8] sm:$0xff]  ;;  %v2697_v7 = vld [vmem:[%s11997_s13 + $0x4e0] sm:$0xff] }
 0xf5f   :  { %3024 = vmatmul.mubr.f32.gmra.mrb[40].mxu1 %v2529_v30  ;;  %3099 = vmatmul.mubr.f32.gmra.mrb[40].mxu0 %v2531_v32  ;;  %v2709_v30 = vld [vmem:[%s11997_s13 + $0x540] sm:$0xff]  ;;  %v2710_v32 = vld [vmem:[%s11997_s13 + $0x548] sm:$0xff]  ;;  %v8428_v62 = vpack.c.bf16 %v2728_v41, %v2727_v40  ;;  %v2716_v41 = vld [vmem:[%s11997_s13 + $0x578] sm:$0xff] }
 0xf60   :  { %3168 = vmatprep.mubr.f32.mxu1 %v2518_v52  ;;  %3243 = vmatprep.mubr.f32.mxu0 %v2520_v42  ;;  %v8394_v52 = vpack.c.bf16 %v2678_v44, %v2677_v9  ;;  %v8426_v42 = vpack.c.bf16 %v2710_v32, %v2709_v30  ;;  %v2698_v10 = vld [vmem:[%s11997_s13 + $0x4e8] sm:$0xff]  ;;  %v1842_v9 = vrot.slane %v10115_v56, %v9826_v53  ;;  %v2684_v30 = vld [vmem:[%s11997_s13 + $0x478] sm:$0xff]  ;;  %v2715_v32 = vld [vmem:[%s11997_s13 + $0x570] sm:$0xff] }
 0xf61   :  { %8383 = vmatpush3.bf16.msra.mxu1 %v8382_v36  ;;  %8415 = vmatpush3.bf16.msra.mxu0 %v8414_v39  ;;  %v2695_v36 = vld [vmem:[%s11997_s13 + $0x4d0] sm:$0xff]  ;;  %v2696_v39 = vld [vmem:[%s11997_s13 + $0x4d8] sm:$0xff]  ;;  %v8400_v26 = vpack.c.bf16 %v2698_v10, %v2697_v7  ;;  %v2714_v17 = vld [vmem:[%s11997_s13 + $0x568] sm:$0xff]  ;;  %v8438_v50 = vpack.c.bf16 %v2716_v41, %v2715_v32 }
 0xf62   :  { %8385 = vmatprep.subr.bf16.mxu1 %v8384_v45  ;;  %8417 = vmatprep.subr.bf16.mxu0 %v8416_v46  ;;  %v2679_v45 = vld [vmem:[%s11997_s13 + $0x450] sm:$0xff]  ;;  %v2680_v46 = vld [vmem:[%s11997_s13 + $0x458] sm:$0xff]  ;;  %v8396_v61 = vpack.c.bf16 %v2696_v39, %v2695_v36  ;;  %v1850_v36 = vrot.slane %v10115_v56, %v9829_v55  ;;  %v8404_v39 = vpack.c.bf16 %v2700_v18, %v2699_v28  ;;  %v2765_v10 = vld [vmem:[%s11997_s13 + $0x700] sm:$0xff] }
 0xf63   :  { %v8398_v15 = vpack.c.bf16 %v2680_v46, %v2679_v45  ;;  %v2781_v45 = vld [vmem:[%s11997_s13 + $0x780] sm:$0xff]  ;;  %v2782_v46 = vld [vmem:[%s11997_s13 + $0x788] sm:$0xff] }
 0xf65   :  { %8387 = vmatpush3.bf16.msra.mxu1 %v8386_v60  ;;  %8419 = vmatpush3.bf16.msra.mxu0 %v8418_v12  ;;  %v2729_v60 = vld [vmem:[%s11997_s13 + $0x5e0] sm:$0xff]  ;;  %v2730_v12 = vld [vmem:[%s11997_s13 + $0x5e8] sm:$0xff] }
 0xf66   :  { %8389 = vmatprep.subr.bf16.mxu1 %v8388_v22  ;;  %8421 = vmatprep.subr.bf16.mxu0 %v8420_v43  ;;  %v2681_v22 = vld [vmem:[%s11997_s13 + $0x460] sm:$0xff]  ;;  %v2682_v43 = vld [vmem:[%s11997_s13 + $0x468] sm:$0xff]  ;;  %v8432_v27 = vpack.c.bf16 %v2730_v12, %v2729_v60  ;;  %v2751_v12 = vld [vmem:[%s11997_s13 + $0x690] sm:$0xff] }
 0xf67   :  { %v8402_v44 = vpack.c.bf16 %v2682_v43, %v2681_v22  ;;  %v2766_v60 = vld [vmem:[%s11997_s13 + $0x708] sm:$0xff]  ;;  %v8472_v22 = vpack.c.bf16 %v2782_v46, %v2781_v45  ;;  %v2752_v43 = vld [vmem:[%s11997_s13 + $0x698] sm:$0xff]  ;;  %v2737_v45 = vld [vmem:[%s11997_s13 + $0x620] sm:$0xff] }
 0xf68   :  { %v8474_v18 = vpack.c.bf16 %v2766_v60, %v2765_v10  ;;  %v2738_v46 = vld [vmem:[%s11997_s13 + $0x628] sm:$0xff]  ;;  %v2755_v60 = vld [vmem:[%s11997_s13 + $0x6b0] sm:$0xff] }
 0xf69   :  { %8391 = vmatpush3.bf16.msra.mxu1 %v8390_v20  ;;  %8423 = vmatpush3.bf16.msra.mxu0 %v8422_v21  ;;  %v2731_v20 = vld [vmem:[%s11997_s13 + $0x5f0] sm:$0xff]  ;;  %v2732_v21 = vld [vmem:[%s11997_s13 + $0x5f8] sm:$0xff]  ;;  %v2770_v10 = vld [vmem:[%s11997_s13 + $0x728] sm:$0xff] }
 0xf6a   :  { %8393 = vmatprep.subr.bf16.mxu1 %v8392_v31  ;;  %8425 = vmatprep.subr.bf16.mxu0 %v8424_v29  ;;  %v8434_v31 = vpack.c.bf16 %v2714_v17, %v2713_v16  ;;  %v2683_v29 = vld [vmem:[%s11997_s13 + $0x470] sm:$0xff]  ;;  %v8436_v40 = vpack.c.bf16 %v2732_v21, %v2731_v20  ;;  %v10365_v16 = vrot.slane %v10115_v56, %v9857_v3 }
 0xf6b   :  { %v8406_v48 = vpack.c.bf16 %v2684_v30, %v2683_v29  ;;  %v10369_v17 = vrot.slane %v10115_v56, %v9878_v19  ;;  %v8444_v20 = vpack.c.bf16 %v2752_v43, %v2751_v12  ;;  %v2756_v12 = vld [vmem:[%s11997_s13 + $0x6b8] sm:$0xff] }
 0xf6c   :  { %v2424_v32 = vadd.f32 %v10054_v35, %v10365_v16  ;;  %v2754_v35 = vld [vmem:[%s11997_s13 + $0x6a8] sm:$0xff] }
 0xf6d   :  { %8395 = vmatpush3.bf16.msra.mxu1 %v8394_v52  ;;  %8427 = vmatpush3.bf16.msra.mxu0 %v8426_v42  ;;  %v2749_v52 = vld [vmem:[%s11997_s13 + $0x680] sm:$0xff]  ;;  %v2750_v42 = vld [vmem:[%s11997_s13 + $0x688] sm:$0xff] }
 0xf6e   :  { %8397 = vmatprep.subr.bf16.mxu1 %v8396_v61  ;;  %8429 = vmatprep.subr.bf16.mxu0 %v8428_v62  ;;  %v2733_v61 = vld [vmem:[%s11997_s13 + $0x600] sm:$0xff]  ;;  %v2734_v62 = vld [vmem:[%s11997_s13 + $0x608] sm:$0xff]  ;;  %v8440_v7 = vpack.c.bf16 %v2750_v42, %v2749_v52 }
 0xf6f   :  { %v8442_v28 = vpack.c.bf16 %v2734_v62, %v2733_v61  ;;  %v2522_v61 = vmax.f32 %v2424_v32, 0.0  ;;  %v2773_v32 = vld [vmem:[%s11997_s13 + $0x740] sm:$0xff] }
 0xf71   :  { %8399 = vmatpush3.bf16.msra.mxu1 %v8398_v15  ;;  %8431 = vmatpush3.bf16.msra.mxu0 %v8430_v57  ;;  %v2268_v15 = vadd.f32 %v9974_v37, %v1842_v9  ;;  %v2345_v57 = vadd.f32 %v9976_v38, %v1850_v36  ;;  %v2276_v37 = vadd.f32 %v10016_v13, %v10149_v0  ;;  %v2735_v0 = vld [vmem:[%s11997_s13 + $0x610] sm:$0xff] }
 0xf72   :  { %8401 = vmatprep.subr.bf16.mxu1 %v8400_v26  ;;  %8433 = vmatprep.subr.bf16.mxu0 %v8432_v27  ;;  %v2783_v26 = vld [vmem:[%s11997_s13 + $0x790] sm:$0xff]  ;;  %v2784_v27 = vld [vmem:[%s11997_s13 + $0x798] sm:$0xff]  ;;  %v2353_v38 = vadd.f32 %v10018_v54, %v10153_v4  ;;  %v2274_v13 = vadd.f32 %v10006_v1, %v1842_v9  ;;  %v2351_v54 = vadd.f32 %v10008_v2, %v1850_v36  ;;  %v2753_v36 = vld [vmem:[%s11997_s13 + $0x6a0] sm:$0xff] }
 0xf73   :  { %v8476_v21 = vpack.c.bf16 %v2784_v27, %v2783_v26  ;;  %v2736_v4 = vld [vmem:[%s11997_s13 + $0x618] sm:$0xff]  ;;  %v2534_v29 = vmax.f32 %v2276_v37, 0.0  ;;  %v2501_v1 = vadd.f32 %v10056_v8, %v10369_v17  ;;  %v2767_v2 = vld [vmem:[%s11997_s13 + $0x710] sm:$0xff]  ;;  %v2785_v8 = vld [vmem:[%s11997_s13 + $0x7a0] sm:$0xff]  ;;  %v8452_v37 = vpack.c.bf16 %v2756_v12, %v2755_v60 }
 0xf74   :  { %v2536_v30 = vmax.f32 %v2353_v38, 0.0  ;;  %v2768_v9 = vld [vmem:[%s11997_s13 + $0x718] sm:$0xff]  ;;  %v2535_v41 = vmax.f32 %v2351_v54, 0.0  ;;  %v8446_v52 = vpack.c.bf16 %v2736_v4, %v2735_v0  ;;  %v2739_v26 = vld [vmem:[%s11997_s13 + $0x630] sm:$0xff]  ;;  %v2741_v0 = vld [vmem:[%s11997_s13 + $0x640] sm:$0xff] }
 0xf75   :  { %8403 = vmatpush3.bf16.msra.mxu1 %v8402_v44  ;;  %8435 = vmatpush3.bf16.msra.mxu0 %v8434_v31  ;;  %v2517_v44 = vmax.f32 %v2268_v15, 0.0  ;;  %v2519_v31 = vmax.f32 %v2345_v57, 0.0  ;;  %v8478_v42 = vpack.c.bf16 %v2768_v9, %v2767_v2  ;;  %v2524_v62 = vmax.f32 %v2501_v1, 0.0  ;;  %v2787_v15 = vld [vmem:[%s11997_s13 + $0x7b0] sm:$0xff]  ;;  %v2788_v57 = vld [vmem:[%s11997_s13 + $0x7b8] sm:$0xff]  ;;  %v2742_v4 = vld [vmem:[%s11997_s13 + $0x648] sm:$0xff] }
 0xf76   :  { %8405 = vmatprep.subr.bf16.mxu1 %v8404_v39  ;;  %8437 = vmatprep.subr.bf16.mxu0 %v8436_v40  ;;  %v2786_v39 = vld [vmem:[%s11997_s13 + $0x7a8] sm:$0xff]  ;;  %v2533_v40 = vmax.f32 %v2274_v13, 0.0  ;;  %v2740_v27 = vld [vmem:[%s11997_s13 + $0x638] sm:$0xff]  ;;  %v8484_v38 = vpack.c.bf16 %v2788_v57, %v2787_v15  ;;  %v2759_v2 = vld [vmem:[%s11997_s13 + $0x6d0] sm:$0xff] }
 0xf77   :  { %v8454_v13 = vpack.c.bf16 %v2740_v27, %v2739_v26  ;;  %v2774_v1 = vld [vmem:[%s11997_s13 + $0x748] sm:$0xff]  ;;  %v2760_v9 = vld [vmem:[%s11997_s13 + $0x6d8] sm:$0xff]  ;;  %v2745_v60 = vld [vmem:[%s11997_s13 + $0x660] sm:$0xff] }
 0xf78   :  { %v2746_v12 = vld [vmem:[%s11997_s13 + $0x668] sm:$0xff]  ;;  %v2763_v26 = vld [vmem:[%s11997_s13 + $0x6f0] sm:$0xff]  ;;  %v2764_v27 = vld [vmem:[%s11997_s13 + $0x6f8] sm:$0xff] }
 0xf79   :  { %8407 = vmatpush3.bf16.msra.mxu1 %v8406_v48  ;;  %8439 = vmatpush3.bf16.msra.mxu0 %v8438_v50  ;;  %v8448_v48 = vpack.c.bf16 %v2754_v35, %v2753_v36  ;;  %v8480_v50 = vpack.c.bf16 %v2786_v39, %v2785_v8  ;;  %v2791_v36 = vld [vmem:[%s11997_s13 + $0x7d0] sm:$0xff]  ;;  %v2792_v35 = vld [vmem:[%s11997_s13 + $0x7d8] sm:$0xff]  ;;  %v8458_v8 = vpack.c.bf16 %v2742_v4, %v2741_v0 }
 0xf7a   :  { %8441 = vmatprep.subr.bf16.mxu1 %v8440_v7  ;;  %8473 = vmatprep.subr.bf16.mxu0 %v8472_v22  ;;  %v2769_v7 = vld [vmem:[%s11997_s13 + $0x720] sm:$0xff]  ;;  %v8450_v22 = vpack.c.bf16 %v2738_v46, %v2737_v45  ;;  %v8490_v39 = vpack.c.bf16 %v2774_v1, %v2773_v32  ;;  %v2775_v45 = vld [vmem:[%s11997_s13 + $0x750] sm:$0xff]  ;;  %v2776_v46 = vld [vmem:[%s11997_s13 + $0x758] sm:$0xff]  ;;  %v2430_v1 = vadd.f32 %v10093_v11, %v10365_v16 }
 0xf7b   :  { %v8482_v43 = vpack.c.bf16 %v2770_v10, %v2769_v7  ;;  %v8494_v10 = vpack.c.bf16 %v2776_v46, %v2775_v45  ;;  %v2779_v0 = vld [vmem:[%s11997_s13 + $0x770] sm:$0xff]  ;;  %v2780_v4 = vld [vmem:[%s11997_s13 + $0x778] sm:$0xff] }
 0xf7c   :  { %3169 = vmatmul.mubr.f32.vlgmr.msra.gmra.mrb[42].mxu1 %v2517_v44  ;;  %3244 = vmatmul.mubr.f32.vlgmr.msra.gmra.mrb[42].mxu0 %v2519_v31  ;;  %v2789_v44 = vld [vmem:[%s11997_s13 + $0x7c0] sm:$0xff]  ;;  %v2790_v31 = vld [vmem:[%s11997_s13 + $0x7c8] sm:$0xff] }
 0xf7d   :  { %3173 = vmatprep.mubr.f32.mxu1 %v2534_v29  ;;  %3248 = vmatprep.mubr.f32.mxu0 %v2536_v30  ;;  %v8488_v30 = vpack.c.bf16 %v2790_v31, %v2789_v44  ;;  %v1866_v44 = vrot.slane %v10115_v56, %v10052_v34  ;;  %v8468_v31 = vpack.c.bf16 %v2764_v27, %v2763_v26 }
 0xf7e   :  { %8443 = vmatpush3.bf16.msra.mxu1 %v8442_v28  ;;  %8475 = vmatpush3.bf16.msra.mxu0 %v8474_v18  ;;  %v2771_v28 = vld [vmem:[%s11997_s13 + $0x730] sm:$0xff]  ;;  %v2772_v18 = vld [vmem:[%s11997_s13 + $0x738] sm:$0xff] }
 0xf7f   :  { %8445 = vmatprep.subr.bf16.mxu1 %v8444_v20  ;;  %8477 = vmatprep.subr.bf16.mxu0 %v8476_v21  ;;  %v2757_v20 = vld [vmem:[%s11997_s13 + $0x6c0] sm:$0xff]  ;;  %v2758_v21 = vld [vmem:[%s11997_s13 + $0x6c8] sm:$0xff]  ;;  %v8486_v54 = vpack.c.bf16 %v2772_v18, %v2771_v28  ;;  %v1858_v28 = vrot.slane %v10115_v56, %v10039_v23  ;;  %v8466_v18 = vpack.c.bf16 %v2746_v12, %v2745_v60 }
 0xf80   :  { %3174 = vmatmul.mubr.f32.gmra.mrb[44].mxu1 %v2533_v40  ;;  %3249 = vmatmul.mubr.f32.gmra.mrb[44].mxu0 %v2535_v41  ;;  %v8456_v29 = vpack.c.bf16 %v2758_v21, %v2757_v20  ;;  %v2743_v40 = vld [vmem:[%s11997_s13 + $0x650] sm:$0xff]  ;;  %v2744_v41 = vld [vmem:[%s11997_s13 + $0x658] sm:$0xff]  ;;  %v8502_v56 = vpack.c.bf16 %v2780_v4, %v2779_v0  ;;  %v2499_v32 = vadd.f32 %v10043_v25, %v1866_v44 }
 0xf81   :  { %3318 = vmatprep.mubr.f32.mxu1 %v2522_v61  ;;  %3393 = vmatprep.mubr.f32.mxu0 %v2524_v62  ;;  %v2761_v61 = vld [vmem:[%s11997_s13 + $0x6e0] sm:$0xff]  ;;  %v2762_v62 = vld [vmem:[%s11997_s13 + $0x6e8] sm:$0xff]  ;;  %v8462_v7 = vpack.c.bf16 %v2744_v41, %v2743_v40  ;;  %v2747_v21 = vld [vmem:[%s11997_s13 + $0x670] sm:$0xff] }
 0xf82   :  { %8447 = vmatpush3.bf16.msra.mxu1 %v8446_v52  ;;  %8479 = vmatpush3.bf16.msra.mxu0 %v8478_v42  ;;  %v8460_v52 = vpack.c.bf16 %v2760_v9, %v2759_v2  ;;  %v8492_v42 = vpack.c.bf16 %v2792_v35, %v2791_v36  ;;  %v8464_v15 = vpack.c.bf16 %v2762_v62, %v2761_v61  ;;  %v2523_v36 = vmax.f32 %v2499_v32, 0.0 }
 0xf83   :  { %8449 = vmatprep.subr.bf16.mxu1 %v8448_v48  ;;  %8481 = vmatprep.subr.bf16.mxu0 %v8480_v50  ;;  %v2793_v48 = vld [vmem:[%s11997_s13 + $0x7e0] sm:$0xff]  ;;  %v2794_v50 = vld [vmem:[%s11997_s13 + $0x7e8] sm:$0xff]  ;;  %v2507_v2 = vadd.f32 %v10095_v14, %v10369_v17  ;;  %v2428_v35 = vadd.f32 %v10078_v47, %v1858_v28 }
 0xf84   :  { %v8496_v57 = vpack.c.bf16 %v2794_v50, %v2793_v48  ;;  %v6877_v47 = vld [vmem:[%s11998_s14] ss:$0 sm:$0xff] }
 0xf85   :  { %v2540_v25 = vmax.f32 %v2507_v2, 0.0  ;;  %v2537_v11 = vmax.f32 %v2428_v35, 0.0 }
 0xf86   :  { %8451 = vmatpush3.bf16.msra.mxu1 %v8450_v22  ;;  %8483 = vmatpush3.bf16.msra.mxu0 %v8482_v43  ;;  %v2777_v22 = vld [vmem:[%s11997_s13 + $0x760] sm:$0xff]  ;;  %v2778_v43 = vld [vmem:[%s11997_s13 + $0x768] sm:$0xff] }
 0xf87   :  { %8453 = vmatprep.subr.bf16.mxu1 %v8452_v37  ;;  %8485 = vmatprep.subr.bf16.mxu0 %v8484_v38  ;;  %v2795_v37 = vld [vmem:[%s11997_s13 + $0x7f0] sm:$0xff]  ;;  %v2796_v38 = vld [vmem:[%s11997_s13 + $0x7f8] sm:$0xff]  ;;  %v8498_v20 = vpack.c.bf16 %v2778_v43, %v2777_v22 }
 0xf8a   :  { %8455 = vmatpush3.bf16.msra.mxu1 %v8454_v13  ;;  %8487 = vmatpush3.bf16.msra.mxu0 %v8486_v54  ;;  %v8500_v13 = vpack.c.bf16 %v2796_v38, %v2795_v37  ;;  %v2748_v54 = vld [vmem:[%s11997_s13 + $0x678] sm:$0xff] }
 0xf8b   :  { %8457 = vmatprep.subr.bf16.mxu1 %v8456_v29  ;;  %8489 = vmatprep.subr.bf16.mxu0 %v8488_v30  ;;  %v8470_v29 = vpack.c.bf16 %v2748_v54, %v2747_v21  ;;  %v2422_v30 = vadd.f32 %v10041_v24, %v1858_v28  ;;  %v2538_v24 = vmax.f32 %v2430_v1, 0.0 }
 0xf8d   :  { %v2521_v9 = vmax.f32 %v2422_v30, 0.0 }
 0xf8e   :  { %8459 = vmatpush3.bf16.msra.mxu1 %v8458_v8  ;;  %8491 = vmatpush3.bf16.msra.mxu0 %v8490_v39  ;;  %v2505_v8 = vadd.f32 %v10080_v6, %v1866_v44 }
 0xf8f   :  { %8461 = vmatprep.subr.bf16.mxu1 %v8460_v52  ;;  %8493 = vmatprep.subr.bf16.mxu0 %v8492_v42 }
 0xf90   :  { %v2539_v16 = vmax.f32 %v2505_v8, 0.0 }
 0xf92   :  { %8463 = vmatpush3.bf16.msra.mxu1 %v8462_v7  ;;  %8495 = vmatpush3.bf16.msra.mxu0 %v8494_v10 }
 0xf93   :  { %8465 = vmatprep.subr.bf16.mxu1 %v8464_v15  ;;  %8497 = vmatprep.subr.bf16.mxu0 %v8496_v57 }
 0xf96   :  { %8467 = vmatpush3.bf16.msra.mxu1 %v8466_v18  ;;  %8499 = vmatpush3.bf16.msra.mxu0 %v8498_v20 }
 0xf97   :  { %8469 = vmatprep.subr.bf16.mxu1 %v8468_v31  ;;  %8501 = vmatprep.subr.bf16.mxu0 %v8500_v13 }
 0xf9a   :  { %8471 = vmatpush3.bf16.msra.mxu1 %v8470_v29  ;;  %8503 = vmatpush3.bf16.msra.mxu0 %v8502_v56 }
 0xf9b   :  { %8082 = vmatprep.subr.mxu0 %v8986_v51 }
 0xf9d   :  { %3319 = vmatmul.mubr.f32.vlgmr.msra.gmra.mrb[46].mxu1 %v2521_v9  ;;  %3394 = vmatmul.mubr.f32.vlgmr.msra.gmra.mrb[46].mxu0 %v2523_v36 }
 0xf9e   :  { %3323 = vmatprep.mubr.f32.mxu1 %v2538_v24  ;;  %3398 = vmatprep.mubr.f32.mxu0 %v2540_v25 }
 0xfa1   :  { %3324 = vmatmul.mubr.f32.gmra.mrb[48].mxu1 %v2537_v11  ;;  %3399 = vmatmul.mubr.f32.gmra.mrb[48].mxu0 %v2539_v16 }
 0xfa2   :  { %8084 = vmatprep.mubr.msk.f32.mxu0 %vm8987_vm5, %v8986_v51 }
0x100e   :  { %v7344_v14 = vpop.f32.mrb[34].mxu1  ;;  %v7382_v17 = vpop.f32.mrb[34].mxu0 }
0x100f   :  { %v7345_v6 = vpop.f32.mrb[35].mxu1  ;;  %v7383_v39 = vpop.f32.mrb[35].mxu0 }
0x1010   :  { %v7346_v40 = vadd.f32 %v7345_v6, %v7344_v14  ;;  %v7384_v41 = vadd.f32 %v7383_v39, %v7382_v17 }
0x1012   :  { %v2871_v52 = vadd.f32 %v7346_v40, %v6877_v47  ;;  %v7347_v42 = vpop.f32.mrb[36].mxu1  ;;  %v7385_v45 = vpop.f32.mrb[36].mxu0 }
0x1013   :  { %v7348_v46 = vpop.f32.mrb[37].mxu1  ;;  %v7386_v61 = vpop.f32.mrb[37].mxu0 }
0x1014   :  { %v2946_v62 = vadd.f32 %v7384_v41, %v2871_v52  ;;  %v7349_v48 = vadd.f32 %v7348_v46, %v7347_v42  ;;  %v7387_v50 = vadd.f32 %v7386_v61, %v7385_v45 }
0x1016   :  { %v2876_v7 = vadd.f32 %v7349_v48, %v6877_v47 }
0x1018   :  { %v2951_v10 = vadd.f32 %v7387_v50, %v2876_v7 }
0x102e   :  { %v7420_v60 = vpop.f32.mrb[38].mxu1  ;;  %v7458_v12 = vpop.f32.mrb[38].mxu0 }
0x102f   :  { %v7421_v15 = vpop.f32.mrb[39].mxu1  ;;  %v7459_v57 = vpop.f32.mrb[39].mxu0 }
0x1030   :  { %v7422_v22 = vadd.f32 %v7421_v15, %v7420_v60  ;;  %v7460_v43 = vadd.f32 %v7459_v57, %v7458_v12 }
0x1032   :  { %v3021_v26 = vadd.f32 %v7422_v22, %v2946_v62  ;;  %v7423_v27 = vpop.f32.mrb[40].mxu1  ;;  %v7461_v37 = vpop.f32.mrb[40].mxu0 }
0x1033   :  { %v7424_v38 = vpop.f32.mrb[41].mxu1  ;;  %v7462_v28 = vpop.f32.mrb[41].mxu0 }
0x1034   :  { %v3096_v18 = vadd.f32 %v7460_v43, %v3021_v26  ;;  %v7425_v20 = vadd.f32 %v7424_v38, %v7423_v27  ;;  %v7463_v21 = vadd.f32 %v7462_v28, %v7461_v37  ;;  %v6882_v38 = vld [vmem:[%s11989_s5 + $0x20] sm:$0xff]  ;;  %v6883_v28 = vld [vmem:[%s11989_s5 + $0x28] sm:$0xff] }
0x1036   :  { %v3026_v44 = vadd.f32 %v7425_v20, %v2951_v10  ;;  %v8504_v20 = vpack.c.bf16 %v6883_v28, %v6882_v38 }
0x1038   :  { %v3101_v31 = vadd.f32 %v7463_v21, %v3026_v44  ;;  %v6885_v21 = vld [vmem:[%s11989_s5 + $0x38] sm:$0xff]  ;;  %8505 = vmatprep.subr.bf16.mxu1 %v8504_v20 }
0x1039   :  { %8507 = vmatpush3.bf16.msra.mxu1 %v8504_v20 }
0x104f   :  { %v7496_v13 = vpop.f32.mrb[42].mxu1  ;;  %v7534_v54 = vpop.f32.mrb[42].mxu0 }
0x1050   :  { %v7497_v0 = vpop.f32.mrb[43].mxu1  ;;  %v7535_v4 = vpop.f32.mrb[43].mxu0 }
0x1051   :  { %v7498_v29 = vadd.f32 %v7497_v0, %v7496_v13  ;;  %v7536_v56 = vadd.f32 %v7535_v4, %v7534_v54 }
0x1053   :  { %v3171_v30 = vadd.f32 %v7498_v29, %v3096_v18  ;;  %v7499_v32 = vpop.f32.mrb[44].mxu1  ;;  %v7537_v1 = vpop.f32.mrb[44].mxu0  ;;  %v6884_v18 = vld [vmem:[%s11989_s5 + $0x30] sm:$0xff] }
0x1054   :  { %v7500_v2 = vpop.f32.mrb[45].mxu1  ;;  %v7538_v9 = vpop.f32.mrb[45].mxu0  ;;  %v8508_v44 = vpack.c.bf16 %v6885_v21, %v6884_v18 }
0x1055   :  { %v3246_v36 = vadd.f32 %v7536_v56, %v3171_v30  ;;  %v7501_v35 = vadd.f32 %v7500_v2, %v7499_v32  ;;  %v7539_v8 = vadd.f32 %v7538_v9, %v7537_v1 }
0x1056   :  { %8509 = vmatprep.subr.bf16.mxu1 %v8508_v44 }
0x1057   :  { %v3176_v24 = vadd.f32 %v7501_v35, %v3101_v31  ;;  %8511 = vmatpush3.bf16.msra.mxu1 %v8508_v44 }
0x1058   :  { %8077 = vmatprep.subr.mxu1 %v8986_v51 }
0x1059   :  { %v3251_v25 = vadd.f32 %v7539_v8, %v3176_v24 }
0x1070   :  { %v7572_v11 = vpop.f32.mrb[46].mxu1  ;;  %v7610_v16 = vpop.f32.mrb[46].mxu0 }
0x1071   :  { %v7573_v14 = vpop.f32.mrb[47].mxu1  ;;  %v7611_v17 = vpop.f32.mrb[47].mxu0 }
0x1072   :  { %v7574_v47 = vadd.f32 %v7573_v14, %v7572_v11  ;;  %v7612_v6 = vadd.f32 %v7611_v17, %v7610_v16  ;;  %v6881_v14 = vld [vmem:[%s11988_s4 + $0x1] ss:$0 sm:$0xff]  ;;  %s12030_s4 = smov 56  }
0x1074   :  { %v3321_v39 = vadd.f32 %v7574_v47, %v3246_v36  ;;  %v7575_v40 = vpop.f32.mrb[48].mxu1  ;;  %v7613_v41 = vpop.f32.mrb[48].mxu0 }
0x1075   :  { %v7576_v52 = vpop.f32.mrb[49].mxu1  ;;  %v7614_v42 = vpop.f32.mrb[49].mxu0 }
0x1076   :  { %v3396_v45 = vadd.f32 %v7612_v6, %v3321_v39  ;;  %v7577_v46 = vadd.f32 %v7576_v52, %v7575_v40  ;;  %v7615_v61 = vadd.f32 %v7614_v42, %v7613_v41  ;;  %v6887_v52 = vld [vmem:[%s11990_s6 + $0x1] ss:$0 sm:$0xff]  ;;  %s12031_s6 = smov 80  }
0x1078   :  { %v10552_v62 = vadd.f32 %v3396_v45, %v9351_v33  ;;  %v3326_v48 = vadd.f32 %v7577_v46, %v3251_v25  ;;  %v6880_v25 = vld [vmem:[%s11987_s3 + $0x1] ss:$0 sm:$0xff] }
0x107a   :  { %v3401_v50 = vadd.f32 %v7615_v61, %v3326_v48  ;;  %v3410_v7 = vsel %vm70_vm0, %v10552_v62, 0.0 }
0x107b   :  { %3411 = vadd.xlane.f32.xlu0 %v3410_v7 }
0x107c   :  { %v10557_v10 = vadd.f32 %v3401_v50, %v9348_v49 }
0x107e   :  { %v3413_v60 = vsel %vm70_vm0, %v10557_v10, 0.0 }
0x107f   :  { %3414 = vadd.xlane.f32.xlu1 %v3413_v60 }
0x1108   :  { %v3412_v12 = vpop.xlane.xlu0 %3411 }
0x1109   :  { %v3416_v15 = vmul.f32 0.03125, %v3412_v12 }
0x110b   :  { %v3418_v57 = vsub.f32 %v10552_v62, %v3416_v15 }
0x110c   :  { %v3415_v22 = vpop.xlane.xlu1 %3414 }
0x110d   :  { %v3417_v33 = vmul.f32 0.03125, %v3415_v22  ;;  %v3420_v43 = vmul.f32 %v3418_v57, %v3418_v57  ;;  %v3436_v11 = vmul.f32 %v6880_v25, %v3418_v57 }
0x110f   :  { %v3419_v26 = vsub.f32 %v10557_v10, %v3417_v33  ;;  %v3422_v27 = vsel %vm70_vm0, %v3420_v43, 0.0 }
0x1110   :  { %3423 = vadd.xlane.f32.xlu0 %v3422_v27 }
0x1111   :  { %v3421_v37 = vmul.f32 %v3419_v26, %v3419_v26  ;;  %v3437_v47 = vmul.f32 %v6880_v25, %v3419_v26 }
0x1113   :  { %v3425_v49 = vsel %vm70_vm0, %v3421_v37, 0.0 }
0x1114   :  { %3426 = vadd.xlane.f32.xlu1 %v3425_v49 }
0x119d   :  { %v3424_v31 = vpop.xlane.xlu0 %3423 }
0x119e   :  { %v3428_v13 = vmul.f32 0.032258064, %v3424_v31 }
0x11a0   :  { %8906 = vrsqrt.f32 %v3428_v13  ;;  %vm3440_vm15 = vcmp.eq.f32.partialorder %v3428_v13, inf  ;;  %v3443_v56 = vand.u32 2147483648, %v3428_v13  ;;  %vm3442_vm1 = vcmp.eq.f32.partialorder %v3428_v13, 0.0 }
0x11a1   :  { %v3427_v54 = vpop.xlane.xlu1 %3426 }
0x11a2   :  { %v3429_v0 = vmul.f32 0.032258064, %v3427_v54 }
0x11a4   :  { %8908 = vrsqrt.f32 %v3429_v0  ;;  %vm3447_vm2 = vcmp.eq.f32.partialorder %v3429_v0, inf  ;;  %v3450_v36 = vand.u32 2147483648, %v3429_v0  ;;  %vm3449_vm3 = vcmp.eq.f32.partialorder %v3429_v0, 0.0 }
0x11aa   :  { %v8907_v4 = vpop.eup %8906 }
0x11ab   :  { %v3439_v29 = vmul.f32 %v8907_v4, %v3428_v13 }
0x11ad   :  { %v3441_v30 = vsel %vm3440_vm15, %v3428_v13, %v3439_v29 }
0x11ae   :  { %v8909_v32 = vpop.eup %8908  ;;  %v3444_v1 = vsel %vm3442_vm1, %v3443_v56, %v3441_v30 }
0x11af   :  { %v3446_v2 = vmul.f32 %v8909_v32, %v3429_v0  ;;  %v3452_v9 = vadd.f32 1e-06, %v3444_v1 }
0x11b1   :  { %v3448_v35 = vsel %vm3447_vm2, %v3429_v0, %v3446_v2  ;;  %8910 = vrcp.f32 %v3452_v9 }
0x11b2   :  { %v3451_v8 = vsel %vm3449_vm3, %v3450_v36, %v3448_v35 }
0x11b3   :  { %v3453_v24 = vadd.f32 1e-06, %v3451_v8 }
0x11b5   :  { %8912 = vrcp.f32 %v3453_v24 }
0x11bb   :  { %v8911_v16 = vpop.eup %8910 }
0x11bc   :  { %v3455_v17 = vmul.f32 %v8911_v16, %v3436_v11 }
0x11be   :  { %v3464_v6 = vadd.f32 %v6881_v14, %v3455_v17 }
0x11bf   :  { %v8913_v39 = vpop.eup %8912 }
0x11c0   :  { %v3457_v40 = vmul.f32 %v8913_v39, %v3437_v47  ;;  %8074 = vmatprep.mubr.msk.f32.mxu1 %vm70_vm0, %v3464_v6 }
0x11c2   :  { %v3465_v41 = vadd.f32 %v6881_v14, %v3457_v40 }
0x11c4   :  { %8075 = vmatmul.mubr.msk.f32.vlgmr.msra.gmra.mrb[50].mxu1 %vm70_vm0, %v3465_v41 }
0x11c5   :  { %8079 = vmatprep.mubr.msk.f32.mxu1 %vm8987_vm5, %v8986_v51 }
0x1297   :  { %v8076_v42 = vpop.f32.mrb[50].mxu1 }
0x1298   :  { %v10591_v45 = vadd.f32 %v8076_v42, %v6887_v52  ;;  %v3551_v46 = vpop.f32.mrb[51].mxu1 }
0x1299   :  { %v10593_v61 = vadd.f32 %v6887_v52, %v3551_v46 }
0x129a   :  { %3638 = vrot.lane.b32.xlu1 %v10591_v45, %s8988_s29 }
0x129b   :  { %3561 = vrot.lane.b32.xlu0 %v10593_v61, %s8988_s29  ;;  %s12032_s29 = smov 112  }
0x130c   :  { %v3639_v48 = vpop.permute.xlu1 %3638 }
0x130d   :  { %8083 = vmatpush3.xpose.msk.msra.mxu0 %vm223_vm6, %v3639_v48  ;;  %v3562_v50 = vpop.permute.xlu0 %3561 }
0x130e   :  { %8078 = vmatpush3.xpose.msk.msra.mxu1 %vm223_vm6, %v3562_v50  ;;  %8092 = vmatprep.subr.mxu0 %v8986_v51 }
0x130f   :  { %8087 = vmatprep.subr.mxu1 %v8986_v51 }
0x1310   :  { %8085 = vmatmul.mubr.msk.f32.vlgmr.msra.gmra.mrb[50].mxu0 %vm223_vm6, %v10591_v45 }
0x1311   :  { %8080 = vmatmul.mubr.msk.f32.vlgmr.msra.gmra.mrb[52].mxu1 %vm223_vm6, %v10593_v61  ;;  %8094 = vmatprep.mubr.msk.f32.mxu0 %vm8987_vm5, %v8986_v51 }
0x1312   :  { %8089 = vmatprep.mubr.msk.f32.mxu1 %vm8987_vm5, %v8986_v51 }
0x13e3   :  { %v3710_v7 = vpop.f32.mrb[50].mxu0 }
0x13e4   :  { %v3715_v60 = vmul.f32 0.35355338, %v3710_v7  ;;  %v3633_v12 = vpop.f32.mrb[52].mxu1  ;;  %v8086_v15 = vpop.f32.mrb[51].mxu0 }
0x13e5   :  { %v3714_v57 = vmul.f32 0.35355338, %v3633_v12  ;;  %v8081_v22 = vpop.f32.mrb[53].mxu1 }
0x13e6   :  { %v3717_v33 = vsel %vm67_vm8, -1e+09, %v3715_v60 }
0x13e7   :  { %v3721_v43 = vsel %vm223_vm6, %v3717_v33, -inf  ;;  %v3716_v26 = vsel %vm66_vm7, -1e+09, %v3714_v57 }
0x13e8   :  { %3722 = vmax.xlane.f32.xlu0 %v3721_v43  ;;  %v3718_v27 = vsel %vm223_vm6, %v3716_v26, -inf }
0x13e9   :  { %3719 = vmax.xlane.f32.xlu1 %v3718_v27 }
0x13fa   :  { %3816 = vrot.lane.b32.xlu1 %v10591_v45, %s8989_s19 }
0x13fe   :  { %3740 = vrot.lane.b32.xlu0 %v10593_v61, %s8989_s19  ;;  %3894 = vrot.lane.b32.xlu1 %v10593_v61, %s8990_s2  ;;  %s12033_s19 = smov 48  }
0x1402   :  { %3972 = vrot.lane.b32.xlu1 %v10591_v45, %s8990_s2  ;;  %s12034_s2 = smov 72  }
0x1475   :  { %v3723_v37 = vpop.xlane.xlu0 %3722 }
0x1476   :  { %v3725_v49 = vsub.f32 %v3717_v33, %v3723_v37  ;;  %v3720_v38 = vpop.xlane.xlu1 %3719 }
0x1477   :  { %v3724_v28 = vsub.f32 %v3716_v26, %v3720_v38 }
0x1478   :  { %v3728_v18 = vmul.f32 1.442695, %v3725_v49 }
0x1479   :  { %v3726_v20 = vmul.f32 1.442695, %v3724_v28  ;;  %v3741_v21 = vpop.permute.xlu0 %3740 }
0x147a   :  { %8914 = vpow2.f32 %v3728_v18  ;;  %v3817_v44 = vpop.permute.xlu1 %3816  ;;  %8088 = vmatpush3.msra.mxu1 %v3741_v21 }
0x147b   :  { %8916 = vpow2.f32 %v3726_v20  ;;  %8093 = vmatpush3.msra.mxu0 %v3817_v44  ;;  %8097 = vmatprep.subr.mxu1 %v8986_v51 }
0x147c   :  { %8102 = vmatprep.subr.mxu0 %v8986_v51 }
0x147e   :  { %v3895_v4 = vpop.permute.xlu1 %3894 }
0x1482   :  { %v3973_v29 = vpop.permute.xlu1 %3972 }
0x1484   :  { %v8915_v31 = vpop.eup %8914 }
0x1485   :  { %v8917_v13 = vpop.eup %8916  ;;  %v3733_v54 = vsel %vm223_vm6, %v8915_v31, 0.0 }
0x1486   :  { %3734 = vadd.xlane.f32.xlu1 %v3733_v54  ;;  %v3730_v0 = vsel %vm223_vm6, %v8917_v13, 0.0 }
0x1487   :  { %3731 = vadd.xlane.f32.xlu0 %v3730_v0 }
0x1497   :  { %3970 = vrot.lane.b32.xlu1 %v10591_v45, %s8991_s1 }
0x149d   :  { %3892 = vrot.lane.b32.xlu0 %v10593_v61, %s8991_s1  ;;  %s12035_s1 = smov 104  }
0x1513   :  { %v3735_v56 = vpop.xlane.xlu1 %3734 }
0x1514   :  { %8918 = vrcp.f32 %v3735_v56  ;;  %v3732_v30 = vpop.xlane.xlu0 %3731 }
0x1515   :  { %8920 = vrcp.f32 %v3732_v30 }
0x1517   :  { %v3971_v36 = vpop.permute.xlu1 %3970 }
0x1518   :  { %v3893_v35 = vpop.permute.xlu0 %3892 }
0x151e   :  { %v8919_v32 = vpop.eup %8918 }
0x151f   :  { %v8921_v1 = vpop.eup %8920  ;;  %v3739_v2 = vmul.f32 %v8919_v32, %v8915_v31 }
0x1520   :  { %v3737_v9 = vmul.f32 %v8921_v1, %v8917_v13 }
0x1521   :  { %8095 = vmatmul.mubr.msk.f32.vlgmr.msra.gmra.mrb[52].mxu0 %vm223_vm6, %v3739_v2 }
0x1522   :  { %8103 = vmatpush3.xpose.msk.msra.mxu0 %vm223_vm6, %v3973_v29  ;;  %8090 = vmatmul.mubr.msk.f32.vlgmr.msra.gmra.mrb[54].mxu1 %vm223_vm6, %v3737_v9 }
0x1523   :  { %8098 = vmatpush3.xpose.msk.msra.mxu1 %vm223_vm6, %v3895_v4  ;;  %8104 = vmatprep.mubr.msk.f32.mxu0 %vm8987_vm5, %v8986_v51 }
0x1524   :  { %8099 = vmatprep.mubr.msk.f32.mxu1 %vm8987_vm5, %v8986_v51  ;;  %8112 = vmatprep.subr.mxu0 %v8986_v51 }
0x1525   :  { %8105 = vmatmul.mubr.msk.f32.vlgmr.msra.gmra.mrb[54].mxu0 %vm223_vm6, %v3971_v36  ;;  %8107 = vmatprep.subr.mxu1 %v8986_v51 }
0x1526   :  { %8100 = vmatmul.mubr.msk.f32.vlgmr.msra.gmra.mrb[56].mxu1 %vm223_vm6, %v3893_v35  ;;  %8114 = vmatprep.mubr.msk.f32.mxu0 %vm8987_vm5, %v8986_v51 }
0x1527   :  { %8109 = vmatprep.mubr.msk.f32.mxu1 %vm8987_vm5, %v8986_v51 }
0x15f4   :  { %v10649_v8 = vpop.f32.mrb[52].mxu0 }
0x15f5   :  { %v10651_v24 = vpop.f32.mrb[54].mxu1  ;;  %v8096_v25 = vpop.f32.mrb[53].mxu0 }
0x15f6   :  { %v8091_v11 = vpop.f32.mrb[55].mxu1 }
0x15f8   :  { %v4044_v16 = vpop.f32.mrb[54].mxu0 }
0x15f9   :  { %v4049_v14 = vmul.f32 0.35355338, %v4044_v16  ;;  %v3966_v17 = vpop.f32.mrb[56].mxu1  ;;  %v8106_v47 = vpop.f32.mrb[55].mxu0 }
0x15fa   :  { %v4048_v6 = vmul.f32 0.35355338, %v3966_v17  ;;  %v8101_v39 = vpop.f32.mrb[57].mxu1 }
0x15fb   :  { %v4051_v40 = vsel %vm67_vm8, -1e+09, %v4049_v14 }
0x15fc   :  { %v4055_v41 = vsel %vm223_vm6, %v4051_v40, -inf  ;;  %v4050_v52 = vsel %vm66_vm7, -1e+09, %v4048_v6 }
0x15fd   :  { %4056 = vmax.xlane.f32.xlu1 %v4055_v41  ;;  %v4052_v42 = vsel %vm223_vm6, %v4050_v52, -inf }
0x15fe   :  { %4053 = vmax.xlane.f32.xlu0 %v4052_v42 }
0x160e   :  { %4150 = vrot.lane.b32.xlu1 %v10591_v45, %s12030_s4 }
0x1612   :  { %4228 = vrot.lane.b32.xlu1 %v10593_v61, %s12031_s6 }
0x1614   :  { %4074 = vrot.lane.b32.xlu0 %v10593_v61, %s12030_s4 }
0x1616   :  { %4306 = vrot.lane.b32.xlu1 %v10591_v45, %s12031_s6  ;;  %s9002_s6 = smov [#allocation2]  }
0x161a   :  { %4304 = vrot.lane.b32.xlu1 %v10591_v45, %s12032_s29 }
0x168a   :  { %v4057_v46 = vpop.xlane.xlu1 %4056 }
0x168b   :  { %v4059_v48 = vsub.f32 %v4051_v40, %v4057_v46  ;;  %v4054_v50 = vpop.xlane.xlu0 %4053 }
0x168c   :  { %v4058_v7 = vsub.f32 %v4050_v52, %v4054_v50 }
0x168d   :  { %v4062_v60 = vmul.f32 1.442695, %v4059_v48 }
0x168e   :  { %v4060_v12 = vmul.f32 1.442695, %v4058_v7  ;;  %v4151_v15 = vpop.permute.xlu1 %4150 }
0x168f   :  { %8922 = vpow2.f32 %v4062_v60  ;;  %8113 = vmatpush3.msra.mxu0 %v4151_v15  ;;  %v4075_v57 = vpop.permute.xlu0 %4074 }
0x1690   :  { %8108 = vmatpush3.msra.mxu1 %v4075_v57  ;;  %8122 = vmatprep.subr.mxu0 %v8986_v51  ;;  %8924 = vpow2.f32 %v4060_v12 }
0x1691   :  { %8117 = vmatprep.subr.mxu1 %v8986_v51 }
0x1692   :  { %v4229_v49 = vpop.permute.xlu1 %4228 }
0x1696   :  { %v4307_v28 = vpop.permute.xlu1 %4306 }
0x1699   :  { %v8923_v22 = vpop.eup %8922 }
0x169a   :  { %v4067_v33 = vsel %vm223_vm6, %v8923_v22, 0.0  ;;  %v8925_v43 = vpop.eup %8924  ;;  %v4305_v44 = vpop.permute.xlu1 %4304 }
0x169b   :  { %4068 = vadd.xlane.f32.xlu0 %v4067_v33  ;;  %v4064_v26 = vsel %vm223_vm6, %v8925_v43, 0.0 }
0x169f   :  { %4065 = vadd.xlane.f32.xlu0 %v4064_v26 }
0x16b5   :  { %4226 = vrot.lane.b32.xlu0 %v10593_v61, %s12032_s29  ;;  %s6816_s29 = sshll.u32 %s9002_s6, 4  ;;  %s6817_s29 = int_to_ptr.vmem [resolvable:$true] %s6816_s29 }
0x16b6   :  { %p8967_p1 = scmp.lt.s32.totalorder %s6817_s29, %s6817_s29 }
0x1728   :  { %v4069_v27 = vpop.xlane.xlu0 %4068 }
0x1729   :  { %8926 = vrcp.f32 %v4069_v27 }
0x172c   :  { %v4066_v37 = vpop.xlane.xlu0 %4065 }
0x172d   :  { %8928 = vrcp.f32 %v4066_v37 }
0x1730   :  { %v4227_v31 = vpop.permute.xlu0 %4226 }
0x1733   :  { %v8927_v38 = vpop.eup %8926 }
0x1734   :  { %v4073_v18 = vmul.f32 %v8927_v38, %v8923_v22 }
0x1736   :  { %8115 = vmatmul.mubr.msk.f32.vlgmr.msra.gmra.mrb[56].mxu0 %vm223_vm6, %v4073_v18 }
0x1737   :  { %v8929_v20 = vpop.eup %8928  ;;  %8123 = vmatpush3.xpose.msk.msra.mxu0 %vm223_vm6, %v4307_v28  ;;  %8124 = vmatprep.mubr.msk.f32.mxu0 %vm8987_vm5, %v8986_v51 }
0x1738   :  { %v4071_v21 = vmul.f32 %v8929_v20, %v8925_v43  ;;  %8132 = vmatprep.subr.mxu0 %v8986_v51 }
0x173a   :  { %8110 = vmatmul.mubr.msk.f32.vlgmr.msra.gmra.mrb[58].mxu1 %vm223_vm6, %v4071_v21  ;;  %8125 = vmatmul.mubr.msk.f32.vlgmr.msra.gmra.mrb[58].mxu0 %vm223_vm6, %v4305_v44 }
0x173b   :  { %8118 = vmatpush3.xpose.msk.msra.mxu1 %vm223_vm6, %v4229_v49  ;;  %8119 = vmatprep.mubr.msk.f32.mxu1 %vm8987_vm5, %v8986_v51 }
0x173c   :  { %8127 = vmatprep.subr.mxu1 %v8986_v51  ;;  %8134 = vmatprep.mubr.msk.f32.mxu0 %vm8987_vm5, %v8986_v51 }
0x173e   :  { %8120 = vmatmul.mubr.msk.f32.vlgmr.msra.gmra.mrb[60].mxu1 %vm223_vm6, %v4227_v31 }
0x173f   :  { %8129 = vmatprep.mubr.msk.f32.mxu1 %vm8987_vm5, %v8986_v51 }
0x1809   :  { %v10691_v13 = vpop.f32.mrb[56].mxu0 }
0x180a   :  { %v8116_v54 = vpop.f32.mrb[57].mxu0 }
0x180d   :  { %v10693_v0 = vpop.f32.mrb[58].mxu1  ;;  %v4378_v4 = vpop.f32.mrb[58].mxu0 }
0x180e   :  { %v4383_v29 = vmul.f32 0.35355338, %v4378_v4  ;;  %v8111_v56 = vpop.f32.mrb[59].mxu1  ;;  %v8126_v30 = vpop.f32.mrb[59].mxu0 }
0x1810   :  { %v4385_v32 = vsel %vm67_vm8, -1e+09, %v4383_v29 }
0x1811   :  { %v4300_v1 = vpop.f32.mrb[60].mxu1  ;;  %v4389_v2 = vsel %vm223_vm6, %v4385_v32, -inf }
0x1812   :  { %v4382_v9 = vmul.f32 0.35355338, %v4300_v1  ;;  %4390 = vmax.xlane.f32.xlu1 %v4389_v2  ;;  %v8121_v36 = vpop.f32.mrb[61].mxu1 }
0x1814   :  { %v4384_v35 = vsel %vm66_vm7, -1e+09, %v4382_v9 }
0x1815   :  { %v4386_v25 = vsel %vm223_vm6, %v4384_v35, -inf }
0x1816   :  { %4387 = vmax.xlane.f32.xlu0 %v4386_v25 }
0x1823   :  { %4484 = vrot.lane.b32.xlu1 %v10591_v45, %s12033_s19 }
0x1827   :  { %4562 = vrot.lane.b32.xlu1 %v10593_v61, %s12034_s2 }
0x182b   :  { %4640 = vrot.lane.b32.xlu1 %v10591_v45, %s12034_s2 }
0x182c   :  { %4408 = vrot.lane.b32.xlu0 %v10593_v61, %s12033_s19 }
0x182f   :  { %4638 = vrot.lane.b32.xlu1 %v10591_v45, %s12035_s1 }
0x189f   :  { %v4391_v11 = vpop.xlane.xlu1 %4390 }
0x18a0   :  { %v4393_v16 = vsub.f32 %v4385_v32, %v4391_v11 }
0x18a2   :  { %v4396_v14 = vmul.f32 1.442695, %v4393_v16 }
0x18a3   :  { %v4485_v17 = vpop.permute.xlu1 %4484  ;;  %v4388_v47 = vpop.xlane.xlu0 %4387 }
0x18a4   :  { %8930 = vpow2.f32 %v4396_v14  ;;  %v4392_v6 = vsub.f32 %v4384_v35, %v4388_v47  ;;  %8133 = vmatpush3.msra.mxu0 %v4485_v17  ;;  %v6915_v47 = vld [vmem:[%s11991_s7 + $0x28] sm:$0xff] }
0x18a5   :  { %8142 = vmatprep.subr.mxu0 %v8986_v51 }
0x18a6   :  { %v4394_v39 = vmul.f32 1.442695, %v4392_v6 }
0x18a7   :  { %v4409_v40 = vpop.permute.xlu0 %4408  ;;  %v4563_v7 = vpop.permute.xlu1 %4562 }
0x18a8   :  { %8932 = vpow2.f32 %v4394_v39  ;;  %8128 = vmatpush3.msra.mxu1 %v4409_v40  ;;  %v6916_v39 = vld [vmem:[%s11991_s7 + $0x30] sm:$0xff]  ;;  %v6917_v40 = vld [vmem:[%s11991_s7 + $0x38] sm:$0xff] }
0x18a9   :  { %8137 = vmatprep.subr.mxu1 %v8986_v51 }
0x18ab   :  { %v4641_v12 = vpop.permute.xlu1 %4640 }
0x18ae   :  { %v8931_v41 = vpop.eup %8930 }
0x18af   :  { %v4401_v52 = vsel %vm223_vm6, %v8931_v41, 0.0  ;;  %v4639_v33 = vpop.permute.xlu1 %4638 }
0x18b0   :  { %4402 = vadd.xlane.f32.xlu0 %v4401_v52 }
0x18b2   :  { %v8933_v42 = vpop.eup %8932 }
0x18b3   :  { %v4398_v46 = vsel %vm223_vm6, %v8933_v42, 0.0 }
0x18b4   :  { %4399 = vadd.xlane.f32.xlu0 %v4398_v46 }
0x18ca   :  { %4560 = vrot.lane.b32.xlu0 %v10593_v61, %s12035_s1 }
0x193d   :  { %v4403_v48 = vpop.xlane.xlu0 %4402 }
0x193e   :  { %8934 = vrcp.f32 %v4403_v48 }
0x1941   :  { %v4400_v50 = vpop.xlane.xlu0 %4399 }
0x1942   :  { %8936 = vrcp.f32 %v4400_v50 }
0x1945   :  { %v4561_v43 = vpop.permute.xlu0 %4560 }
0x1948   :  { %v8935_v60 = vpop.eup %8934 }
0x1949   :  { %v4407_v15 = vmul.f32 %v8935_v60, %v8931_v41  ;;  %v8516_v41 = vpack.c.bf16 %v6917_v40, %v6916_v39  ;;  %v6958_v39 = vld [vmem:[%s11995_s11 + $0x300] sm:$0xff] }
0x194a   :  { %v6974_v40 = vld [vmem:[%s11995_s11 + $0x380] sm:$0xff] }
0x194b   :  { %8135 = vmatmul.mubr.msk.f32.vlgmr.msra.gmra.mrb[60].mxu0 %vm223_vm6, %v4407_v15 }
0x194c   :  { %v8937_v57 = vpop.eup %8936  ;;  %8143 = vmatpush3.xpose.msk.msra.mxu0 %vm223_vm6, %v4641_v12  ;;  %8144 = vmatprep.mubr.msk.f32.mxu0 %vm8987_vm5, %v8986_v51 }
0x194d   :  { %v4405_v22 = vmul.f32 %v8937_v57, %v8933_v42  ;;  %8152 = vmatprep.subr.mxu0 %v8986_v51 }
0x194f   :  { %8130 = vmatmul.mubr.msk.f32.vlgmr.msra.gmra.mrb[62].mxu1 %vm223_vm6, %v4405_v22  ;;  %8145 = vmatmul.mubr.msk.f32.vlgmr.msra.gmra.mrb[62].mxu0 %vm223_vm6, %v4639_v33 }
0x1950   :  { %8138 = vmatpush3.xpose.msk.msra.mxu1 %vm223_vm6, %v4563_v7  ;;  %8139 = vmatprep.mubr.msk.f32.mxu1 %vm8987_vm5, %v8986_v51 }
0x1951   :  { %8147 = vmatprep.subr.mxu1 %v8986_v51  ;;  %8154 = vmatprep.mubr.msk.f32.mxu0 %vm8987_vm5, %v8986_v51 }
0x1953   :  { %8140 = vmatmul.mubr.msk.f32.vlgmr.msra.gmra.mrb[64].mxu1 %vm223_vm6, %v4561_v43 }
0x1954   :  { %8149 = vmatprep.mubr.msk.f32.mxu1 %vm8987_vm5, %v8986_v51 }
0x1a1e   :  { %v4556_v26 = vpop.f32.mrb[60].mxu0 }
0x1a1f   :  { %v8136_v27 = vpop.f32.mrb[61].mxu0 }
0x1a22   :  { %v4480_v37 = vpop.f32.mrb[62].mxu1  ;;  %v4712_v49 = vpop.f32.mrb[62].mxu0 }
0x1a23   :  { %v4717_v38 = vmul.f32 0.35355338, %v4712_v49  ;;  %v8131_v28 = vpop.f32.mrb[63].mxu1  ;;  %v8146_v18 = vpop.f32.mrb[63].mxu0 }
0x1a25   :  { %v4719_v20 = vsel %vm67_vm8, -1e+09, %v4717_v38 }
0x1a26   :  { %v4634_v21 = vpop.f32.mrb[64].mxu1  ;;  %v4723_v44 = vsel %vm223_vm6, %v4719_v20, -inf }
0x1a27   :  { %v4716_v31 = vmul.f32 0.35355338, %v4634_v21  ;;  %4724 = vmax.xlane.f32.xlu1 %v4723_v44  ;;  %v8141_v54 = vpop.f32.mrb[65].mxu1 }
0x1a29   :  { %v4718_v4 = vsel %vm66_vm7, -1e+09, %v4716_v31 }
0x1a2a   :  { %v4720_v29 = vsel %vm223_vm6, %v4718_v4, -inf }
0x1a2b   :  { %4721 = vmax.xlane.f32.xlu0 %v4720_v29 }
0x1a38   :  { %4818 = vrot.lane.b32.xlu1 %v10591_v45, %s12036_s12 }
0x1a3c   :  { %4896 = vrot.lane.b32.xlu1 %v10693_v0, %s12037_s30 }
0x1a40   :  { %4898 = vrot.lane.b32.xlu1 %v10691_v13, %s12037_s30 }
0x1a44   :  { %4906 = vrot.lane.b32.xlu1 %v4556_v26, %s12038_s18 }
0x1ab4   :  { %v4725_v63 = vpop.xlane.xlu1 %4724 }
0x1ab5   :  { %v4727_v56 = vsub.f32 %v4719_v20, %v4725_v63 }
0x1ab7   :  { %v4730_v30 = vmul.f32 1.442695, %v4727_v56 }
0x1ab8   :  { %v4819_v32 = vpop.permute.xlu1 %4818  ;;  %v4722_v59 = vpop.xlane.xlu0 %4721 }
0x1ab9   :  { %8938 = vpow2.f32 %v4730_v30  ;;  %v4726_v1 = vsub.f32 %v4718_v4, %v4722_v59  ;;  %8153 = vmatpush3.msra.mxu0 %v4819_v32  ;;  %v6927_v59 = vld [vmem:[%s11995_s11 + $0x208] sm:$0xff] }
0x1abb   :  { %v4728_v2 = vmul.f32 1.442695, %v4726_v1  ;;  %v6943_v1 = vld [vmem:[%s11995_s11 + $0x288] sm:$0xff] }
0x1abc   :  { %v4897_v50 = vpop.permute.xlu1 %4896 }
0x1abd   :  { %8940 = vpow2.f32 %v4728_v2  ;;  %v4918_v15 = vsel %vm223_vm6, %v10651_v24, %v4897_v50  ;;  %v6919_v24 = vld [vmem:[%s11992_s8 + $0x1] ss:$0 sm:$0xff]  ;;  %v6929_v2 = vld [vmem:[%s11995_s11 + $0x218] sm:$0xff]  ;;  %v6931_v50 = vld [vmem:[%s11995_s11 + $0x228] sm:$0xff] }
0x1ac0   :  { %v4899_v7 = vpop.permute.xlu1 %4898 }
0x1ac1   :  { %v4919_v22 = vsel %vm223_vm6, %v10649_v8, %v4899_v7  ;;  %v6947_v7 = vld [vmem:[%s11995_s11 + $0x2a8] sm:$0xff] }
0x1ac3   :  { %v8939_v9 = vpop.eup %8938 }
0x1ac4   :  { %v4735_v45 = vsel %vm223_vm6, %v8939_v9, 0.0  ;;  %v4907_v60 = vpop.permute.xlu1 %4906 }
0x1ac5   :  { %4736 = vadd.xlane.f32.xlu0 %v4735_v45  ;;  %v4921_v26 = vsel %vm1581_vm10, %v4919_v22, %v4907_v60  ;;  %v6945_v45 = vld [vmem:[%s11995_s11 + $0x298] sm:$0xff]  ;;  %v8536_v60 = vpack.c.bf16 %v6947_v7, %v6931_v50  ;;  %v6934_v50 = vld [vmem:[%s11995_s11 + $0x240] sm:$0xff] }
0x1ac7   :  { %v8941_v0 = vpop.eup %8940 }
0x1ac8   :  { %v4732_v36 = vsel %vm223_vm6, %v8941_v0, 0.0 }
0x1ac9   :  { %4733 = vadd.xlane.f32.xlu0 %v4732_v36  ;;  %v6942_v36 = vld [vmem:[%s11995_s11 + $0x280] sm:$0xff] }
0x1adf   :  { %4742 = vrot.lane.b32.xlu0 %v10593_v61, %s12036_s12  ;;  %v6914_v61 = vld [vmem:[%s11991_s7 + $0x20] sm:$0xff] }
0x1ae0   :  { %v8512_v6 = vpack.c.bf16 %v6915_v47, %v6914_v61  ;;  %v6961_v61 = vld [vmem:[%s11995_s11 + $0x318] sm:$0xff] }
0x1ae3   :  { %4904 = vrot.lane.b32.xlu0 %v4480_v37, %s12038_s18 }
0x1b52   :  { %v4737_v13 = vpop.xlane.xlu0 %4736 }
0x1b53   :  { %8942 = vrcp.f32 %v4737_v13  ;;  %v8528_v13 = vpack.c.bf16 %v6945_v45, %v6929_v2  ;;  %v6925_v2 = vld [vmem:[%s11994_s10 + $0x1] ss:$0 sm:$0xff]  ;;  %v6979_v45 = vld [vmem:[%s11995_s11 + $0x3a8] sm:$0xff] }
0x1b56   :  { %v4734_v35 = vpop.xlane.xlu0 %4733 }
0x1b57   :  { %8944 = vrcp.f32 %v4734_v35 }
0x1b5a   :  { %v4743_v25 = vpop.permute.xlu0 %4742 }
0x1b5b   :  { %8148 = vmatpush3.msra.mxu1 %v4743_v25  ;;  %v6928_v25 = vld [vmem:[%s11995_s11 + $0x210] sm:$0xff] }
0x1b5c   :  { %8513 = vmatprep.subr.bf16.mxu1 %v8512_v6 }
0x1b5d   :  { %v8943_v11 = vpop.eup %8942 }
0x1b5e   :  { %v4741_v16 = vmul.f32 %v8943_v11, %v8939_v9  ;;  %v4905_v12 = vpop.permute.xlu0 %4904  ;;  %v8520_v9 = vpack.c.bf16 %v6943_v1, %v6927_v59  ;;  %v6944_v11 = vld [vmem:[%s11995_s11 + $0x290] sm:$0xff] }
0x1b5f   :  { %v4920_v33 = vsel %vm1581_vm10, %v4918_v15, %v4905_v12  ;;  %v6933_v12 = vld [vmem:[%s11995_s11 + $0x238] sm:$0xff]  ;;  %v6948_v59 = vld [vmem:[%s11995_s11 + $0x2b0] sm:$0xff] }
0x1b60   :  { %8155 = vmatmul.mubr.msk.f32.vlgmr.msra.gmra.mrb[64].mxu0 %vm223_vm6, %v4741_v16  ;;  %8521 = vmatprep.subr.bf16.mxu0 %v8520_v9  ;;  %v8530_v16 = vpack.c.bf16 %v6944_v11, %v6928_v25  ;;  %v6949_v15 = vld [vmem:[%s11995_s11 + $0x2b8] sm:$0xff]  ;;  %v6962_v25 = vld [vmem:[%s11995_s11 + $0x320] sm:$0xff] }
0x1b61   :  { %v8945_v14 = vpop.eup %8944  ;;  %5300 = vmatprep.mubr.f32.mxu0 %v8986_v51 }
0x1b62   :  { %v4739_v17 = vmul.f32 %v8945_v14, %v8941_v0  ;;  %v6926_v0 = vld [vmem:[%s11995_s11 + $0x200] sm:$0xff]  ;;  %v6959_v14 = vld [vmem:[%s11995_s11 + $0x308] sm:$0xff] }
0x1b63   :  { %v8522_v35 = vpack.c.bf16 %v6942_v36, %v6926_v0  ;;  %v6965_v0 = vld [vmem:[%s11995_s11 + $0x338] sm:$0xff] }
0x1b64   :  { %8150 = vmatmul.mubr.msk.f32.vlgmr.msra.gmra.mrb[66].mxu1 %vm223_vm6, %v4739_v17  ;;  %v6975_v17 = vld [vmem:[%s11995_s11 + $0x388] sm:$0xff]  ;;  %v6981_v36 = vld [vmem:[%s11995_s11 + $0x3b8] sm:$0xff] }
0x1b65   :  { %8515 = vmatpush3.bf16.msra.mxu1 %v8512_v6  ;;  %8523 = vmatpush1.bf16.msra.mxu0 %v8522_v35  ;;  %v8524_v47 = vpack.c.bf16 %v6975_v17, %v6959_v14  ;;  %v6977_v6 = vld [vmem:[%s11995_s11 + $0x398] sm:$0xff]  ;;  %v6978_v14 = vld [vmem:[%s11995_s11 + $0x3a0] sm:$0xff]  ;;  %v6964_v17 = vld [vmem:[%s11995_s11 + $0x330] sm:$0xff] }
0x1b66   :  { %8517 = vmatprep.subr.bf16.mxu1 %v8516_v41 }
0x1b67   :  { %8525 = vmatprep.subr.bf16.mxu0 %v8524_v47 }
0x1b69   :  { %8519 = vmatpush3.bf16.msra.mxu1 %v8516_v41  ;;  %v8532_v41 = vpack.c.bf16 %v6977_v6, %v6961_v61  ;;  %v6980_v61 = vld [vmem:[%s11995_s11 + $0x3b0] sm:$0xff] }
0x1b6a   :  { %8529 = vmatprep.subr.bf16.mxu1 %v8528_v13 }
0x1c33   :  { %v4890_v52 = vpop.f32.mrb[64].mxu0 }
0x1c34   :  { %4914 = vrot.lane.b32.xlu1 %v4890_v52, %s12039_s27  ;;  %v8156_v42 = vpop.f32.mrb[65].mxu0  ;;  %v8526_v52 = vpack.c.bf16 %v6974_v40, %v6958_v39  ;;  %v8548_v39 = vpack.c.bf16 %v6981_v36, %v6965_v0  ;;  %v6973_v0 = vld [vmem:[%s11995_s11 + $0x378] sm:$0xff] }
0x1c35   :  { %v6960_v42 = vld [vmem:[%s11995_s11 + $0x310] sm:$0xff]  ;;  %v6989_v36 = vld [vmem:[%s11995_s11 + $0x3f8] sm:$0xff] }
0x1c36   :  { %8527 = vmatpush1.bf16.msra.mxu0 %v8526_v52  ;;  %v6937_v52 = vld [vmem:[%s11995_s11 + $0x258] sm:$0xff] }
0x1c37   :  { %v4814_v46 = vpop.f32.mrb[66].mxu1  ;;  %8537 = vmatprep.subr.bf16.mxu0 %v8536_v60  ;;  %v6950_v60 = vld [vmem:[%s11995_s11 + $0x2c0] sm:$0xff] }
0x1c38   :  { %4912 = vrot.lane.b32.xlu0 %v4814_v46, %s12039_s27  ;;  %v8151_v48 = vpop.f32.mrb[67].mxu1  ;;  %v6976_v46 = vld [vmem:[%s11995_s11 + $0x390] sm:$0xff] }
0x1c39   :  { %v8534_v48 = vpack.c.bf16 %v6976_v46, %v6960_v42  ;;  %v6953_v42 = vld [vmem:[%s11995_s11 + $0x2d8] sm:$0xff]  ;;  %v8542_v46 = vpack.c.bf16 %v6978_v14, %v6962_v25  ;;  %v6970_v25 = vld [vmem:[%s11995_s11 + $0x360] sm:$0xff]  ;;  %v6972_v14 = vld [vmem:[%s11995_s11 + $0x370] sm:$0xff] }
0x1ca6   :  { %v4915_v57 = vpop.permute.xlu1 %4914 }
0x1ca7   :  { %v4923_v37 = vsel %vm1584_vm9, %v4921_v26, %v4915_v57  ;;  %v8544_v57 = vpack.c.bf16 %v6949_v15, %v6933_v12  ;;  %v6936_v12 = vld [vmem:[%s11995_s11 + $0x250] sm:$0xff] }
0x1ca8   :  { %v6952_v15 = vld [vmem:[%s11995_s11 + $0x2d0] sm:$0xff] }
0x1caa   :  { %v4913_v43 = vpop.permute.xlu0 %4912 }
0x1cab   :  { %v4922_v27 = vsel %vm1584_vm9, %v4920_v33, %v4913_v43 }
0x1cac   :  { %8165 = vmatprep.mubr.msk.f32.mxu1 %vm70_vm0, %v4922_v27 }
0x1cad   :  { %8166 = vmatmul.mubr.msk.f32.vlgmr.msra.gmra.mrb[68].mxu1 %vm70_vm0, %v4923_v37 }
0x1cae   :  { %5377 = vmatprep.mubr.f32.mxu1 %v8986_v51  ;;  %8531 = vmatpush1.bf16.msra.mxu1 %v8530_v16 }
0x1caf   :  { %8533 = vmatprep.subr.bf16.mxu1 %v8532_v41  ;;  %v6951_v41 = vld [vmem:[%s11995_s11 + $0x2c8] sm:$0xff] }
0x1cb2   :  { %8535 = vmatpush1.bf16.msra.mxu1 %v8534_v48  ;;  %v8550_v48 = vpack.c.bf16 %v6980_v61, %v6964_v17  ;;  %v6988_v17 = vld [vmem:[%s11995_s11 + $0x3f0] sm:$0xff] }
0x1cb3   :  { %8545 = vmatprep.subr.bf16.mxu1 %v8544_v57 }
0x1d80   :  { %v8167_v8 = vpop.f32.mrb[68].mxu1 }
0x1d81   :  { %v5015_v49 = vadd.f32 %v8167_v8, %v6919_v24  ;;  %v5009_v38 = vpop.f32.mrb[69].mxu1 }
0x1d82   :  { %v5010_v28 = vadd.f32 %v6919_v24, %v5009_v38 }
0x1d83   :  { %v10783_v18 = vadd.f32 %v5015_v49, %v10557_v10 }
0x1d84   :  { %v10786_v20 = vadd.f32 %v5010_v28, %v10552_v62 }
0x1d85   :  { %v5027_v21 = vsel %vm70_vm0, %v10783_v18, 0.0 }
0x1d86   :  { %5028 = vadd.xlane.f32.xlu1 %v5027_v21  ;;  %v5024_v44 = vsel %vm70_vm0, %v10786_v20, 0.0 }
0x1d87   :  { %5025 = vadd.xlane.f32.xlu0 %v5024_v44 }
0x1e13   :  { %v5029_v31 = vpop.xlane.xlu1 %5028 }
0x1e14   :  { %v5031_v54 = vmul.f32 0.03125, %v5029_v31  ;;  %v5026_v4 = vpop.xlane.xlu0 %5025 }
0x1e15   :  { %v5030_v29 = vmul.f32 0.03125, %v5026_v4 }
0x1e16   :  { %v10793_v63 = vsub.f32 %v10783_v18, %v5031_v54 }
0x1e17   :  { %v10796_v10 = vsub.f32 %v10786_v20, %v5030_v29  ;;  %v6924_v29 = vld [vmem:[%s11993_s9 + $0x1] ss:$0 sm:$0xff] }
0x1e18   :  { %v5035_v30 = vmul.f32 %v10793_v63, %v10793_v63  ;;  %v5051_v11 = vmul.f32 %v6924_v29, %v10793_v63  ;;  %v6935_v63 = vld [vmem:[%s11995_s11 + $0x248] sm:$0xff] }
0x1e19   :  { %v5034_v62 = vmul.f32 %v10796_v10, %v10796_v10  ;;  %v8552_v57 = vpack.c.bf16 %v6951_v41, %v6935_v63  ;;  %v7056_v63 = vld [vmem:[%s11997_s13 + $0x980] sm:$0xff] }
0x1e1a   :  { %v5039_v32 = vsel %vm70_vm0, %v5035_v30, 0.0  ;;  %v6946_v30 = vld [vmem:[%s11995_s11 + $0x2a0] sm:$0xff] }
0x1e1b   :  { %v5036_v56 = vsel %vm70_vm0, %v5034_v62, 0.0  ;;  %v6930_v62 = vld [vmem:[%s11995_s11 + $0x220] sm:$0xff] }
0x1e1c   :  { %5037 = vadd.xlane.f32.xlu0 %v5036_v56  ;;  %v5050_v56 = vmul.f32 %v6924_v29, %v10796_v10  ;;  %v6963_v10 = vld [vmem:[%s11995_s11 + $0x328] sm:$0xff]  ;;  %v8538_v13 = vpack.c.bf16 %v6946_v30, %v6930_v62  ;;  %v6957_v29 = vld [vmem:[%s11995_s11 + $0x2f8] sm:$0xff]  ;;  %v6938_v30 = vld [vmem:[%s11995_s11 + $0x260] sm:$0xff] }
0x1e1d   :  { %v8540_v6 = vpack.c.bf16 %v6979_v45, %v6963_v10  ;;  %v6987_v45 = vld [vmem:[%s11995_s11 + $0x3e8] sm:$0xff] }
0x1e20   :  { %5040 = vadd.xlane.f32.xlu0 %v5039_v32  ;;  %v6932_v32 = vld [vmem:[%s11995_s11 + $0x230] sm:$0xff] }
0x1e21   :  { %v8546_v35 = vpack.c.bf16 %v6948_v59, %v6932_v32  ;;  %v6954_v32 = vld [vmem:[%s11995_s11 + $0x2e0] sm:$0xff]  ;;  %v6940_v59 = vld [vmem:[%s11995_s11 + $0x270] sm:$0xff] }
0x1ea9   :  { %v5038_v22 = vpop.xlane.xlu0 %5037 }
0x1eaa   :  { %v5042_v33 = vmul.f32 0.032258064, %v5038_v22  ;;  %v8560_v22 = vpack.c.bf16 %v6953_v42, %v6937_v52  ;;  %v8582_v52 = vpack.c.bf16 %v6988_v17, %v6972_v14  ;;  %v7008_v42 = vld [vmem:[%s11997_s13 + $0x800] sm:$0xff]  ;;  %v7065_v17 = vld [vmem:[%s11997_s13 + $0x9c8] sm:$0xff] }
0x1eab   :  { %v7064_v14 = vld [vmem:[%s11997_s13 + $0x9c0] sm:$0xff] }
0x1eac   :  { %8946 = vrsqrt.f32 %v5042_v33  ;;  %vm5054_vm4 = vcmp.eq.f32.partialorder %v5042_v33, inf  ;;  %v5057_v24 = vand.u32 2147483648, %v5042_v33  ;;  %vm5056_vm5 = vcmp.eq.f32.partialorder %v5042_v33, 0.0 }
0x1ead   :  { %v5041_v43 = vpop.xlane.xlu0 %5040 }
0x1eae   :  { %v5043_v26 = vmul.f32 0.032258064, %v5041_v43  ;;  %v6983_v43 = vld [vmem:[%s11995_s11 + $0x3c8] sm:$0xff] }
0x1eb0   :  { %8948 = vrsqrt.f32 %v5043_v26  ;;  %vm5061_vm6 = vcmp.eq.f32.partialorder %v5043_v26, inf  ;;  %v5064_v44 = vand.u32 2147483648, %v5043_v26  ;;  %vm5063_vm7 = vcmp.eq.f32.partialorder %v5043_v26, 0.0 }
0x1eb6   :  { %v8947_v27 = vpop.eup %8946 }
0x1eb7   :  { %v5053_v37 = vmul.f32 %v8947_v27, %v5042_v33  ;;  %v6985_v27 = vld [vmem:[%s11995_s11 + $0x3d8] sm:$0xff] }
0x1eb9   :  { %v5055_v8 = vsel %vm5054_vm4, %v5042_v33, %v5053_v37  ;;  %v6967_v33 = vld [vmem:[%s11995_s11 + $0x348] sm:$0xff]  ;;  %v8554_v37 = vpack.c.bf16 %v6950_v60, %v6934_v50  ;;  %v7040_v60 = vld [vmem:[%s11997_s13 + $0x900] sm:$0xff] }
0x1eba   :  { %v8949_v49 = vpop.eup %8948  ;;  %v5058_v38 = vsel %vm5056_vm5, %v5057_v24, %v5055_v8  ;;  %v8562_v24 = vpack.c.bf16 %v6952_v15, %v6936_v12  ;;  %v6966_v8 = vld [vmem:[%s11995_s11 + $0x340] sm:$0xff]  ;;  %v7041_v12 = vld [vmem:[%s11997_s13 + $0x908] sm:$0xff]  ;;  %v7026_v15 = vld [vmem:[%s11997_s13 + $0x890] sm:$0xff] }
0x1ebb   :  { %v5066_v28 = vadd.f32 1e-06, %v5058_v38  ;;  %v5060_v21 = vmul.f32 %v8949_v49, %v5043_v26  ;;  %v6982_v49 = vld [vmem:[%s11995_s11 + $0x3c0] sm:$0xff]  ;;  %v6968_v38 = vld [vmem:[%s11995_s11 + $0x350] sm:$0xff] }
0x1ebc   :  { %v8558_v62 = vpack.c.bf16 %v6982_v49, %v6966_v8  ;;  %v7042_v49 = vld [vmem:[%s11997_s13 + $0x910] sm:$0xff] }
0x1ebd   :  { %8950 = vrcp.f32 %v5066_v28  ;;  %v5062_v31 = vsel %vm5061_vm6, %v5043_v26, %v5060_v21  ;;  %v6969_v26 = vld [vmem:[%s11995_s11 + $0x358] sm:$0xff]  ;;  %v6984_v28 = vld [vmem:[%s11995_s11 + $0x3d0] sm:$0xff]  ;;  %v8556_v21 = vpack.c.bf16 %v6983_v43, %v6967_v33 }
0x1ebe   :  { %v5065_v54 = vsel %vm5063_vm7, %v5064_v44, %v5062_v31  ;;  %v8564_v44 = vpack.c.bf16 %v6985_v27, %v6969_v26  ;;  %v6939_v31 = vld [vmem:[%s11995_s11 + $0x268] sm:$0xff]  ;;  %v7059_v33 = vld [vmem:[%s11997_s13 + $0x998] sm:$0xff]  ;;  %v8618_v26 = vpack.c.bf16 %v7041_v12, %v7040_v60  ;;  %v7010_v27 = vld [vmem:[%s11997_s13 + $0x810] sm:$0xff] }
0x1ebf   :  { %v5067_v4 = vadd.f32 1e-06, %v5065_v54  ;;  %v6955_v54 = vld [vmem:[%s11995_s11 + $0x2e8] sm:$0xff] }
0x1ec1   :  { %8952 = vrcp.f32 %v5067_v4  ;;  %v6941_v4 = vld [vmem:[%s11995_s11 + $0x278] sm:$0xff] }
0x1ec2   :  { %v8576_v10 = vpack.c.bf16 %v6957_v29, %v6941_v4  ;;  %v7012_v4 = vld [vmem:[%s11997_s13 + $0x820] sm:$0xff]  ;;  %v7013_v29 = vld [vmem:[%s11997_s13 + $0x828] sm:$0xff] }
0x1ec7   :  { %v8951_v1 = vpop.eup %8950 }
0x1ec8   :  { %v5069_v9 = vmul.f32 %v8951_v1, %v5050_v56  ;;  %v8566_v56 = vpack.c.bf16 %v6984_v28, %v6968_v38  ;;  %v6956_v1 = vld [vmem:[%s11995_s11 + $0x2f0] sm:$0xff]  ;;  %v7043_v38 = vld [vmem:[%s11997_s13 + $0x918] sm:$0xff]  ;;  %v7028_v28 = vld [vmem:[%s11997_s13 + $0x8a0] sm:$0xff] }
0x1eca   :  { %v10899_v16 = vadd.f32 %v6925_v2, %v5069_v9  ;;  %v6971_v9 = vld [vmem:[%s11995_s11 + $0x368] sm:$0xff] }
0x1ecb   :  { %v8953_v47 = vpop.eup %8952  ;;  %v8572_v61 = vpack.c.bf16 %v6987_v45, %v6971_v9  ;;  %v7015_v45 = vld [vmem:[%s11997_s13 + $0x838] sm:$0xff] }
0x1ecc   :  { %v5071_v40 = vmul.f32 %v8953_v47, %v5051_v11  ;;  %6992 = vmatmul.mubr.msk.f32.vlgmr.msra.gmra.mrb[66].mxu0 %vm70_vm0, %v10899_v16  ;;  %6994 = vmatmul.mubr.msk.f32.vlgmr.msra.gmra.mrb[70].mxu1 %vm70_vm0, %v10899_v16  ;;  %v6986_v11 = vld [vmem:[%s11995_s11 + $0x3e0] sm:$0xff]  ;;  %v8580_v47 = vpack.c.bf16 %v6989_v36, %v6973_v0 }
0x1ecd   :  { %8539 = vmatpush1.bf16.msra.mxu0 %v8538_v13  ;;  %8547 = vmatpush1.bf16.msra.mxu1 %v8546_v35  ;;  %v8570_v13 = vpack.c.bf16 %v6954_v32, %v6938_v30  ;;  %v8578_v35 = vpack.c.bf16 %v6956_v1, %v6940_v59  ;;  %v8574_v41 = vpack.c.bf16 %v6986_v11, %v6970_v25  ;;  %v7045_v30 = vld [vmem:[%s11997_s13 + $0x928] sm:$0xff]  ;;  %v7030_v32 = vld [vmem:[%s11997_s13 + $0x8b0] sm:$0xff]  ;;  %v7031_v59 = vld [vmem:[%s11997_s13 + $0x8b8] sm:$0xff] }
0x1ece   :  { %5306 = vmatprep.mubr.f32.mxu0 %v8986_v51  ;;  %5383 = vmatprep.mubr.f32.mxu1 %v8986_v51  ;;  %v10931_v7 = vadd.f32 %v6925_v2, %v5071_v40  ;;  %v8568_v2 = vpack.c.bf16 %v6955_v54, %v6939_v31  ;;  %v7057_v40 = vld [vmem:[%s11997_s13 + $0x988] sm:$0xff]  ;;  %v7062_v1 = vld [vmem:[%s11997_s13 + $0x9b0] sm:$0xff]  ;;  %v8596_v0 = vpack.c.bf16 %v7031_v59, %v7030_v32  ;;  %v7032_v25 = vld [vmem:[%s11997_s13 + $0x8c0] sm:$0xff] }
0x1ecf   :  { %8541 = vmatprep.subr.bf16.mxu0 %v8540_v6  ;;  %8549 = vmatprep.subr.bf16.mxu1 %v8548_v39  ;;  %v7024_v6 = vld [vmem:[%s11997_s13 + $0x880] sm:$0xff]  ;;  %v7025_v39 = vld [vmem:[%s11997_s13 + $0x888] sm:$0xff]  ;;  %v8616_v50 = vpack.c.bf16 %v7057_v40, %v7056_v63  ;;  %v8632_v40 = vpack.c.bf16 %v7065_v17, %v7064_v14  ;;  %v7071_v32 = vld [vmem:[%s11997_s13 + $0x9f8] sm:$0xff] }
0x1ed0   :  { %6993 = vmatmul.mubr.msk.f32.gmra.mrb[68].mxu0 %vm70_vm0, %v10931_v7  ;;  %6995 = vmatmul.mubr.msk.f32.gmra.mrb[72].mxu1 %vm70_vm0, %v10931_v7  ;;  %v7061_v31 = vld [vmem:[%s11997_s13 + $0x9a8] sm:$0xff]  ;;  %v7022_v59 = vld [vmem:[%s11997_s13 + $0x870] sm:$0xff] }
0x1ed1   :  { %8543 = vmatpush1.bf16.msra.mxu0 %v8542_v46  ;;  %8551 = vmatpush1.bf16.msra.mxu1 %v8550_v48  ;;  %v7009_v46 = vld [vmem:[%s11997_s13 + $0x808] sm:$0xff]  ;;  %v8584_v48 = vpack.c.bf16 %v7025_v39, %v7024_v6  ;;  %v7016_v6 = vld [vmem:[%s11997_s13 + $0x840] sm:$0xff]  ;;  %v11261_v14 = vld [vmem:[%s12029_s21 + $0x10] sm:$0xff] }
0x1ed2   :  { %5454 = vmatprep.mubr.f32.mxu0 %v8986_v51  ;;  %5531 = vmatprep.mubr.f32.mxu1 %v8986_v51  ;;  %v8586_v43 = vpack.c.bf16 %v7009_v46, %v7008_v42  ;;  %v7033_v11 = vld [vmem:[%s11997_s13 + $0x8c8] sm:$0xff]  ;;  %v7034_v42 = vld [vmem:[%s11997_s13 + $0x8d0] sm:$0xff]  ;;  %v7035_v46 = vld [vmem:[%s11997_s13 + $0x8d8] sm:$0xff]  ;;  %v5153_v17 = vrot.slane %v11261_v14, %v9826_v53 }
0x1ed3   :  { %8553 = vmatprep.subr.bf16.mxu0 %v8552_v57  ;;  %8561 = vmatprep.subr.bf16.mxu1 %v8560_v22  ;;  %v7027_v57 = vld [vmem:[%s11997_s13 + $0x898] sm:$0xff]  ;;  %v7058_v22 = vld [vmem:[%s11997_s13 + $0x990] sm:$0xff]  ;;  %v7017_v39 = vld [vmem:[%s11997_s13 + $0x848] sm:$0xff]  ;;  %v8600_v63 = vpack.c.bf16 %v7033_v11, %v7032_v25 }
0x1ed4   :  { %6996 = vmatmul.mubr.msk.f32.vlgmr.msra.gmra.mrb[70].mxu0 %vm70_vm0, %v10899_v16  ;;  %6998 = vmatmul.mubr.msk.f32.vlgmr.msra.gmra.mrb[74].mxu1 %vm70_vm0, %v10899_v16  ;;  %v8620_v8 = vpack.c.bf16 %v7059_v33, %v7058_v22  ;;  %v8602_v60 = vpack.c.bf16 %v7017_v39, %v7016_v6  ;;  %v8604_v22 = vpack.c.bf16 %v7035_v46, %v7034_v42  ;;  %v7121_v25 = vld [vmem:[%s11997_s13 + $0xb88] sm:$0xff]  ;;  %v7072_v39 = vld [vmem:[%s11997_s13 + $0xa00] sm:$0xff]  ;;  %v7090_v46 = vld [vmem:[%s11997_s13 + $0xa90] sm:$0xff] }
0x1ed5   :  { %8555 = vmatpush1.bf16.msra.mxu0 %v8554_v37  ;;  %8563 = vmatpush1.bf16.msra.mxu1 %v8562_v24  ;;  %v7011_v37 = vld [vmem:[%s11997_s13 + $0x818] sm:$0xff]  ;;  %v8588_v24 = vpack.c.bf16 %v7027_v57, %v7026_v15  ;;  %v7018_v15 = vld [vmem:[%s11997_s13 + $0x850] sm:$0xff]  ;;  %v5165_v6 = vrot.slane %v11261_v14, %v9840_v5  ;;  %v7105_v42 = vld [vmem:[%s11997_s13 + $0xb08] sm:$0xff] }
0x1ed6   :  { %5460 = vmatprep.mubr.f32.mxu0 %v8986_v51  ;;  %5537 = vmatprep.mubr.f32.mxu1 %v8986_v51  ;;  %v8590_v54 = vpack.c.bf16 %v7011_v37, %v7010_v27  ;;  %v7019_v57 = vld [vmem:[%s11997_s13 + $0x858] sm:$0xff]  ;;  %v7036_v27 = vld [vmem:[%s11997_s13 + $0x8e0] sm:$0xff]  ;;  %v7037_v37 = vld [vmem:[%s11997_s13 + $0x8e8] sm:$0xff] }
0x1ed7   :  { %8557 = vmatprep.subr.bf16.mxu0 %v8556_v21  ;;  %8565 = vmatprep.subr.bf16.mxu1 %v8564_v44  ;;  %v7029_v21 = vld [vmem:[%s11997_s13 + $0x8a8] sm:$0xff]  ;;  %v7060_v44 = vld [vmem:[%s11997_s13 + $0x9a0] sm:$0xff] }
0x1ed8   :  { %6997 = vmatmul.mubr.msk.f32.gmra.mrb[72].mxu0 %vm70_vm0, %v10931_v7  ;;  %6999 = vmatmul.mubr.msk.f32.gmra.mrb[76].mxu1 %vm70_vm0, %v10931_v7 }
0x1ed9   :  { %8559 = vmatpush1.bf16.msra.mxu0 %v8558_v62  ;;  %8567 = vmatpush1.bf16.msra.mxu1 %v8566_v56  ;;  %v8592_v62 = vpack.c.bf16 %v7029_v21, %v7028_v28  ;;  %v8624_v56 = vpack.c.bf16 %v7061_v31, %v7060_v44  ;;  %v7020_v28 = vld [vmem:[%s11997_s13 + $0x860] sm:$0xff]  ;;  %v8608_v21 = vpack.c.bf16 %v7037_v37, %v7036_v27  ;;  %v7021_v31 = vld [vmem:[%s11997_s13 + $0x868] sm:$0xff] }
0x1eda   :  { %5608 = vmatprep.mubr.f32.mxu0 %v8986_v51  ;;  %5685 = vmatprep.mubr.f32.mxu1 %v8986_v51  ;;  %v11297_v37 = vrot.slane %v11261_v14, %v9857_v3 }
0x1edb   :  { %8569 = vmatprep.subr.bf16.mxu0 %v8568_v2  ;;  %8577 = vmatprep.subr.bf16.mxu1 %v8576_v10  ;;  %v7063_v2 = vld [vmem:[%s11997_s13 + $0x9b8] sm:$0xff]  ;;  %v8594_v10 = vpack.c.bf16 %v7013_v29, %v7012_v4  ;;  %v8610_v4 = vpack.c.bf16 %v7021_v31, %v7020_v28 }
0x1edc   :  { %7000 = vmatmul.mubr.msk.f32.vlgmr.msra.gmra.mrb[74].mxu0 %vm70_vm0, %v10899_v16  ;;  %7002 = vmatmul.mubr.msk.f32.vlgmr.msra.gmra.mrb[78].mxu1 %vm70_vm0, %v10899_v16  ;;  %v8628_v36 = vpack.c.bf16 %v7063_v2, %v7062_v1  ;;  %v7023_v1 = vld [vmem:[%s11997_s13 + $0x878] sm:$0xff] }
0x1edd   :  { %8571 = vmatpush1.bf16.msra.mxu0 %v8570_v13  ;;  %8579 = vmatpush1.bf16.msra.mxu1 %v8578_v35  ;;  %v7046_v13 = vld [vmem:[%s11997_s13 + $0x930] sm:$0xff]  ;;  %v7047_v35 = vld [vmem:[%s11997_s13 + $0x938] sm:$0xff] }
0x1ede   :  { %5614 = vmatprep.mubr.f32.mxu0 %v8986_v51  ;;  %5691 = vmatprep.mubr.f32.mxu1 %v8986_v51  ;;  %v7075_v31 = vld [vmem:[%s11997_s13 + $0xa18] sm:$0xff] }
0x1edf   :  { %8573 = vmatprep.subr.bf16.mxu0 %v8572_v61  ;;  %8581 = vmatprep.subr.bf16.mxu1 %v8580_v47  ;;  %v8630_v47 = vpack.c.bf16 %v7047_v35, %v7046_v13  ;;  %v7120_v13 = vld [vmem:[%s11997_s13 + $0xb80] sm:$0xff] }
0x1ee0   :  { %7001 = vmatmul.mubr.msk.f32.gmra.mrb[76].mxu0 %vm70_vm0, %v10931_v7  ;;  %7003 = vmatmul.mubr.msk.f32.gmra.mrb[80].mxu1 %vm70_vm0, %v10931_v7  ;;  %v8680_v11 = vpack.c.bf16 %v7121_v25, %v7120_v13 }
0x1ee1   :  { %8575 = vmatpush1.bf16.msra.mxu0 %v8574_v41  ;;  %8583 = vmatpush1.bf16.msra.mxu1 %v8582_v52  ;;  %v7048_v41 = vld [vmem:[%s11997_s13 + $0x940] sm:$0xff]  ;;  %v7049_v52 = vld [vmem:[%s11997_s13 + $0x948] sm:$0xff] }
0x1ee2   :  { %5762 = vmatprep.mubr.f32.mxu0 %v8986_v51  ;;  %5839 = vmatprep.mubr.f32.mxu1 %v8986_v51  ;;  %v8634_v12 = vpack.c.bf16 %v7049_v52, %v7048_v41  ;;  %v7104_v52 = vld [vmem:[%s11997_s13 + $0xb00] sm:$0xff] }
0x1ee3   :  { %8585 = vmatprep.subr.bf16.mxu0 %v8584_v48  ;;  %8617 = vmatprep.subr.bf16.mxu1 %v8616_v50  ;;  %v7066_v48 = vld [vmem:[%s11997_s13 + $0x9d0] sm:$0xff]  ;;  %v7067_v50 = vld [vmem:[%s11997_s13 + $0x9d8] sm:$0xff]  ;;  %v8682_v27 = vpack.c.bf16 %v7105_v42, %v7104_v52  ;;  %v7109_v52 = vld [vmem:[%s11997_s13 + $0xb28] sm:$0xff] }
0x1ee4   :  { %7004 = vmatmul.mubr.msk.f32.vlgmr.msra.gmra.mrb[78].mxu0 %vm70_vm0, %v10899_v16  ;;  %7006 = vmatmul.mubr.msk.f32.vlgmr.msra.gmra.mrb[82].mxu1 %vm70_vm0, %v10899_v16  ;;  %v8622_v16 = vpack.c.bf16 %v7043_v38, %v7042_v49  ;;  %v8636_v33 = vpack.c.bf16 %v7067_v50, %v7066_v48  ;;  %v8606_v49 = vpack.c.bf16 %v7019_v57, %v7018_v15  ;;  %v7091_v15 = vld [vmem:[%s11997_s13 + $0xa98] sm:$0xff]  ;;  %v7122_v57 = vld [vmem:[%s11997_s13 + $0xb90] sm:$0xff] }
0x1ee5   :  { %5768 = vmatprep.mubr.f32.mxu0 %v8986_v51  ;;  %5845 = vmatprep.mubr.f32.mxu1 %v8986_v51  ;;  %v7044_v51 = vld [vmem:[%s11997_s13 + $0x920] sm:$0xff]  ;;  %v7094_v42 = vld [vmem:[%s11997_s13 + $0xab0] sm:$0xff] }
0x1ee6   :  { %8587 = vmatpush3.bf16.msra.mxu0 %v8586_v43  ;;  %8619 = vmatpush3.bf16.msra.mxu1 %v8618_v26  ;;  %v8626_v9 = vpack.c.bf16 %v7045_v30, %v7044_v51  ;;  %v7050_v43 = vld [vmem:[%s11997_s13 + $0x950] sm:$0xff]  ;;  %v7051_v26 = vld [vmem:[%s11997_s13 + $0x958] sm:$0xff] }
0x1ee7   :  { %8589 = vmatprep.subr.bf16.mxu0 %v8588_v24  ;;  %8621 = vmatprep.subr.bf16.mxu1 %v8620_v8  ;;  %v7068_v24 = vld [vmem:[%s11997_s13 + $0x9e0] sm:$0xff]  ;;  %v7069_v8 = vld [vmem:[%s11997_s13 + $0x9e8] sm:$0xff]  ;;  %v8638_v38 = vpack.c.bf16 %v7051_v26, %v7050_v43  ;;  %v7070_v51 = vld [vmem:[%s11997_s13 + $0x9f0] sm:$0xff] }
0x1ee8   :  { %7005 = vmatmul.mubr.msk.f32.gmra.mrb[80].mxu0 %vm70_vm0, %v10931_v7  ;;  %7007 = vmatmul.mubr.msk.f32.gmra.mrb[84].mxu1 %vm70_vm0, %v10931_v7  ;;  %v7014_v7 = vld [vmem:[%s11997_s13 + $0x830] sm:$0xff]  ;;  %v8640_v44 = vpack.c.bf16 %v7069_v8, %v7068_v24  ;;  %v8644_v2 = vpack.c.bf16 %v7071_v32, %v7070_v51  ;;  %v7092_v32 = vld [vmem:[%s11997_s13 + $0xaa0] sm:$0xff] }
0x1ee9   :  { %v8598_v61 = vpack.c.bf16 %v7015_v45, %v7014_v7  ;;  %v7055_v7 = vld [vmem:[%s11997_s13 + $0x978] sm:$0xff]  ;;  %v7074_v24 = vld [vmem:[%s11997_s13 + $0xa10] sm:$0xff] }
0x1eea   :  { %8591 = vmatpush3.bf16.msra.mxu0 %v8590_v54  ;;  %8623 = vmatpush3.bf16.msra.mxu1 %v8622_v16  ;;  %v7052_v54 = vld [vmem:[%s11997_s13 + $0x960] sm:$0xff]  ;;  %v7053_v16 = vld [vmem:[%s11997_s13 + $0x968] sm:$0xff]  ;;  %v8654_v25 = vpack.c.bf16 %v7075_v31, %v7074_v24  ;;  %v7079_v24 = vld [vmem:[%s11997_s13 + $0xa38] sm:$0xff] }
0x1eeb   :  { %8593 = vmatprep.subr.bf16.mxu0 %v8592_v62  ;;  %8625 = vmatprep.subr.bf16.mxu1 %v8624_v56  ;;  %v8642_v29 = vpack.c.bf16 %v7053_v16, %v7052_v54  ;;  %v7038_v62 = vld [vmem:[%s11997_s13 + $0x8f0] sm:$0xff]  ;;  %v7039_v56 = vld [vmem:[%s11997_s13 + $0x8f8] sm:$0xff]  ;;  %v7096_v31 = vld [vmem:[%s11997_s13 + $0xac0] sm:$0xff] }
0x1eec   :  { %v8612_v30 = vpack.c.bf16 %v7039_v56, %v7038_v62  ;;  %v7106_v54 = vld [vmem:[%s11997_s13 + $0xb10] sm:$0xff] }
0x1eee   :  { %8595 = vmatpush3.bf16.msra.mxu0 %v8594_v10  ;;  %8627 = vmatpush3.bf16.msra.mxu1 %v8626_v9  ;;  %v8614_v10 = vpack.c.bf16 %v7023_v1, %v7022_v59  ;;  %v7054_v9 = vld [vmem:[%s11997_s13 + $0x970] sm:$0xff] }
0x1eef   :  { %8597 = vmatprep.subr.bf16.mxu0 %v8596_v0  ;;  %8629 = vmatprep.subr.bf16.mxu1 %v8628_v36  ;;  %v8646_v45 = vpack.c.bf16 %v7055_v7, %v7054_v9  ;;  %v7088_v0 = vld [vmem:[%s11997_s13 + $0xa80] sm:$0xff]  ;;  %v7089_v36 = vld [vmem:[%s11997_s13 + $0xa88] sm:$0xff] }
0x1ef0   :  { %v8648_v35 = vpack.c.bf16 %v7089_v36, %v7088_v0  ;;  %v7124_v9 = vld [vmem:[%s11997_s13 + $0xba0] sm:$0xff]  ;;  %v7125_v7 = vld [vmem:[%s11997_s13 + $0xba8] sm:$0xff] }
0x1ef2   :  { %8599 = vmatpush3.bf16.msra.mxu0 %v8598_v61  ;;  %8631 = vmatpush3.bf16.msra.mxu1 %v8630_v47  ;;  %v5161_v61 = vrot.slane %v11261_v14, %v9829_v55  ;;  %v5157_v47 = vrot.slane %v11261_v14, %v9837_v58 }
0x1ef3   :  { %8601 = vmatprep.subr.bf16.mxu0 %v8600_v63  ;;  %8633 = vmatprep.subr.bf16.mxu1 %v8632_v40  ;;  %v7073_v63 = vld [vmem:[%s11997_s13 + $0xa08] sm:$0xff] }
0x1ef4   :  { %v8650_v26 = vpack.c.bf16 %v7073_v63, %v7072_v39 }
0x1ef6   :  { %8603 = vmatpush3.bf16.msra.mxu0 %v8602_v60  ;;  %8635 = vmatpush3.bf16.msra.mxu1 %v8634_v12 }
0x1ef7   :  { %8605 = vmatprep.subr.bf16.mxu0 %v8604_v22  ;;  %8637 = vmatprep.subr.bf16.mxu1 %v8636_v33  ;;  %v7123_v22 = vld [vmem:[%s11997_s13 + $0xb98] sm:$0xff] }
0x1efa   :  { %8607 = vmatpush3.bf16.msra.mxu0 %v8606_v49  ;;  %8639 = vmatpush3.bf16.msra.mxu1 %v8638_v38 }
0x1efb   :  { %8609 = vmatprep.subr.bf16.mxu0 %v8608_v21  ;;  %8641 = vmatprep.subr.bf16.mxu1 %v8640_v44  ;;  %v8652_v21 = vpack.c.bf16 %v7091_v15, %v7090_v46  ;;  %v8684_v44 = vpack.c.bf16 %v7123_v22, %v7122_v57 }
0x1efe   :  { %8611 = vmatpush3.bf16.msra.mxu0 %v8610_v4  ;;  %8643 = vmatpush3.bf16.msra.mxu1 %v8642_v29 }
0x1eff   :  { %8613 = vmatprep.subr.bf16.mxu0 %v8612_v30  ;;  %8645 = vmatprep.subr.bf16.mxu1 %v8644_v2  ;;  %v7107_v30 = vld [vmem:[%s11997_s13 + $0xb18] sm:$0xff]  ;;  %v11316_v2 = vrot.slane %v11261_v14, %v9878_v19 }
0x1f02   :  { %8615 = vmatpush3.bf16.msra.mxu0 %v8614_v10  ;;  %8647 = vmatpush3.bf16.msra.mxu1 %v8646_v45  ;;  %v7093_v10 = vld [vmem:[%s11997_s13 + $0xaa8] sm:$0xff]  ;;  %v7076_v45 = vld [vmem:[%s11997_s13 + $0xa20] sm:$0xff] }
0x1f03   :  { %8649 = vmatprep.subr.bf16.mxu0 %v8648_v35  ;;  %8681 = vmatprep.subr.bf16.mxu1 %v8680_v11  ;;  %v8686_v11 = vpack.c.bf16 %v7107_v30, %v7106_v54  ;;  %v7097_v54 = vld [vmem:[%s11997_s13 + $0xac8] sm:$0xff]  ;;  %v7080_v30 = vld [vmem:[%s11997_s13 + $0xa40] sm:$0xff] }
0x1f9f   :  { %v5302_v40 = vpop.f32.mrb[66].mxu0  ;;  %v5379_v41 = vpop.f32.mrb[70].mxu1 }
0x1fa0   :  { %v5303_v48 = vadd.f32 %v5302_v40, %v5153_v17  ;;  %v5380_v50 = vadd.f32 %v5379_v41, %v5161_v61  ;;  %v5304_v60 = vpop.f32.mrb[67].mxu0  ;;  %v5381_v12 = vpop.f32.mrb[71].mxu1  ;;  %v8656_v40 = vpack.c.bf16 %v7093_v10, %v7092_v32  ;;  %v8688_v41 = vpack.c.bf16 %v7125_v7, %v7124_v9  ;;  %v7081_v32 = vld [vmem:[%s11997_s13 + $0xa48] sm:$0xff]  ;;  %v7112_v7 = vld [vmem:[%s11997_s13 + $0xb40] sm:$0xff] }
0x1fa1   :  { %v5305_v33 = vadd.f32 %v5304_v60, %v5157_v47  ;;  %v5382_v43 = vadd.f32 %v5381_v12, %v5165_v6  ;;  %v7126_v60 = vld [vmem:[%s11997_s13 + $0xbb0] sm:$0xff]  ;;  %v7127_v12 = vld [vmem:[%s11997_s13 + $0xbb8] sm:$0xff]  ;;  %v8664_v10 = vpack.c.bf16 %v7097_v54, %v7096_v31  ;;  %v7116_v54 = vld [vmem:[%s11997_s13 + $0xb60] sm:$0xff] }
0x1fa2   :  { %v5852_v16 = vmax.f32 %v5303_v48, 0.0  ;;  %v5854_v4 = vmax.f32 %v5380_v50, 0.0  ;;  %v7095_v50 = vld [vmem:[%s11997_s13 + $0xab8] sm:$0xff] }
0x1fa3   :  { %v5853_v8 = vmax.f32 %v5305_v33, 0.0  ;;  %v5855_v49 = vmax.f32 %v5382_v43, 0.0  ;;  %v5308_v38 = vpop.f32.mrb[68].mxu0  ;;  %v5385_v28 = vpop.f32.mrb[72].mxu1 }
0x1fa4   :  { %v5309_v29 = vadd.f32 %v5308_v38, %v5153_v17  ;;  %v5386_v62 = vadd.f32 %v5385_v28, %v5161_v61  ;;  %v5310_v56 = vpop.f32.mrb[69].mxu0  ;;  %v5387_v51 = vpop.f32.mrb[73].mxu1  ;;  %v7077_v17 = vld [vmem:[%s11997_s13 + $0xa28] sm:$0xff]  ;;  %v7108_v61 = vld [vmem:[%s11997_s13 + $0xb20] sm:$0xff]  ;;  %v8660_v38 = vpack.c.bf16 %v7095_v50, %v7094_v42  ;;  %v8692_v28 = vpack.c.bf16 %v7127_v12, %v7126_v60 }
0x1fa5   :  { %v5311_v59 = vadd.f32 %v5310_v56, %v5157_v47  ;;  %v5388_v1 = vadd.f32 %v5387_v51, %v5165_v6  ;;  %6213 = vmatprep.mubr.f32.mxu0 %v5853_v8  ;;  %6288 = vmatprep.mubr.f32.mxu1 %v5855_v49  ;;  %v8658_v43 = vpack.c.bf16 %v7077_v17, %v7076_v45  ;;  %v7113_v45 = vld [vmem:[%s11997_s13 + $0xb48] sm:$0xff]  ;;  %v7100_v50 = vld [vmem:[%s11997_s13 + $0xae0] sm:$0xff] }
0x1fa6   :  { %6214 = vmatmul.mubr.f32.vlgmr.msra.gmra.mrb[82].mxu0 %v5852_v16  ;;  %6289 = vmatmul.mubr.f32.vlgmr.msra.gmra.mrb[86].mxu1 %v5854_v4  ;;  %v5868_v47 = vmax.f32 %v5309_v29, 0.0  ;;  %v5870_v6 = vmax.f32 %v5386_v62, 0.0  ;;  %v7128_v16 = vld [vmem:[%s11997_s13 + $0xbc0] sm:$0xff]  ;;  %v7129_v4 = vld [vmem:[%s11997_s13 + $0xbc8] sm:$0xff] }
0x1fa7   :  { %v5869_v0 = vmax.f32 %v5311_v59, 0.0  ;;  %v5871_v36 = vmax.f32 %v5388_v1, 0.0  ;;  %8651 = vmatpush3.bf16.msra.mxu0 %v8650_v26  ;;  %8683 = vmatpush3.bf16.msra.mxu1 %v8682_v27  ;;  %v11330_v13 = vpop.f32.mrb[70].mxu0  ;;  %v11332_v35 = vpop.f32.mrb[74].mxu1  ;;  %v8690_v26 = vpack.c.bf16 %v7109_v52, %v7108_v61  ;;  %v7078_v27 = vld [vmem:[%s11997_s13 + $0xa30] sm:$0xff]  ;;  %v8696_v9 = vpack.c.bf16 %v7129_v4, %v7128_v16  ;;  %v7101_v60 = vld [vmem:[%s11997_s13 + $0xae8] sm:$0xff] }
0x1fa8   :  { %v5458_v39 = vpop.f32.mrb[71].mxu0  ;;  %v5535_v63 = vpop.f32.mrb[75].mxu1  ;;  %8653 = vmatprep.subr.bf16.mxu0 %v8652_v21  ;;  %8685 = vmatprep.subr.bf16.mxu1 %v8684_v44  ;;  %v7110_v21 = vld [vmem:[%s11997_s13 + $0xb30] sm:$0xff]  ;;  %v7111_v44 = vld [vmem:[%s11997_s13 + $0xb38] sm:$0xff]  ;;  %v8662_v56 = vpack.c.bf16 %v7079_v24, %v7078_v27  ;;  %v7132_v12 = vld [vmem:[%s11997_s13 + $0xbe0] sm:$0xff] }
0x1fa9   :  { %v5459_v46 = vadd.f32 %v5458_v39, %v11297_v37  ;;  %v5536_v48 = vadd.f32 %v5535_v63, %v11316_v2  ;;  %6218 = vmatprep.mubr.f32.mxu0 %v5869_v0  ;;  %6293 = vmatprep.mubr.f32.mxu1 %v5871_v36  ;;  %v8694_v51 = vpack.c.bf16 %v7111_v44, %v7110_v21  ;;  %v7098_v0 = vld [vmem:[%s11997_s13 + $0xad0] sm:$0xff]  ;;  %v7099_v36 = vld [vmem:[%s11997_s13 + $0xad8] sm:$0xff]  ;;  %v7084_v24 = vld [vmem:[%s11997_s13 + $0xa60] sm:$0xff] }
0x1faa   :  { %6219 = vmatmul.mubr.f32.gmra.mrb[84].mxu0 %v5868_v47  ;;  %6294 = vmatmul.mubr.f32.gmra.mrb[88].mxu1 %v5870_v6  ;;  %v8666_v47 = vpack.c.bf16 %v7081_v32, %v7080_v30  ;;  %v8698_v6 = vpack.c.bf16 %v7113_v45, %v7112_v7  ;;  %v7082_v39 = vld [vmem:[%s11997_s13 + $0xa50] sm:$0xff]  ;;  %v7083_v63 = vld [vmem:[%s11997_s13 + $0xa58] sm:$0xff]  ;;  %v8668_v52 = vpack.c.bf16 %v7099_v36, %v7098_v0  ;;  %v7117_v16 = vld [vmem:[%s11997_s13 + $0xb68] sm:$0xff] }
0x1fab   :  { %v5857_v15 = vmax.f32 %v5459_v46, 0.0  ;;  %v5859_v57 = vmax.f32 %v5536_v48, 0.0  ;;  %8655 = vmatpush3.bf16.msra.mxu0 %v8654_v25  ;;  %8687 = vmatpush3.bf16.msra.mxu1 %v8686_v11  ;;  %v11357_v22 = vpop.f32.mrb[72].mxu0  ;;  %v11359_v33 = vpop.f32.mrb[76].mxu1  ;;  %v7130_v25 = vld [vmem:[%s11997_s13 + $0xbd0] sm:$0xff]  ;;  %v7131_v11 = vld [vmem:[%s11997_s13 + $0xbd8] sm:$0xff]  ;;  %v8672_v44 = vpack.c.bf16 %v7101_v60, %v7100_v50  ;;  %v5169_v32 = vrot.slane %v11261_v14, %v10039_v23 }
0x1fac   :  { %v11367_v8 = vpop.f32.mrb[73].mxu0  ;;  %v11369_v49 = vpop.f32.mrb[77].mxu1  ;;  %8657 = vmatprep.subr.bf16.mxu0 %v8656_v40  ;;  %8689 = vmatprep.subr.bf16.mxu1 %v8688_v41  ;;  %v8700_v42 = vpack.c.bf16 %v7131_v11, %v7130_v25  ;;  %v7114_v46 = vld [vmem:[%s11997_s13 + $0xb50] sm:$0xff]  ;;  %v7115_v48 = vld [vmem:[%s11997_s13 + $0xb58] sm:$0xff]  ;;  %v8706_v45 = vpack.c.bf16 %v7117_v16, %v7116_v54  ;;  %v5177_v11 = vrot.slane %v11261_v14, %v10052_v34  ;;  %v7153_v14 = vld [vmem:[%s11997_s13 + $0xc88] sm:$0xff] }
0x1fad   :  { %6363 = vmatprep.mubr.f32.mxu0 %v5857_v15  ;;  %6438 = vmatprep.mubr.f32.mxu1 %v5859_v57  ;;  %v7133_v15 = vld [vmem:[%s11997_s13 + $0xbe8] sm:$0xff]  ;;  %v8702_v27 = vpack.c.bf16 %v7115_v48, %v7114_v46  ;;  %v7102_v4 = vld [vmem:[%s11997_s13 + $0xaf0] sm:$0xff]  ;;  %v7135_v30 = vld [vmem:[%s11997_s13 + $0xbf8] sm:$0xff] }
0x1fae   :  { %v8704_v31 = vpack.c.bf16 %v7133_v15, %v7132_v12  ;;  %v7086_v0 = vld [vmem:[%s11997_s13 + $0xa70] sm:$0xff]  ;;  %v7087_v36 = vld [vmem:[%s11997_s13 + $0xa78] sm:$0xff]  ;;  %v7184_v46 = vld [vmem:[%s11997_s13 + $0xd80] sm:$0xff]  ;;  %v5534_v54 = vadd.f32 %v11332_v35, %v5177_v11  ;;  %v5542_v35 = vadd.f32 %v11369_v49, %v11316_v2  ;;  %v5540_v2 = vadd.f32 %v11359_v33, %v5177_v11 }
0x1faf   :  { %8659 = vmatpush3.bf16.msra.mxu0 %v8658_v43  ;;  %8691 = vmatpush3.bf16.msra.mxu1 %v8690_v26  ;;  %v11389_v29 = vpop.f32.mrb[74].mxu0  ;;  %v11391_v62 = vpop.f32.mrb[78].mxu1  ;;  %v8670_v26 = vpack.c.bf16 %v7083_v63, %v7082_v39  ;;  %v7118_v25 = vld [vmem:[%s11997_s13 + $0xb70] sm:$0xff]  ;;  %v7185_v48 = vld [vmem:[%s11997_s13 + $0xd88] sm:$0xff]  ;;  %v11524_v50 = vld [vmem:[%s12029_s21 + $0x18] sm:$0xff]  ;;  %v8678_v15 = vpack.c.bf16 %v7087_v36, %v7086_v0 }
0x1fb0   :  { %v11399_v59 = vpop.f32.mrb[75].mxu0  ;;  %v11401_v1 = vpop.f32.mrb[79].mxu1  ;;  %8661 = vmatprep.subr.bf16.mxu0 %v8660_v38  ;;  %8693 = vmatprep.subr.bf16.mxu1 %v8692_v28  ;;  %v7085_v38 = vld [vmem:[%s11997_s13 + $0xa68] sm:$0xff]  ;;  %v7136_v60 = vld [vmem:[%s11997_s13 + $0xc00] sm:$0xff]  ;;  %v8744_v16 = vpack.c.bf16 %v7185_v48, %v7184_v46  ;;  %v5875_v49 = vmax.f32 %v5542_v35, 0.0  ;;  %v7170_v33 = vld [vmem:[%s11997_s13 + $0xd10] sm:$0xff] }
0x1fb1   :  { %v8674_v7 = vpack.c.bf16 %v7085_v38, %v7084_v24  ;;  %v7137_v12 = vld [vmem:[%s11997_s13 + $0xc08] sm:$0xff]  ;;  %v7168_v24 = vld [vmem:[%s11997_s13 + $0xd00] sm:$0xff]  ;;  %v5874_v46 = vmax.f32 %v5540_v2, 0.0  ;;  %v7142_v35 = vld [vmem:[%s11997_s13 + $0xc30] sm:$0xff] }
0x1fb2   :  { %v7169_v38 = vld [vmem:[%s11997_s13 + $0xd08] sm:$0xff]  ;;  %v7156_v11 = vld [vmem:[%s11997_s13 + $0xca0] sm:$0xff] }
0x1fb3   :  { %8663 = vmatpush3.bf16.msra.mxu0 %v8662_v56  ;;  %8695 = vmatpush3.bf16.msra.mxu1 %v8694_v51  ;;  %v11421_v17 = vpop.f32.mrb[76].mxu0  ;;  %v11423_v61 = vpop.f32.mrb[80].mxu1  ;;  %v7103_v56 = vld [vmem:[%s11997_s13 + $0xaf8] sm:$0xff]  ;;  %v7134_v51 = vld [vmem:[%s11997_s13 + $0xbf0] sm:$0xff]  ;;  %v8746_v0 = vpack.c.bf16 %v7169_v38, %v7168_v24  ;;  %v7192_v2 = vld [vmem:[%s11997_s13 + $0xdc0] sm:$0xff] }
0x1fb4   :  { %v11431_v40 = vpop.f32.mrb[77].mxu0  ;;  %v11433_v41 = vpop.f32.mrb[81].mxu1  ;;  %8665 = vmatprep.subr.bf16.mxu0 %v8664_v10  ;;  %8697 = vmatprep.subr.bf16.mxu1 %v8696_v9  ;;  %v8676_v39 = vpack.c.bf16 %v7103_v56, %v7102_v4  ;;  %v8708_v63 = vpack.c.bf16 %v7135_v30, %v7134_v51  ;;  %v7155_v4 = vld [vmem:[%s11997_s13 + $0xc98] sm:$0xff]  ;;  %v7186_v56 = vld [vmem:[%s11997_s13 + $0xd90] sm:$0xff]  ;;  %v11558_v30 = vrot.slane %v11524_v50, %v9837_v58 }
0x1fb5   :  { %v7187_v51 = vld [vmem:[%s11997_s13 + $0xd98] sm:$0xff]  ;;  %v7138_v58 = vld [vmem:[%s11997_s13 + $0xc10] sm:$0xff] }
0x1fb7   :  { %8667 = vmatpush3.bf16.msra.mxu0 %v8666_v47  ;;  %8699 = vmatpush3.bf16.msra.mxu1 %v8698_v6  ;;  %v11453_v57 = vpop.f32.mrb[78].mxu0  ;;  %v11455_v43 = vpop.f32.mrb[82].mxu1 }
0x1fb8   :  { %v11463_v28 = vpop.f32.mrb[79].mxu0  ;;  %v11465_v21 = vpop.f32.mrb[83].mxu1  ;;  %8669 = vmatprep.subr.bf16.mxu0 %v8668_v52  ;;  %8701 = vmatprep.subr.bf16.mxu1 %v8700_v42  ;;  %v7119_v52 = vld [vmem:[%s11997_s13 + $0xb78] sm:$0xff]  ;;  %v7152_v42 = vld [vmem:[%s11997_s13 + $0xc80] sm:$0xff] }
0x1fbb   :  { %8671 = vmatpush3.bf16.msra.mxu0 %v8670_v26  ;;  %8703 = vmatpush3.bf16.msra.mxu1 %v8702_v27  ;;  %v11487_v10 = vpop.f32.mrb[80].mxu0  ;;  %v11489_v9 = vpop.f32.mrb[84].mxu1  ;;  %v8710_v26 = vpack.c.bf16 %v7119_v52, %v7118_v25  ;;  %v8712_v27 = vpack.c.bf16 %v7153_v14, %v7152_v42  ;;  %v8748_v25 = vpack.c.bf16 %v7187_v51, %v7186_v56  ;;  %v7189_v42 = vld [vmem:[%s11997_s13 + $0xda8] sm:$0xff]  ;;  %v7191_v56 = vld [vmem:[%s11997_s13 + $0xdb8] sm:$0xff] }
0x1fbc   :  { %v11502_v47 = vpop.f32.mrb[81].mxu0  ;;  %v11504_v6 = vpop.f32.mrb[85].mxu1  ;;  %8673 = vmatprep.subr.bf16.mxu0 %v8672_v44  ;;  %8705 = vmatprep.subr.bf16.mxu1 %v8704_v31  ;;  %v7154_v44 = vld [vmem:[%s11997_s13 + $0xc90] sm:$0xff]  ;;  %v5457_v31 = vadd.f32 %v11330_v13, %v5169_v32  ;;  %v5465_v13 = vadd.f32 %v11367_v8, %v11297_v37  ;;  %v5463_v37 = vadd.f32 %v11357_v22, %v5169_v32  ;;  %v7171_v32 = vld [vmem:[%s11997_s13 + $0xd18] sm:$0xff] }
0x1fbd   :  { %v8716_v36 = vpack.c.bf16 %v7155_v4, %v7154_v44  ;;  %v5613_v52 = vadd.f32 %v11399_v59, %v11558_v30  ;;  %v7157_v59 = vld [vmem:[%s11997_s13 + $0xca8] sm:$0xff]  ;;  %v7172_v44 = vld [vmem:[%s11997_s13 + $0xd20] sm:$0xff]  ;;  %v7190_v4 = vld [vmem:[%s11997_s13 + $0xdb0] sm:$0xff] }
0x1fbe   :  { %v5873_v8 = vmax.f32 %v5465_v13, 0.0  ;;  %v5872_v14 = vmax.f32 %v5463_v37, 0.0  ;;  %v8720_v24 = vpack.c.bf16 %v7157_v59, %v7156_v11  ;;  %v7161_v37 = vld [vmem:[%s11997_s13 + $0xcc8] sm:$0xff]  ;;  %v7162_v59 = vld [vmem:[%s11997_s13 + $0xcd0] sm:$0xff] }
0x1fbf   :  { %8675 = vmatpush3.bf16.msra.mxu0 %v8674_v7  ;;  %8707 = vmatpush3.bf16.msra.mxu1 %v8706_v45  ;;  %v11562_v7 = vrot.slane %v11524_v50, %v9840_v5  ;;  %v8714_v45 = vpack.c.bf16 %v7137_v12, %v7136_v60  ;;  %v7139_v5 = vld [vmem:[%s11997_s13 + $0xc18] sm:$0xff]  ;;  %v8750_v60 = vpack.c.bf16 %v7171_v32, %v7170_v33  ;;  %v7140_v12 = vld [vmem:[%s11997_s13 + $0xc20] sm:$0xff]  ;;  %v7177_v11 = vld [vmem:[%s11997_s13 + $0xd48] sm:$0xff] }
0x1fc0   :  { %8677 = vmatprep.subr.bf16.mxu0 %v8676_v39  ;;  %8709 = vmatprep.subr.bf16.mxu1 %v8708_v63  ;;  %v5856_v39 = vmax.f32 %v5457_v31, 0.0  ;;  %v5858_v63 = vmax.f32 %v5534_v54, 0.0  ;;  %v8718_v48 = vpack.c.bf16 %v7139_v5, %v7138_v58  ;;  %v7173_v31 = vld [vmem:[%s11997_s13 + $0xd28] sm:$0xff]  ;;  %v7158_v54 = vld [vmem:[%s11997_s13 + $0xcb0] sm:$0xff]  ;;  %v7176_v32 = vld [vmem:[%s11997_s13 + $0xd40] sm:$0xff] }
0x1fc1   :  { %v5690_v22 = vadd.f32 %v11401_v1, %v11562_v7  ;;  %v7188_v1 = vld [vmem:[%s11997_s13 + $0xda0] sm:$0xff]  ;;  %v8754_v13 = vpack.c.bf16 %v7173_v31, %v7172_v44  ;;  %v7193_v58 = vld [vmem:[%s11997_s13 + $0xdc8] sm:$0xff] }
0x1fc2   :  { %v8752_v38 = vpack.c.bf16 %v7189_v42, %v7188_v1  ;;  %v8760_v33 = vpack.c.bf16 %v7193_v58, %v7192_v2  ;;  %v7163_v1 = vld [vmem:[%s11997_s13 + $0xcd8] sm:$0xff]  ;;  %v7194_v42 = vld [vmem:[%s11997_s13 + $0xdd0] sm:$0xff]  ;;  %v7165_v44 = vld [vmem:[%s11997_s13 + $0xce8] sm:$0xff] }
0x1fc3   :  { %8679 = vmatpush3.bf16.msra.mxu0 %v8678_v15  ;;  %8711 = vmatpush3.bf16.msra.mxu1 %v8710_v26  ;;  %v7141_v15 = vld [vmem:[%s11997_s13 + $0xc28] sm:$0xff]  ;;  %v5861_v26 = vmax.f32 %v5613_v52, 0.0  ;;  %v7196_v31 = vld [vmem:[%s11997_s13 + $0xde0] sm:$0xff] }
0x1fc4   :  { %8713 = vmatprep.subr.bf16.mxu0 %v8712_v27  ;;  %8745 = vmatprep.subr.bf16.mxu1 %v8744_v16  ;;  %v5863_v27 = vmax.f32 %v5690_v22, 0.0  ;;  %v7159_v16 = vld [vmem:[%s11997_s13 + $0xcb8] sm:$0xff]  ;;  %v8722_v51 = vpack.c.bf16 %v7141_v15, %v7140_v12  ;;  %v7145_v52 = vld [vmem:[%s11997_s13 + $0xc48] sm:$0xff]  ;;  %v8732_v15 = vpack.c.bf16 %v7163_v1, %v7162_v59  ;;  %v7200_v1 = vld [vmem:[%s11997_s13 + $0xe00] sm:$0xff] }
0x1fc5   :  { %v7147_v12 = vld [vmem:[%s11997_s13 + $0xc58] sm:$0xff]  ;;  %v7249_v59 = vld [vmem:[%s11997_s13 + $0xf88] sm:$0xff] }
0x1fc6   :  { %6364 = vmatmul.mubr.f32.vlgmr.msra.gmra.mrb[86].mxu0 %v5856_v39  ;;  %6439 = vmatmul.mubr.f32.vlgmr.msra.gmra.mrb[90].mxu1 %v5858_v63  ;;  %v7175_v39 = vld [vmem:[%s11997_s13 + $0xd38] sm:$0xff]  ;;  %v7160_v63 = vld [vmem:[%s11997_s13 + $0xcc0] sm:$0xff] }
0x1fc7   :  { %6368 = vmatprep.mubr.f32.mxu0 %v5873_v8  ;;  %6443 = vmatprep.mubr.f32.mxu1 %v5875_v49  ;;  %v7144_v49 = vld [vmem:[%s11997_s13 + $0xc40] sm:$0xff]  ;;  %v8728_v22 = vpack.c.bf16 %v7161_v37, %v7160_v63  ;;  %v7199_v63 = vld [vmem:[%s11997_s13 + $0xdf8] sm:$0xff]  ;;  %v5185_v37 = vrot.slane %v11524_v50, %v9826_v53 }
0x1fc8   :  { %8715 = vmatpush3.bf16.msra.mxu0 %v8714_v45  ;;  %8747 = vmatpush3.bf16.msra.mxu1 %v8746_v0  ;;  %v7143_v45 = vld [vmem:[%s11997_s13 + $0xc38] sm:$0xff]  ;;  %v8724_v0 = vpack.c.bf16 %v7159_v16, %v7158_v54  ;;  %v7197_v54 = vld [vmem:[%s11997_s13 + $0xde8] sm:$0xff] }
0x1fc9   :  { %8717 = vmatprep.subr.bf16.mxu0 %v8716_v36  ;;  %8749 = vmatprep.subr.bf16.mxu1 %v8748_v25  ;;  %v8756_v36 = vpack.c.bf16 %v7191_v56, %v7190_v4  ;;  %v7174_v25 = vld [vmem:[%s11997_s13 + $0xd30] sm:$0xff]  ;;  %v8726_v5 = vpack.c.bf16 %v7143_v45, %v7142_v35  ;;  %v7148_v56 = vld [vmem:[%s11997_s13 + $0xc60] sm:$0xff]  ;;  %v8768_v35 = vpack.c.bf16 %v7197_v54, %v7196_v31  ;;  %v7251_v31 = vld [vmem:[%s11997_s13 + $0xf98] sm:$0xff] }
0x1fca   :  { %6369 = vmatmul.mubr.f32.gmra.mrb[88].mxu0 %v5872_v14  ;;  %6444 = vmatmul.mubr.f32.gmra.mrb[92].mxu1 %v5874_v46  ;;  %v8758_v8 = vpack.c.bf16 %v7175_v39, %v7174_v25  ;;  %v7195_v14 = vld [vmem:[%s11997_s13 + $0xdd8] sm:$0xff]  ;;  %v8730_v46 = vpack.c.bf16 %v7145_v52, %v7144_v49  ;;  %v7180_v45 = vld [vmem:[%s11997_s13 + $0xd60] sm:$0xff]  ;;  %v7198_v39 = vld [vmem:[%s11997_s13 + $0xdf0] sm:$0xff]  ;;  %v5193_v52 = vrot.slane %v11524_v50, %v9829_v55 }
0x1fcb   :  { %6513 = vmatprep.mubr.f32.mxu0 %v5861_v26  ;;  %6588 = vmatprep.mubr.f32.mxu1 %v5863_v27  ;;  %v8764_v26 = vpack.c.bf16 %v7195_v14, %v7194_v42  ;;  %v7178_v27 = vld [vmem:[%s11997_s13 + $0xd50] sm:$0xff]  ;;  %v7167_v25 = vld [vmem:[%s11997_s13 + $0xcf8] sm:$0xff]  ;;  %v7248_v55 = vld [vmem:[%s11997_s13 + $0xf80] sm:$0xff]  ;;  %v11774_v54 = vrot.slane %v11524_v50, %v9857_v3 }
0x1fcc   :  { %8719 = vmatpush3.bf16.msra.mxu0 %v8718_v48  ;;  %8751 = vmatpush3.bf16.msra.mxu1 %v8750_v60  ;;  %v8762_v48 = vpack.c.bf16 %v7177_v11, %v7176_v32  ;;  %v7146_v60 = vld [vmem:[%s11997_s13 + $0xc50] sm:$0xff]  ;;  %v7216_v32 = vld [vmem:[%s11997_s13 + $0xe80] sm:$0xff]  ;;  %v7217_v11 = vld [vmem:[%s11997_s13 + $0xe88] sm:$0xff] }
0x1fcd   :  { %8721 = vmatprep.subr.bf16.mxu0 %v8720_v24  ;;  %8753 = vmatprep.subr.bf16.mxu1 %v8752_v38  ;;  %v7179_v24 = vld [vmem:[%s11997_s13 + $0xd58] sm:$0xff]  ;;  %v7164_v38 = vld [vmem:[%s11997_s13 + $0xce0] sm:$0xff]  ;;  %v8734_v16 = vpack.c.bf16 %v7147_v12, %v7146_v60  ;;  %v7182_v49 = vld [vmem:[%s11997_s13 + $0xd70] sm:$0xff] }
0x1fce   :  { %v8766_v4 = vpack.c.bf16 %v7179_v24, %v7178_v27  ;;  %v7201_v42 = vld [vmem:[%s11997_s13 + $0xe08] sm:$0xff]  ;;  %v7232_v60 = vld [vmem:[%s11997_s13 + $0xf00] sm:$0xff]  ;;  %v5688_v27 = vadd.f32 %v11391_v62, %v5193_v52  ;;  %v8808_v24 = vpack.c.bf16 %v7249_v59, %v7248_v55  ;;  %v5696_v62 = vadd.f32 %v11433_v41, %v11562_v7  ;;  %v7202_v3 = vld [vmem:[%s11997_s13 + $0xe10] sm:$0xff] }
0x1fcf   :  { %v7233_v12 = vld [vmem:[%s11997_s13 + $0xf08] sm:$0xff]  ;;  %v5694_v41 = vadd.f32 %v11423_v61, %v5193_v52  ;;  %v7234_v61 = vld [vmem:[%s11997_s13 + $0xf10] sm:$0xff]  ;;  %v7223_v55 = vld [vmem:[%s11997_s13 + $0xeb8] sm:$0xff] }
0x1fd0   :  { %8723 = vmatpush3.bf16.msra.mxu0 %v8722_v51  ;;  %8755 = vmatpush3.bf16.msra.mxu1 %v8754_v13  ;;  %v7149_v51 = vld [vmem:[%s11997_s13 + $0xc68] sm:$0xff]  ;;  %v8736_v13 = vpack.c.bf16 %v7165_v44, %v7164_v38  ;;  %v7219_v38 = vld [vmem:[%s11997_s13 + $0xe98] sm:$0xff]  ;;  %v7250_v44 = vld [vmem:[%s11997_s13 + $0xf90] sm:$0xff]  ;;  %v5879_v7 = vmax.f32 %v5696_v62, 0.0 }
0x1fd1   :  { %8725 = vmatprep.subr.bf16.mxu0 %v8724_v0  ;;  %8757 = vmatprep.subr.bf16.mxu1 %v8756_v36  ;;  %v7181_v0 = vld [vmem:[%s11997_s13 + $0xd68] sm:$0xff]  ;;  %v7166_v36 = vld [vmem:[%s11997_s13 + $0xcf0] sm:$0xff]  ;;  %v8738_v2 = vpack.c.bf16 %v7149_v51, %v7148_v56  ;;  %v8810_v56 = vpack.c.bf16 %v7233_v12, %v7232_v60  ;;  %v7208_v62 = vld [vmem:[%s11997_s13 + $0xe40] sm:$0xff] }
0x1fd2   :  { %v8770_v58 = vpack.c.bf16 %v7181_v0, %v7180_v45  ;;  %v8740_v53 = vpack.c.bf16 %v7167_v25, %v7166_v36  ;;  %v5862_v45 = vmax.f32 %v5688_v27, 0.0  ;;  %v5767_v0 = vadd.f32 %v11463_v28, %v11774_v54  ;;  %v7235_v36 = vld [vmem:[%s11997_s13 + $0xf18] sm:$0xff]  ;;  %v7220_v25 = vld [vmem:[%s11997_s13 + $0xea0] sm:$0xff]  ;;  %v7221_v28 = vld [vmem:[%s11997_s13 + $0xea8] sm:$0xff] }
0x1fd3   :  { %v7254_v59 = vld [vmem:[%s11997_s13 + $0xfb0] sm:$0xff]  ;;  %v7224_v27 = vld [vmem:[%s11997_s13 + $0xec0] sm:$0xff] }
0x1fd4   :  { %8727 = vmatpush3.bf16.msra.mxu0 %v8726_v5  ;;  %8759 = vmatpush3.bf16.msra.mxu1 %v8758_v8  ;;  %v7150_v5 = vld [vmem:[%s11997_s13 + $0xc70] sm:$0xff]  ;;  %v7151_v8 = vld [vmem:[%s11997_s13 + $0xc78] sm:$0xff] }
0x1fd5   :  { %8729 = vmatprep.subr.bf16.mxu0 %v8728_v22  ;;  %8761 = vmatprep.subr.bf16.mxu1 %v8760_v33  ;;  %v8772_v22 = vpack.c.bf16 %v7199_v63, %v7198_v39  ;;  %v7183_v33 = vld [vmem:[%s11997_s13 + $0xd78] sm:$0xff]  ;;  %v8742_v14 = vpack.c.bf16 %v7151_v8, %v7150_v5  ;;  %v7253_v39 = vld [vmem:[%s11997_s13 + $0xfa8] sm:$0xff]  ;;  %v7204_v5 = vld [vmem:[%s11997_s13 + $0xe20] sm:$0xff] }
0x1fd6   :  { %v7205_v8 = vld [vmem:[%s11997_s13 + $0xe28] sm:$0xff] }
0x1fd8   :  { %8731 = vmatpush3.bf16.msra.mxu0 %v8730_v46  ;;  %8763 = vmatpush3.bf16.msra.mxu1 %v8762_v48  ;;  %v8774_v46 = vpack.c.bf16 %v7183_v33, %v7182_v49  ;;  %v8776_v48 = vpack.c.bf16 %v7217_v11, %v7216_v32  ;;  %v5865_v49 = vmax.f32 %v5767_v0, 0.0  ;;  %v7236_v33 = vld [vmem:[%s11997_s13 + $0xf20] sm:$0xff]  ;;  %v7237_v32 = vld [vmem:[%s11997_s13 + $0xf28] sm:$0xff]  ;;  %v7222_v11 = vld [vmem:[%s11997_s13 + $0xeb0] sm:$0xff] }
0x1fd9   :  { %8733 = vmatprep.subr.bf16.mxu0 %v8732_v15  ;;  %8765 = vmatprep.subr.bf16.mxu1 %v8764_v26  ;;  %v7218_v15 = vld [vmem:[%s11997_s13 + $0xe90] sm:$0xff]  ;;  %v5611_v26 = vadd.f32 %v11389_v29, %v5185_v37  ;;  %v5619_v29 = vadd.f32 %v11431_v40, %v11558_v30  ;;  %v5617_v40 = vadd.f32 %v11421_v17, %v5185_v37  ;;  %v5878_v37 = vmax.f32 %v5694_v41, 0.0  ;;  %v7211_v0 = vld [vmem:[%s11997_s13 + $0xe58] sm:$0xff] }
0x1fda   :  { %v8780_v51 = vpack.c.bf16 %v7219_v38, %v7218_v15  ;;  %v8788_v60 = vpack.c.bf16 %v7223_v55, %v7222_v11  ;;  %v7238_v15 = vld [vmem:[%s11997_s13 + $0xf30] sm:$0xff]  ;;  %v7256_v38 = vld [vmem:[%s11997_s13 + $0xfc0] sm:$0xff]  ;;  %v7263_v11 = vld [vmem:[%s11997_s13 + $0xff8] sm:$0xff]  ;;  %v5201_v55 = vrot.slane %v11524_v50, %v10039_v23 }
0x1fdb   :  { %v5877_v30 = vmax.f32 %v5619_v29, 0.0  ;;  %v5876_v63 = vmax.f32 %v5617_v40, 0.0  ;;  %v7227_v40 = vld [vmem:[%s11997_s13 + $0xed8] sm:$0xff]  ;;  %v7258_v41 = vld [vmem:[%s11997_s13 + $0xfd0] sm:$0xff] }
0x1fdc   :  { %8735 = vmatpush3.bf16.msra.mxu0 %v8734_v16  ;;  %8767 = vmatpush3.bf16.msra.mxu1 %v8766_v4  ;;  %v11778_v16 = vrot.slane %v11524_v50, %v9878_v19  ;;  %v8778_v4 = vpack.c.bf16 %v7201_v42, %v7200_v1  ;;  %v7203_v19 = vld [vmem:[%s11997_s13 + $0xe18] sm:$0xff]  ;;  %v8786_v42 = vpack.c.bf16 %v7205_v8, %v7204_v5  ;;  %v7213_v5 = vld [vmem:[%s11997_s13 + $0xe68] sm:$0xff]  ;;  %v7246_v23 = vld [vmem:[%s11997_s13 + $0xf70] sm:$0xff] }
0x1fdd   :  { %8737 = vmatprep.subr.bf16.mxu0 %v8736_v13  ;;  %8769 = vmatprep.subr.bf16.mxu1 %v8768_v35  ;;  %v8812_v13 = vpack.c.bf16 %v7251_v31, %v7250_v44  ;;  %v5860_v35 = vmax.f32 %v5611_v26, 0.0  ;;  %v7255_v1 = vld [vmem:[%s11997_s13 + $0xfb8] sm:$0xff]  ;;  %v7257_v44 = vld [vmem:[%s11997_s13 + $0xfc8] sm:$0xff] }
0x1fde   :  { %v5844_v17 = vadd.f32 %v11465_v21, %v11778_v16  ;;  %v7252_v21 = vld [vmem:[%s11997_s13 + $0xfa0] sm:$0xff]  ;;  %v8820_v12 = vpack.c.bf16 %v7255_v1, %v7254_v59  ;;  %v7239_v26 = vld [vmem:[%s11997_s13 + $0xf38] sm:$0xff] }
0x1fdf   :  { %v8822_v29 = vpack.c.bf16 %v7239_v26, %v7238_v15 }
0x1fe0   :  { %8739 = vmatpush3.bf16.msra.mxu0 %v8738_v2  ;;  %8771 = vmatpush3.bf16.msra.mxu1 %v8770_v58  ;;  %v8782_v2 = vpack.c.bf16 %v7203_v19, %v7202_v3  ;;  %v8814_v58 = vpack.c.bf16 %v7235_v36, %v7234_v61  ;;  %v5867_v52 = vmax.f32 %v5844_v17, 0.0  ;;  %v7259_v3 = vld [vmem:[%s11997_s13 + $0xfd8] sm:$0xff]  ;;  %v7242_v36 = vld [vmem:[%s11997_s13 + $0xf50] sm:$0xff] }
0x1fe1   :  { %8741 = vmatprep.subr.bf16.mxu0 %v8740_v53  ;;  %8773 = vmatprep.subr.bf16.mxu1 %v8772_v22  ;;  %v8784_v53 = vpack.c.bf16 %v7221_v28, %v7220_v25  ;;  %v8816_v22 = vpack.c.bf16 %v7253_v39, %v7252_v21  ;;  %v8828_v61 = vpack.c.bf16 %v7259_v3, %v7258_v41  ;;  %v7243_v25 = vld [vmem:[%s11997_s13 + $0xf58] sm:$0xff]  ;;  %v7228_v28 = vld [vmem:[%s11997_s13 + $0xee0] sm:$0xff]  ;;  %v7229_v21 = vld [vmem:[%s11997_s13 + $0xee8] sm:$0xff] }
0x1fe2   :  { %v7260_v39 = vld [vmem:[%s11997_s13 + $0xfe0] sm:$0xff]  ;;  %v8800_v8 = vpack.c.bf16 %v7229_v21, %v7228_v28 }
0x1fe4   :  { %8743 = vmatpush3.bf16.msra.mxu0 %v8742_v14  ;;  %8775 = vmatpush3.bf16.msra.mxu1 %v8774_v46  ;;  %v8818_v14 = vpack.c.bf16 %v7237_v32, %v7236_v33  ;;  %v7206_v46 = vld [vmem:[%s11997_s13 + $0xe30] sm:$0xff]  ;;  %v7231_v33 = vld [vmem:[%s11997_s13 + $0xef8] sm:$0xff] }
0x1fe5   :  { %8777 = vmatprep.subr.bf16.mxu0 %v8776_v48  ;;  %8809 = vmatprep.subr.bf16.mxu1 %v8808_v24  ;;  %v7207_v48 = vld [vmem:[%s11997_s13 + $0xe38] sm:$0xff]  ;;  %v7225_v24 = vld [vmem:[%s11997_s13 + $0xec8] sm:$0xff]  ;;  %v7262_v32 = vld [vmem:[%s11997_s13 + $0xff0] sm:$0xff] }
0x1fe6   :  { %v8790_v31 = vpack.c.bf16 %v7207_v48, %v7206_v46  ;;  %v8836_v48 = vpack.c.bf16 %v7263_v11, %v7262_v32 }
0x1fe7   :  { %6514 = vmatmul.mubr.f32.vlgmr.msra.gmra.mrb[90].mxu0 %v5860_v35  ;;  %6589 = vmatmul.mubr.f32.vlgmr.msra.gmra.mrb[94].mxu1 %v5862_v45  ;;  %v7241_v35 = vld [vmem:[%s11997_s13 + $0xf48] sm:$0xff]  ;;  %v7226_v45 = vld [vmem:[%s11997_s13 + $0xed0] sm:$0xff] }
0x1fe8   :  { %6518 = vmatprep.mubr.f32.mxu0 %v5877_v30  ;;  %6593 = vmatprep.mubr.f32.mxu1 %v5879_v7  ;;  %v7210_v7 = vld [vmem:[%s11997_s13 + $0xe50] sm:$0xff]  ;;  %v8796_v17 = vpack.c.bf16 %v7227_v40, %v7226_v45 }
0x1fe9   :  { %8779 = vmatpush3.bf16.msra.mxu0 %v8778_v4  ;;  %8811 = vmatpush3.bf16.msra.mxu1 %v8810_v56  ;;  %v7209_v4 = vld [vmem:[%s11997_s13 + $0xe48] sm:$0xff]  ;;  %v8792_v56 = vpack.c.bf16 %v7225_v24, %v7224_v27  ;;  %v5773_v27 = vadd.f32 %v11502_v47, %v11774_v54  ;;  %v5850_v24 = vadd.f32 %v11504_v6, %v11778_v16  ;;  %v7265_v54 = vld [vmem:[%s11998_s14 + $0x1] ss:$0 sm:$0xff] }
0x1fea   :  { %8781 = vmatprep.subr.bf16.mxu0 %v8780_v51  ;;  %8813 = vmatprep.subr.bf16.mxu1 %v8812_v13  ;;  %v8824_v51 = vpack.c.bf16 %v7257_v44, %v7256_v38  ;;  %v7240_v13 = vld [vmem:[%s11997_s13 + $0xf40] sm:$0xff]  ;;  %v8794_v19 = vpack.c.bf16 %v7209_v4, %v7208_v62 }
0x1feb   :  { %6519 = vmatmul.mubr.f32.gmra.mrb[92].mxu0 %v5876_v63  ;;  %6594 = vmatmul.mubr.f32.gmra.mrb[96].mxu1 %v5878_v37  ;;  %v8826_v30 = vpack.c.bf16 %v7241_v35, %v7240_v13  ;;  %v7261_v63 = vld [vmem:[%s11997_s13 + $0xfe8] sm:$0xff]  ;;  %v8798_v37 = vpack.c.bf16 %v7211_v0, %v7210_v7  ;;  %v5881_v62 = vmax.f32 %v5773_v27, 0.0 }
0x1fec   :  { %6663 = vmatprep.mubr.f32.mxu0 %v5865_v49  ;;  %6738 = vmatprep.mubr.f32.mxu1 %v5867_v52  ;;  %v8832_v49 = vpack.c.bf16 %v7261_v63, %v7260_v39  ;;  %v7244_v52 = vld [vmem:[%s11997_s13 + $0xf60] sm:$0xff] }
0x1fed   :  { %8783 = vmatpush3.bf16.msra.mxu0 %v8782_v2  ;;  %8815 = vmatpush3.bf16.msra.mxu1 %v8814_v58  ;;  %v8830_v2 = vpack.c.bf16 %v7243_v25, %v7242_v36  ;;  %v7212_v58 = vld [vmem:[%s11997_s13 + $0xe60] sm:$0xff] }
0x1fee   :  { %8785 = vmatprep.subr.bf16.mxu0 %v8784_v53  ;;  %8817 = vmatprep.subr.bf16.mxu1 %v8816_v22  ;;  %v7245_v53 = vld [vmem:[%s11997_s13 + $0xf68] sm:$0xff]  ;;  %v7230_v22 = vld [vmem:[%s11997_s13 + $0xef0] sm:$0xff]  ;;  %v8802_v59 = vpack.c.bf16 %v7213_v5, %v7212_v58 }
0x1fef   :  { %v8834_v1 = vpack.c.bf16 %v7245_v53, %v7244_v52  ;;  %v8804_v46 = vpack.c.bf16 %v7231_v33, %v7230_v22 }
0x1ff1   :  { %8787 = vmatpush3.bf16.msra.mxu0 %v8786_v42  ;;  %8819 = vmatpush3.bf16.msra.mxu1 %v8818_v14  ;;  %v7214_v42 = vld [vmem:[%s11997_s13 + $0xe70] sm:$0xff]  ;;  %v5209_v14 = vrot.slane %v11524_v50, %v10052_v34  ;;  %v5765_v50 = vadd.f32 %v11453_v57, %v5201_v55  ;;  %v5883_v57 = vmax.f32 %v5850_v24, 0.0 }
0x1ff2   :  { %8789 = vmatprep.subr.bf16.mxu0 %v8788_v60  ;;  %8821 = vmatprep.subr.bf16.mxu1 %v8820_v12  ;;  %v7215_v60 = vld [vmem:[%s11997_s13 + $0xe78] sm:$0xff] }
0x1ff3   :  { %v7247_v12 = vld [vmem:[%s11997_s13 + $0xf78] sm:$0xff]  ;;  %v8806_v15 = vpack.c.bf16 %v7215_v60, %v7214_v42  ;;  %v5842_v26 = vadd.f32 %v11455_v43, %v5209_v14  ;;  %v5864_v38 = vmax.f32 %v5765_v50, 0.0 }
0x1ff4   :  { %v8838_v34 = vpack.c.bf16 %v7247_v12, %v7246_v23 }
0x1ff5   :  { %8791 = vmatpush3.bf16.msra.mxu0 %v8790_v31  ;;  %8823 = vmatpush3.bf16.msra.mxu1 %v8822_v29  ;;  %v5866_v44 = vmax.f32 %v5842_v26, 0.0  ;;  %v5771_v31 = vadd.f32 %v11487_v10, %v5201_v55  ;;  %v5848_v29 = vadd.f32 %v11489_v9, %v5209_v14 }
0x1ff6   :  { %8793 = vmatprep.subr.bf16.mxu0 %v8792_v56  ;;  %8825 = vmatprep.subr.bf16.mxu1 %v8824_v51 }
0x1ff7   :  { %v5880_v43 = vmax.f32 %v5771_v31, 0.0  ;;  %v5882_v4 = vmax.f32 %v5848_v29, 0.0 }
0x1ff9   :  { %8795 = vmatpush3.bf16.msra.mxu0 %v8794_v19  ;;  %8827 = vmatpush3.bf16.msra.mxu1 %v8826_v30 }
0x1ffa   :  { %8797 = vmatprep.subr.bf16.mxu0 %v8796_v17  ;;  %8829 = vmatprep.subr.bf16.mxu1 %v8828_v61 }
0x1ffd   :  { %8799 = vmatpush3.bf16.msra.mxu0 %v8798_v37  ;;  %8831 = vmatpush3.bf16.msra.mxu1 %v8830_v2 }
0x1ffe   :  { %8801 = vmatprep.subr.bf16.mxu0 %v8800_v8  ;;  %8833 = vmatprep.subr.bf16.mxu1 %v8832_v49 }
0x2001   :  { %8803 = vmatpush3.bf16.msra.mxu0 %v8802_v59  ;;  %8835 = vmatpush3.bf16.msra.mxu1 %v8834_v1 }
0x2002   :  { %8805 = vmatprep.subr.bf16.mxu0 %v8804_v46  ;;  %8837 = vmatprep.subr.bf16.mxu1 %v8836_v48 }
0x2005   :  { %8807 = vmatpush3.bf16.msra.mxu0 %v8806_v15  ;;  %8839 = vmatpush3.bf16.msra.mxu1 %v8838_v34 }
0x2008   :  { %6664 = vmatmul.mubr.f32.vlgmr.msra.gmra.mrb[94].mxu0 %v5864_v38  ;;  %6739 = vmatmul.mubr.f32.vlgmr.msra.gmra.mrb[98].mxu1 %v5866_v44 }
0x2009   :  { %6668 = vmatprep.mubr.f32.mxu0 %v5881_v62  ;;  %6743 = vmatprep.mubr.f32.mxu1 %v5883_v57 }
0x200c   :  { %6669 = vmatmul.mubr.f32.gmra.mrb[96].mxu0 %v5880_v43  ;;  %6744 = vmatmul.mubr.f32.gmra.mrb[100].mxu1 %v5882_v4 }
0x2079   :  { %v7692_v47 = vpop.f32.mrb[82].mxu0  ;;  %v7730_v6 = vpop.f32.mrb[86].mxu1 }
0x207a   :  { %v7693_v16 = vpop.f32.mrb[83].mxu0  ;;  %v7731_v10 = vpop.f32.mrb[87].mxu1 }
0x207b   :  { %v7694_v56 = vadd.f32 %v7693_v16, %v7692_v47  ;;  %v7732_v9 = vadd.f32 %v7731_v10, %v7730_v6 }
0x207d   :  { %v6216_v51 = vadd.f32 %v7694_v56, %v7265_v54  ;;  %v7695_v13 = vpop.f32.mrb[84].mxu0  ;;  %v7733_v35 = vpop.f32.mrb[88].mxu1 }
0x207e   :  { %v7696_v45 = vpop.f32.mrb[85].mxu0  ;;  %v7734_v40 = vpop.f32.mrb[89].mxu1 }
0x207f   :  { %v6291_v41 = vadd.f32 %v7732_v9, %v6216_v51  ;;  %v7697_v3 = vadd.f32 %v7696_v45, %v7695_v13  ;;  %v7735_v19 = vadd.f32 %v7734_v40, %v7733_v35 }
0x2081   :  { %v6221_v30 = vadd.f32 %v7697_v3, %v7265_v54 }
0x2083   :  { %v6296_v7 = vadd.f32 %v7735_v19, %v6221_v30 }
0x2099   :  { %v7768_v0 = vpop.f32.mrb[86].mxu0  ;;  %v7806_v17 = vpop.f32.mrb[90].mxu1 }
0x209a   :  { %v7769_v61 = vpop.f32.mrb[87].mxu0  ;;  %v7807_v36 = vpop.f32.mrb[91].mxu1 }
0x209b   :  { %v7770_v25 = vadd.f32 %v7769_v61, %v7768_v0  ;;  %v7808_v28 = vadd.f32 %v7807_v36, %v7806_v17 }
0x209d   :  { %v6366_v21 = vadd.f32 %v7770_v25, %v6291_v41  ;;  %v7771_v39 = vpop.f32.mrb[88].mxu0  ;;  %v7809_v63 = vpop.f32.mrb[92].mxu1 }
0x209e   :  { %v7772_v37 = vpop.f32.mrb[89].mxu0  ;;  %v7810_v2 = vpop.f32.mrb[93].mxu1 }
0x209f   :  { %v6441_v58 = vadd.f32 %v7808_v28, %v6366_v21  ;;  %v7773_v5 = vadd.f32 %v7772_v37, %v7771_v39  ;;  %v7811_v8 = vadd.f32 %v7810_v2, %v7809_v63 }
0x20a1   :  { %v6371_v49 = vadd.f32 %v7773_v5, %v6296_v7 }
0x20a3   :  { %v6446_v52 = vadd.f32 %v7811_v8, %v6371_v49  ;;  %v7266_v49 = vld [vmem:[%s11999_s15] ss:$0 sm:$0xff]  ;;  %s8962_s15 = scalar_lea.vmem %s6817_s29, 256 }
0x20a4   :  { %p8963_p0 = scmp.ne.s32.totalorder %s6817_s29, %s8962_s15  ;;  %p8968_p2 = scmp.lt.s32.totalorder %s8962_s15, %s8962_s15 }
0x20a6   :  { %p8969_p3 = por %p8968_p2, %p8967_p1 }
0x20a8   :  { %p8970_p4 = pnand %p8969_p3, %p8963_p0 }
0x20ba   :  { %v7844_v53 = vpop.f32.mrb[90].mxu0  ;;  %v7882_v22 = vpop.f32.mrb[94].mxu1 }
0x20bb   :  { %v7845_v33 = vpop.f32.mrb[91].mxu0  ;;  %v7883_v32 = vpop.f32.mrb[95].mxu1 }
0x20bc   :  { %v7846_v11 = vadd.f32 %v7845_v33, %v7844_v53  ;;  %v7884_v55 = vadd.f32 %v7883_v32, %v7882_v22  ;;  %v7267_v22 = vld [vmem:[%s12000_s16] ss:$0 sm:$0xff] }
0x20be   :  { %v6516_v59 = vadd.f32 %v7846_v11, %v6441_v58  ;;  %v7847_v1 = vpop.f32.mrb[92].mxu0  ;;  %v7885_v42 = vpop.f32.mrb[96].mxu1 }
0x20bf   :  { %v7848_v14 = vpop.f32.mrb[93].mxu0  ;;  %v7886_v46 = vpop.f32.mrb[97].mxu1 }
0x20c0   :  { %v6591_v48 = vadd.f32 %v7884_v55, %v6516_v59  ;;  %v7849_v60 = vadd.f32 %v7848_v14, %v7847_v1  ;;  %v7887_v23 = vadd.f32 %v7886_v46, %v7885_v42 }
0x20c2   :  { %v6521_v12 = vadd.f32 %v7849_v60, %v6446_v52 }
0x20c4   :  { %v6596_v15 = vadd.f32 %v7887_v23, %v6521_v12 }
0x20db   :  { %v7920_v34 = vpop.f32.mrb[94].mxu0  ;;  %v7958_v50 = vpop.f32.mrb[98].mxu1 }
0x20dc   :  { %v7921_v26 = vpop.f32.mrb[95].mxu0  ;;  %v7959_v27 = vpop.f32.mrb[99].mxu1 }
0x20dd   :  { %v7922_v24 = vadd.f32 %v7921_v26, %v7920_v34  ;;  %v7960_v38 = vadd.f32 %v7959_v27, %v7958_v50 }
0x20df   :  { %v6666_v44 = vadd.f32 %v7922_v24, %v6591_v48  ;;  %v7923_v31 = vpop.f32.mrb[96].mxu0  ;;  %v7961_v29 = vpop.f32.mrb[100].mxu1 }
0x20e0   :  { %v7924_v62 = vpop.f32.mrb[97].mxu0  ;;  %v7962_v57 = vpop.f32.mrb[101].mxu1 }
0x20e1   :  { %v6741_v43 = vadd.f32 %v7960_v38, %v6666_v44  ;;  %v7925_v4 = vadd.f32 %v7924_v62, %v7923_v31  ;;  %v7963_v47 = vadd.f32 %v7962_v57, %v7961_v29 }
0x20e3   :  { %v6671_v6 = vadd.f32 %v7925_v4, %v6596_v15  ;;  %v6749_v54 = vadd.f32 %v6741_v43, %v10786_v20 }
0x20e5   :  { %v6746_v16 = vadd.f32 %v7963_v47, %v6671_v6  ;;  %v6753_v10 = vsel %vm70_vm0, %v6749_v54, 0.0 }
0x20e6   :  { %6754 = vadd.xlane.f32.xlu0 %v6753_v10 }
0x20e7   :  { %v6750_v56 = vadd.f32 %v6746_v16, %v10783_v18 }
0x20e9   :  { %v6756_v9 = vsel %vm70_vm0, %v6750_v56, 0.0 }
0x20ea   :  { %6757 = vadd.xlane.f32.xlu1 %v6756_v9 }
0x2173   :  { %v6755_v51 = vpop.xlane.xlu0 %6754 }
0x2174   :  { %v6759_v13 = vmul.f32 0.03125, %v6755_v51 }
0x2176   :  { %v6761_v35 = vsub.f32 %v6749_v54, %v6759_v13 }
0x2177   :  { %v6758_v45 = vpop.xlane.xlu1 %6757 }
0x2178   :  { %v6760_v40 = vmul.f32 0.03125, %v6758_v45  ;;  %v6763_v41 = vmul.f32 %v6761_v35, %v6761_v35  ;;  %v6779_v52 = vmul.f32 %v7266_v49, %v6761_v35 }
0x217a   :  { %v6762_v3 = vsub.f32 %v6750_v56, %v6760_v40  ;;  %v6765_v19 = vsel %vm70_vm0, %v6763_v41, 0.0 }
0x217b   :  { %6766 = vadd.xlane.f32.xlu0 %v6765_v19 }
0x217c   :  { %v6764_v20 = vmul.f32 %v6762_v3, %v6762_v3  ;;  %v6780_v32 = vmul.f32 %v7266_v49, %v6762_v3 }
0x217e   :  { %v6768_v30 = vsel %vm70_vm0, %v6764_v20, 0.0 }
0x217f   :  { %6769 = vadd.xlane.f32.xlu1 %v6768_v30 }
0x2208   :  { %v6767_v7 = vpop.xlane.xlu0 %6766 }
0x2209   :  { %v6771_v0 = vmul.f32 0.032258064, %v6767_v7 }
0x220b   :  { %8954 = vrsqrt.f32 %v6771_v0  ;;  %vm6783_vm8 = vcmp.eq.f32.partialorder %v6771_v0, inf  ;;  %v6786_v25 = vand.u32 2147483648, %v6771_v0  ;;  %vm6785_vm9 = vcmp.eq.f32.partialorder %v6771_v0, 0.0 }
0x220c   :  { %v6770_v18 = vpop.xlane.xlu1 %6769 }
0x220d   :  { %v6772_v17 = vmul.f32 0.032258064, %v6770_v18 }
0x220f   :  { %8956 = vrsqrt.f32 %v6772_v17  ;;  %vm6790_vm10 = vcmp.eq.f32.partialorder %v6772_v17, inf  ;;  %v6793_v2 = vand.u32 2147483648, %v6772_v17  ;;  %vm6792_vm11 = vcmp.eq.f32.partialorder %v6772_v17, 0.0 }
0x2215   :  { %v8955_v61 = vpop.eup %8954 }
0x2216   :  { %v6782_v36 = vmul.f32 %v8955_v61, %v6771_v0 }
0x2218   :  { %v6784_v28 = vsel %vm6783_vm8, %v6771_v0, %v6782_v36 }
0x2219   :  { %v8957_v21 = vpop.eup %8956  ;;  %v6787_v39 = vsel %vm6785_vm9, %v6786_v25, %v6784_v28 }
0x221a   :  { %v6795_v63 = vadd.f32 1e-06, %v6787_v39  ;;  %v6789_v37 = vmul.f32 %v8957_v21, %v6772_v17 }
0x221c   :  { %8958 = vrcp.f32 %v6795_v63  ;;  %v6791_v58 = vsel %vm6790_vm10, %v6772_v17, %v6789_v37 }
0x221d   :  { %v6794_v5 = vsel %vm6792_vm11, %v6793_v2, %v6791_v58 }
0x221e   :  { %v6796_v8 = vadd.f32 1e-06, %v6794_v5 }
0x2220   :  { %8960 = vrcp.f32 %v6796_v8 }
0x2226   :  { %v8959_v53 = vpop.eup %8958 }
0x2227   :  { %v6798_v33 = vmul.f32 %v8959_v53, %v6779_v52 }
0x2229   :  { %v6807_v11 = vadd.f32 %v7267_v22, %v6798_v33 }
0x222a   :  { %v8961_v55 = vpop.eup %8960 }
0x222b   :  { %v6800_v59 = vmul.f32 %v8961_v55, %v6780_v32  ;;  %6809 = vst.msk [vmem:[#allocation2] sm:$0xff] %vm70_vm0, %v6807_v11 }
0x222d   :  { %v6808_v1 = vadd.f32 %v7267_v22, %v6800_v59 }
0x222f   :  { %6810 = vst.msk [vmem:[#allocation2 + $0x8] sm:$0xff] %vm70_vm0, %v6808_v1 }
0x2230   :  { %8973 = shalt.err (!%p8970_p4)
}
0x2231   :  { %s8974_s2 = scalar_lea.hbm %s12001_s17, 256 }
0x2232   :  { %p8975_p5 = scmp.ne.s32.totalorder %s12001_s17, %s8974_s2  ;;  %p8978_p6 = scmp.lt.u32.totalorder %s8974_s2, %s12001_s17 }
0x2234   :  { %p8980_p7 = pnand %p8978_p6, %p8975_p5 }
0x2236   :  { %8983 = shalt.err (!%p8980_p7)
}
0x2237   :  { %s9003_s18 = smov 128  }
0x2238   :  { %6822 = dma.vmem_to_hbm [thread:$0]  %s6817_s29, 256, %s12001_s17, [#allocation3], %s9003_s18, %s9003_s18, %s12037_s30  }
0x2239   :  { %8984 = dma.done.wait [#allocation3], 256  }
0x223a   :  { %8985 = vsyncadd [#allocation3], 4294967040 }
0x223b   :  { %6826 = vsyncpa [#allocation3], 1 }

</bundles_post_ra>
